<compile_context>
chip_gen: v7x
topology: tpu7x:2x2x1
jax: 0.10.0
libtpu: 0.0.40
codegen_flags: <defaults>
</compile_context>

<pallas_src>
import jax
import jax.numpy as jnp
from jax import lax
from jax.experimental import pallas as pl
from jax.experimental.pallas import tpu as pltpu


# -------------- one CrissCrossAttention block (single batch element) ---------

def _cca_block(x, y, w_ref, b_ref, mask):
    """x, y: (C, HW) channel-major activations (f32).
    w_ref: (2*CQP + C, C) packed [q_pad ; k_pad ; gamma*v] projection weights.
    b_ref: (2*CQP + C, 1) packed biases.
    mask : (HW, HW) additive criss-cross mask (0 allowed / -1e30 disallowed).
    Returns gamma*(out_H + out_W) + x  (gamma already folded into the v rows)."""
    c = x.shape[0]
    cqp2 = w_ref.shape[0] - c            # 2 * padded query/key channel count
    cqp = cqp2 // 2

    # Fused 1x1 projections, channel-major: (Cout, C) @ (C, HW) on the MXU.
    qk = (jnp.dot(w_ref[0:cqp2, :], x, preferred_element_type=jnp.float32)
          + b_ref[0:cqp2, :])                                    # (2*CQP, HW)
    v = (jnp.dot(w_ref[cqp2:cqp2 + c, :], y, preferred_element_type=jnp.float32)
         + b_ref[cqp2:cqp2 + c, :])                               # (C, HW)

    q = qk[0:cqp, :].astype(jnp.bfloat16)        # (CQP, HW), padded rows are 0
    k = qk[cqp:cqp2, :].astype(jnp.bfloat16)     # (CQP, HW)

    # e_t[key, query] = sum_c k[c, key] * q[c, query]  -> full (HW, HW) tile.
    e_t = lax.dot_general(k, q, (((0,), (0,)), ((), ())),
                          preferred_element_type=jnp.float32)
    e_t = e_t + mask                                             # criss-cross mask

    # Column softmax (per query pixel), f32 math; EUP reciprocal for the denom.
    m = jnp.max(e_t, axis=0, keepdims=True)                      # (1, HW)
    p = jnp.exp(e_t - m)
    z = jnp.sum(p, axis=0, keepdims=True)                        # (1, HW)
    a_t = (p * pl.reciprocal(z, approx=True)).astype(jnp.bfloat16)

    # out[c, q] = sum_key v[c, key] * a_t[key, q]  -> (C, HW), channel-major.
    out = jnp.dot(v.astype(jnp.bfloat16), a_t,
                  preferred_element_type=jnp.float32)
    return out + x                     # gamma already inside the value rows


# ---------------------------- fused CC32CC32 kernel --------------------------

def _cc32cc32_kernel(mask_ref, x_ref, y_ref,
                     w1_ref, b1_ref, w2_ref, b2_ref, o_ref):
    # x_ref / y_ref / o_ref blocks: (1, C, HW) -> lane-dense 256-wide slabs.
    mask = mask_ref[...]               # load once, reused by both blocks
    x = x_ref[0]                       # (C, HW)
    y = y_ref[0]

    o1 = _cca_block(x, y, w1_ref, b1_ref, mask)
    o2 = _cca_block(o1, o1, w2_ref, b2_ref, mask)

    o_ref[0] = o2                      # unmasked, full-lane dense store


# --------------------------------- wrapper ----------------------------------

def _prep_params(p, cq_pad=8):
    """Pack conv weights into one (2*cq_pad + C, C) weight + (.,1) bias.
    Query/key rows are zero-padded to cq_pad (sublane aligned, exact: the
    padded channels contribute 0 to the energies); gamma is folded into the
    value rows (exact: output is linear in v)."""
    wq, bq, wk, bk, wv, bv, gamma = p
    cq, c = wq.shape

    def pad(w, b):
        wp = jnp.zeros((cq_pad, c), jnp.float32).at[:cq, :].set(w)
        bp = jnp.zeros((cq_pad,), jnp.float32).at[:cq].set(b)
        return wp, bp

    wq_p, bq_p = pad(wq, bq)
    wk_p, bk_p = pad(wk, bk)
    w_pack = jnp.concatenate([wq_p, wk_p, gamma * wv], axis=0)          # (48, C)
    b_pack = jnp.concatenate([bq_p, bk_p, gamma * bv], axis=0).reshape(-1, 1)
    return w_pack, b_pack


@jax.jit
def cc32cc32(x_nchw, y_nchw, p1, p2):
    """CC32CC32.forward: two chained CrissCrossAttention(in_dim=32) modules."""
    B, C, H, W = x_nchw.shape
    HW = H * W
    w1, b1 = _prep_params(p1)
    w2, b2 = _prep_params(p2)

    # Additive criss-cross mask over flattened pixels, built ONCE here and
    # passed as a constant-indexed input (self pixel allowed exactly once).
    idx = jnp.arange(HW, dtype=jnp.int32)
    r = idx // W
    c = idx % W
    allowed = (r[:, None] == r[None, :]) | (c[:, None] == c[None, :])
    mask = jnp.where(allowed, 0.0, -1e30).astype(jnp.float32)            # (HW, HW)

    # NCHW with flattened spatial -> free reshape, no XLA transposes anywhere.
    x = x_nchw.reshape(B, C, HW)
    y = y_nchw.reshape(B, C, HW)

    def const_spec(shape):
        zeros = (0,) * len(shape)
        return pl.BlockSpec(shape, lambda b: zeros)

    act_spec = pl.BlockSpec((1, C, HW), lambda b: (b, 0, 0))

    out = pl.pallas_call(
        _cc32cc32_kernel,
        out_shape=jax.ShapeDtypeStruct((B, C, HW), jnp.float32),
        grid=(B,),
        in_specs=[const_spec((HW, HW)),          # mask
                  act_spec, act_spec,            # x, y
                  const_spec(w1.shape), const_spec(b1.shape),
                  const_spec(w2.shape), const_spec(b2.shape)],
        out_specs=pl.BlockSpec((1, C, HW), lambda b: (b, 0, 0)),
        compiler_params=pltpu.CompilerParams(
            dimension_semantics=("parallel",)),   # megacore batch sharding (v7x)
    )(mask, x, y, w1, b1, w2, b2)

    return out.reshape(B, C, H, W)


# ------------------------------- parameters ---------------------------------

def init_cca_params(key, in_dim):
    cq = in_dim // 8
    ks = jax.random.split(key, 6)
    scale = 0.1
    wq = scale * jax.random.normal(ks[0], (cq, in_dim), jnp.float32)
    bq = scale * jax.random.normal(ks[1], (cq,), jnp.float32)
    wk = scale * jax.random.normal(ks[2], (cq, in_dim), jnp.float32)
    bk = scale * jax.random.normal(ks[3], (cq,), jnp.float32)
    wv = scale * jax.random.normal(ks[4], (in_dim, in_dim), jnp.float32)
    bv = scale * jax.random.normal(ks[5], (in_dim,), jnp.float32)
    # NOTE: PyTorch initializes gamma = 0 (which makes the forward an identity);
    # we use a deterministic nonzero gamma so the attention path is exercised.
    gamma = jnp.float32(0.5)
    return (wq, bq, wk, bk, wv, bv, gamma)


# ------------------------- pure-JAX reference (NCHW) -------------------------

def _cca_reference(x, y, p):
    wq, bq, wk, bk, wv, bv, gamma = p

    def conv(inp, w, b):
        return jnp.einsum('bchw,oc->bohw', inp, w) + b[None, :, None, None]

    q = conv(x, wq, bq)
    k = conv(x, wk, bk)
    v = conv(y, wv, bv)
    B, C, H, W = x.shape
    e_h = jnp.einsum('bchw,bcjw->bhwj', q, k)
    diag = jnp.eye(H, dtype=bool)[None, :, None, :]
    e_h = jnp.where(diag, -jnp.inf, e_h)
    e_w = jnp.einsum('bchw,bchj->bhwj', q, k)
    att = jax.nn.softmax(jnp.concatenate([e_h, e_w], axis=-1), axis=-1)
    att_h = att[..., :H]
    att_w = att[..., H:]
    out_h = jnp.einsum('bcjw,bhwj->bchw', v, att_h)
    out_w = jnp.einsum('bchj,bhwj->bchw', v, att_w)
    return gamma * (out_h + out_w) + x


def cc32cc32_reference(x, y, p1, p2):
    o1 = _cca_reference(x, y, p1)
    return _cca_reference(o1, o1, p2)


# ----------------------------------- main ------------------------------------

if __name__ == "__main__":
    key = jax.random.PRNGKey(0)
    kx, ky, kp1, kp2 = jax.random.split(key, 4)
    B, C, H, W = 2, 32, 16, 16            # in_dim is fixed to 32 by the module
    x = jax.random.normal(kx, (B, C, H, W), jnp.float32)
    y = jax.random.normal(ky, (B, C, H, W), jnp.float32)
    p1 = init_cca_params(kp1, C)
    p2 = init_cca_params(kp2, C)

    out = cc32cc32(x, y, p1, p2)
    out = jax.block_until_ready(out)
    assert out.shape == (B, C, H, W)

    ref = cc32cc32_reference(x, y, p1, p2)
    if not bool(jnp.allclose(out, ref, rtol=2e-2, atol=2e-2)):
        max_err = float(jnp.max(jnp.abs(out - ref)))
        raise AssertionError(f"Pallas result mismatch vs reference, max|err|={max_err}")

    print("KERNEL_OK")
</pallas_src>

<mosaic_0001>
module attributes {stable_mosaic.version = 11 : i64} {
  func.func @_cc32cc32_kernel(%arg0: i32, %arg1: memref<256x256xf32, #tpu.memory_space<vmem>>, %arg2: memref<1x32x256xf32, #tpu.memory_space<vmem>>, %arg3: memref<1x32x256xf32, #tpu.memory_space<vmem>>, %arg4: memref<48x32xf32, #tpu.memory_space<vmem>>, %arg5: memref<48x1xf32, #tpu.memory_space<vmem>>, %arg6: memref<48x32xf32, #tpu.memory_space<vmem>>, %arg7: memref<48x1xf32, #tpu.memory_space<vmem>>, %arg8: memref<1x32x256xf32, #tpu.memory_space<vmem>>) attributes {dimension_semantics = [#tpu.dimension_semantics<parallel>], iteration_bounds = array<i64: 2>, scalar_prefetch = 0 : i64, scratch_operands = 0 : i64, tpu.core_type = #tpu.core_type<tc>, window_params = [{pipeline_mode = #tpu.pipeline_mode<synchronous>, transform_indices = @transform_0, window_bounds = array<i64: 256, 256>}, {transform_indices = @transform_1, window_bounds = array<i64: 1, 32, 256>}, {transform_indices = @transform_2, window_bounds = array<i64: 1, 32, 256>}, {pipeline_mode = #tpu.pipeline_mode<synchronous>, transform_indices = @transform_3, window_bounds = array<i64: 48, 32>}, {pipeline_mode = #tpu.pipeline_mode<synchronous>, transform_indices = @transform_4, window_bounds = array<i64: 48, 1>}, {pipeline_mode = #tpu.pipeline_mode<synchronous>, transform_indices = @transform_5, window_bounds = array<i64: 48, 32>}, {pipeline_mode = #tpu.pipeline_mode<synchronous>, transform_indices = @transform_6, window_bounds = array<i64: 48, 1>}, {transform_indices = @transform_7, window_bounds = array<i64: 1, 32, 256>}]} {
    %c0 = arith.constant 0 : index
    %c0_0 = arith.constant 0 : index
    %0 = vector.load %arg1[%c0, %c0_0] : memref<256x256xf32, #tpu.memory_space<vmem>>, vector<256x256xf32>
    %c0_1 = arith.constant 0 : index
    %c0_2 = arith.constant 0 : index
    %c0_3 = arith.constant 0 : index
    %1 = vector.load %arg2[%c0_1, %c0_2, %c0_3] : memref<1x32x256xf32, #tpu.memory_space<vmem>>, vector<1x32x256xf32>
    %2 = vector.shape_cast %1 : vector<1x32x256xf32> to vector<32x256xf32>
    %c0_4 = arith.constant 0 : index
    %c0_5 = arith.constant 0 : index
    %c0_6 = arith.constant 0 : index
    %3 = vector.load %arg3[%c0_4, %c0_5, %c0_6] : memref<1x32x256xf32, #tpu.memory_space<vmem>>, vector<1x32x256xf32>
    %4 = vector.shape_cast %3 : vector<1x32x256xf32> to vector<32x256xf32>
    %c0_7 = arith.constant 0 : index
    %c0_8 = arith.constant 0 : index
    %5 = vector.load %arg4[%c0_7, %c0_8] : memref<48x32xf32, #tpu.memory_space<vmem>>, vector<16x32xf32>
    %cst = arith.constant dense<0.000000e+00> : vector<16x256xf32>
    %6 = tpu.matmul %5, %2, %cst {dimension_numbers = #tpu.dot_dimension_numbers<[1], [0], [0], [1], [0, 0, 1, 1], [], []>} : vector<16x32xf32>, vector<32x256xf32>, vector<16x256xf32> -> vector<16x256xf32>
    %c0_9 = arith.constant 0 : index
    %c0_10 = arith.constant 0 : index
    %7 = vector.load %arg5[%c0_9, %c0_10] : memref<48x1xf32, #tpu.memory_space<vmem>>, vector<16x1xf32>
    %8 = vector.broadcast %7 : vector<16x1xf32> to vector<16x256xf32>
    %9 = arith.addf %6, %8 : vector<16x256xf32>
    %c16 = arith.constant 16 : index
    %c0_11 = arith.constant 0 : index
    %10 = vector.load %arg4[%c16, %c0_11] : memref<48x32xf32, #tpu.memory_space<vmem>>, vector<32x32xf32>
    %cst_12 = arith.constant dense<0.000000e+00> : vector<32x256xf32>
    %11 = tpu.matmul %10, %4, %cst_12 {dimension_numbers = #tpu.dot_dimension_numbers<[1], [0], [0], [1], [0, 0, 1, 1], [], []>} : vector<32x32xf32>, vector<32x256xf32>, vector<32x256xf32> -> vector<32x256xf32>
    %c16_13 = arith.constant 16 : index
    %c0_14 = arith.constant 0 : index
    %12 = vector.load %arg5[%c16_13, %c0_14] : memref<48x1xf32, #tpu.memory_space<vmem>>, vector<32x1xf32>
    %13 = vector.broadcast %12 : vector<32x1xf32> to vector<32x256xf32>
    %14 = arith.addf %11, %13 : vector<32x256xf32>
    %15 = vector.extract_strided_slice %9 {offsets = [0, 0], sizes = [8, 256], strides = [1, 1]} : vector<16x256xf32> to vector<8x256xf32>
    %16 = arith.truncf %15 : vector<8x256xf32> to vector<8x256xbf16>
    %17 = vector.extract_strided_slice %9 {offsets = [8, 0], sizes = [8, 256], strides = [1, 1]} : vector<16x256xf32> to vector<8x256xf32>
    %18 = arith.truncf %17 : vector<8x256xf32> to vector<8x256xbf16>
    %cst_15 = arith.constant dense<0.000000e+00> : vector<256x256xf32>
    %19 = tpu.matmul %18, %16, %cst_15 {dimension_numbers = #tpu.dot_dimension_numbers<[0], [0], [1], [1], [0, 1, 1, 1], [], []>} : vector<8x256xbf16>, vector<8x256xbf16>, vector<256x256xf32> -> vector<256x256xf32>
    %20 = arith.addf %19, %0 : vector<256x256xf32>
    %cst_16 = arith.constant dense<0xFF800000> : vector<256xf32>
    %21 = vector.multi_reduction <maximumf>, %20, %cst_16 [0] : vector<256x256xf32> to vector<256xf32>
    %22 = vector.shape_cast %21 : vector<256xf32> to vector<1x256xf32>
    %23 = vector.broadcast %22 : vector<1x256xf32> to vector<256x256xf32>
    %24 = arith.subf %20, %23 : vector<256x256xf32>
    %25 = math.exp %24 : vector<256x256xf32>
    %cst_17 = arith.constant dense<0.000000e+00> : vector<256xf32>
    %26 = vector.multi_reduction <add>, %25, %cst_17 [0] : vector<256x256xf32> to vector<256xf32>
    %27 = vector.shape_cast %26 : vector<256xf32> to vector<1x256xf32>
    %28 = tpu.reciprocal %27 {approx = true} : vector<1x256xf32> -> vector<1x256xf32>
    %29 = vector.broadcast %28 : vector<1x256xf32> to vector<256x256xf32>
    %30 = arith.mulf %25, %29 : vector<256x256xf32>
    %31 = arith.truncf %30 : vector<256x256xf32> to vector<256x256xbf16>
    %32 = arith.truncf %14 : vector<32x256xf32> to vector<32x256xbf16>
    %cst_18 = arith.constant dense<0.000000e+00> : vector<32x256xf32>
    %33 = tpu.matmul %32, %31, %cst_18 {dimension_numbers = #tpu.dot_dimension_numbers<[1], [0], [0], [1], [0, 0, 1, 1], [], []>} : vector<32x256xbf16>, vector<256x256xbf16>, vector<32x256xf32> -> vector<32x256xf32>
    %34 = arith.addf %33, %2 : vector<32x256xf32>
    %c0_19 = arith.constant 0 : index
    %c0_20 = arith.constant 0 : index
    %35 = vector.load %arg6[%c0_19, %c0_20] : memref<48x32xf32, #tpu.memory_space<vmem>>, vector<16x32xf32>
    %cst_21 = arith.constant dense<0.000000e+00> : vector<16x256xf32>
    %36 = tpu.matmul %35, %34, %cst_21 {dimension_numbers = #tpu.dot_dimension_numbers<[1], [0], [0], [1], [0, 0, 1, 1], [], []>} : vector<16x32xf32>, vector<32x256xf32>, vector<16x256xf32> -> vector<16x256xf32>
    %c0_22 = arith.constant 0 : index
    %c0_23 = arith.constant 0 : index
    %37 = vector.load %arg7[%c0_22, %c0_23] : memref<48x1xf32, #tpu.memory_space<vmem>>, vector<16x1xf32>
    %38 = vector.broadcast %37 : vector<16x1xf32> to vector<16x256xf32>
    %39 = arith.addf %36, %38 : vector<16x256xf32>
    %c16_24 = arith.constant 16 : index
    %c0_25 = arith.constant 0 : index
    %40 = vector.load %arg6[%c16_24, %c0_25] : memref<48x32xf32, #tpu.memory_space<vmem>>, vector<32x32xf32>
    %cst_26 = arith.constant dense<0.000000e+00> : vector<32x256xf32>
    %41 = tpu.matmul %40, %34, %cst_26 {dimension_numbers = #tpu.dot_dimension_numbers<[1], [0], [0], [1], [0, 0, 1, 1], [], []>} : vector<32x32xf32>, vector<32x256xf32>, vector<32x256xf32> -> vector<32x256xf32>
    %c16_27 = arith.constant 16 : index
    %c0_28 = arith.constant 0 : index
    %42 = vector.load %arg7[%c16_27, %c0_28] : memref<48x1xf32, #tpu.memory_space<vmem>>, vector<32x1xf32>
    %43 = vector.broadcast %42 : vector<32x1xf32> to vector<32x256xf32>
    %44 = arith.addf %41, %43 : vector<32x256xf32>
    %45 = vector.extract_strided_slice %39 {offsets = [0, 0], sizes = [8, 256], strides = [1, 1]} : vector<16x256xf32> to vector<8x256xf32>
    %46 = arith.truncf %45 : vector<8x256xf32> to vector<8x256xbf16>
    %47 = vector.extract_strided_slice %39 {offsets = [8, 0], sizes = [8, 256], strides = [1, 1]} : vector<16x256xf32> to vector<8x256xf32>
    %48 = arith.truncf %47 : vector<8x256xf32> to vector<8x256xbf16>
    %cst_29 = arith.constant dense<0.000000e+00> : vector<256x256xf32>
    %49 = tpu.matmul %48, %46, %cst_29 {dimension_numbers = #tpu.dot_dimension_numbers<[0], [0], [1], [1], [0, 1, 1, 1], [], []>} : vector<8x256xbf16>, vector<8x256xbf16>, vector<256x256xf32> -> vector<256x256xf32>
    %50 = arith.addf %49, %0 : vector<256x256xf32>
    %cst_30 = arith.constant dense<0xFF800000> : vector<256xf32>
    %51 = vector.multi_reduction <maximumf>, %50, %cst_30 [0] : vector<256x256xf32> to vector<256xf32>
    %52 = vector.shape_cast %51 : vector<256xf32> to vector<1x256xf32>
    %53 = vector.broadcast %52 : vector<1x256xf32> to vector<256x256xf32>
    %54 = arith.subf %50, %53 : vector<256x256xf32>
    %55 = math.exp %54 : vector<256x256xf32>
    %cst_31 = arith.constant dense<0.000000e+00> : vector<256xf32>
    %56 = vector.multi_reduction <add>, %55, %cst_31 [0] : vector<256x256xf32> to vector<256xf32>
    %57 = vector.shape_cast %56 : vector<256xf32> to vector<1x256xf32>
    %58 = tpu.reciprocal %57 {approx = true} : vector<1x256xf32> -> vector<1x256xf32>
    %59 = vector.broadcast %58 : vector<1x256xf32> to vector<256x256xf32>
    %60 = arith.mulf %55, %59 : vector<256x256xf32>
    %61 = arith.truncf %60 : vector<256x256xf32> to vector<256x256xbf16>
    %62 = arith.truncf %44 : vector<32x256xf32> to vector<32x256xbf16>
    %cst_32 = arith.constant dense<0.000000e+00> : vector<32x256xf32>
    %63 = tpu.matmul %62, %61, %cst_32 {dimension_numbers = #tpu.dot_dimension_numbers<[1], [0], [0], [1], [0, 0, 1, 1], [], []>} : vector<32x256xbf16>, vector<256x256xbf16>, vector<32x256xf32> -> vector<32x256xf32>
    %64 = arith.addf %63, %34 : vector<32x256xf32>
    %c0_33 = arith.constant 0 : index
    %c0_34 = arith.constant 0 : index
    %c0_35 = arith.constant 0 : index
    %65 = vector.load %arg8[%c0_33, %c0_34, %c0_35] : memref<1x32x256xf32, #tpu.memory_space<vmem>>, vector<1x32x256xf32>
    %66 = vector.shape_cast %65 : vector<1x32x256xf32> to vector<32x256xf32>
    %67 = vector.shape_cast %64 : vector<32x256xf32> to vector<1x32x256xf32>
    tpu.vector_store %arg8[%c0_33, %c0_34, %c0_35], %67 {strides = array<i32>} : memref<1x32x256xf32, #tpu.memory_space<vmem>>, vector<1x32x256xf32>,
    return
  }
  func.func @transform_0(%arg0: i32) -> (i32, i32) {
    %c0_i32 = arith.constant 0 : i32
    %c0_i32_0 = arith.constant 0 : i32
    %c0_i32_1 = arith.constant 0 : i32
    return %c0_i32, %c0_i32_0 : i32, i32
  }
  func.func @transform_1(%arg0: i32) -> (i32, i32, i32) {
    %c0_i32 = arith.constant 0 : i32
    %c0_i32_0 = arith.constant 0 : i32
    %c0_i32_1 = arith.constant 0 : i32
    return %arg0, %c0_i32, %c0_i32_0 : i32, i32, i32
  }
  func.func @transform_2(%arg0: i32) -> (i32, i32, i32) {
    %c0_i32 = arith.constant 0 : i32
    %c0_i32_0 = arith.constant 0 : i32
    %c0_i32_1 = arith.constant 0 : i32
    return %arg0, %c0_i32, %c0_i32_0 : i32, i32, i32
  }
  func.func @transform_3(%arg0: i32) -> (i32, i32) {
    %c0_i32 = arith.constant 0 : i32
    %c0_i32_0 = arith.constant 0 : i32
    %c0_i32_1 = arith.constant 0 : i32
    return %c0_i32, %c0_i32_0 : i32, i32
  }
  func.func @transform_4(%arg0: i32) -> (i32, i32) {
    %c0_i32 = arith.constant 0 : i32
    %c0_i32_0 = arith.constant 0 : i32
    %c0_i32_1 = arith.constant 0 : i32
    return %c0_i32, %c0_i32_0 : i32, i32
  }
  func.func @transform_5(%arg0: i32) -> (i32, i32) {
    %c0_i32 = arith.constant 0 : i32
    %c0_i32_0 = arith.constant 0 : i32
    %c0_i32_1 = arith.constant 0 : i32
    return %c0_i32, %c0_i32_0 : i32, i32
  }
  func.func @transform_6(%arg0: i32) -> (i32, i32) {
    %c0_i32 = arith.constant 0 : i32
    %c0_i32_0 = arith.constant 0 : i32
    %c0_i32_1 = arith.constant 0 : i32
    return %c0_i32, %c0_i32_0 : i32, i32
  }
  func.func @transform_7(%arg0: i32) -> (i32, i32, i32) {
    %c0_i32 = arith.constant 0 : i32
    %c0_i32_0 = arith.constant 0 : i32
    %c0_i32_1 = arith.constant 0 : i32
    return %arg0, %c0_i32, %c0_i32_0 : i32, i32, i32
  }
}

</mosaic_0001>

<bundles_post_ra>
// kernel: cc32cc32.1
= control target key start
LH: loop header
LB: loop body
LE: loop exit
PB: predicated region body
PF: predicated region fallthrough
CT: control target
= control target key end

     0   :  { %s2958_s24 = smov 0   ;;  %s5414_s0 = inlined_call_operand.vmem [shape: f32[256,256], index: 0, kind: input, shape index: {}]   ;;  %s5415_s1 = inlined_call_operand.vmem [shape: f32[2,32,256], index: 1, kind: input, shape index: {}]   ;;  %s5416_s2 = inlined_call_operand.vmem [shape: f32[2,32,256], index: 2, kind: input, shape index: {}]   ;;  %s5417_s3 = inlined_call_operand.vmem [shape: f32[48,32], index: 3, kind: input, shape index: {}]   ;;  %s5418_s4 = inlined_call_operand.vmem [shape: f32[48,1], index: 4, kind: input, shape index: {}]   ;;  %s5419_s5 = inlined_call_operand.vmem [shape: f32[48,32], index: 5, kind: input, shape index: {}]   ;;  %s5420_s6 = inlined_call_operand.vmem [shape: f32[48,1], index: 6, kind: input, shape index: {}]   ;;  %s5421_s7 = inlined_call_operand.vmem [shape: f32[2,32,256], index: 7, kind: output, shape index: {}]  }
   0x1 LB: > { %s2466_s25 = sadd.s32 4294967295, %s2914_s24   ;;  %p2470_p0 = scmp.ge.s32.totalorder %s2914_s24, 1  ;;  %s2914_s24 = sphi %s2958_s24, %s17_s24  }
   0x2   : > { %p247_p1 = scmp.lt.s32.totalorder %s2914_s24, 3 }
   0x4   : > { %p248_p2 = pnand %p2470_p0, %p247_p1 }
   0x6   : > { %251 = sbr.rel (%p248_p2) target bundleno = 2232 (0x8b8), region = 48 }
   0xd   : > { %p284_p3 = scmp.lt.s32.totalorder %s2466_s25, 1  ;;  %v5424_v0 = vmov 0.0   ;;  %v5422_v1 = vmov 0   ;;  %v383_v2 = vld [vmem:[%s5418_s4 + $0x8] sm:$0xff]  ;;  %v382_v3 = vld [vmem:[%s5418_s4] sm:$0xff]  ;;  %v482_v7 = vld [vmem:[%s5418_s4 + $0x10] sm:$0xff] }
   0xe   : > { %465 = vmatprep.mubr.f32.mxu0 %v5424_v0  ;;  %1471 = vmatprep.mubr.f32.mxu1 %v5424_v0  ;;  %v483_v24 = vld [vmem:[%s5418_s4 + $0x18] sm:$0xff]  ;;  %v380_v25 = vld [vmem:[%s5417_s3] sm:$0xff]  ;;  %vm394_vm0 = vcmask 261120   ;;  %v381_v31 = vld [vmem:[%s5417_s3 + $0x8] sm:$0xff]  ;;  %vm692_vm1 = vcmask 1043456   ;;  %vm643_vm2 = vcmask 64512  }
   0xf   : > { %s5851_s25 = smov (!%p284_p3, %s2466_s25), 1  ;;  %2570 = vset.pattern.permute.xlu0 %v5422_v1  ;;  %v484_v30 = vld [vmem:[%s5418_s4 + $0x20] sm:$0xff]  ;;  %v485_v33 = vld [vmem:[%s5418_s4 + $0x28] sm:$0xff]  ;;  %v478_v34 = vld [vmem:[%s5417_s3 + $0x10] sm:$0xff] }
  0x10   : > { %391 = vperm.xlu0 %2570, %v383_v2   ;;  %s2972_s28 = sshll.u32 %s5851_s25, 6  ;;  %v1390_v35 = vld [vmem:[%s5420_s6 + $0x8] sm:$0xff]  ;;  %v479_v36 = vld [vmem:[%s5417_s3 + $0x18] sm:$0xff]  ;;  %v1389_v37 = vld [vmem:[%s5420_s6] sm:$0xff] }
  0x11   : > { %s2981_s10 = scalar_lea.vmem %s5415_s1, %s2972_s28  ;;  %s2987_s13 = scalar_lea.vmem %s5416_s2, %s2972_s28  ;;  %v480_v38 = vld [vmem:[%s5417_s3 + $0x20] sm:$0xff]  ;;  %v481_v39 = vld [vmem:[%s5417_s3 + $0x28] sm:$0xff] }
  0x12   : > { %v365_v4 = vld [vmem:[%s2981_s10 + $0x8] sm:$0xff]  ;;  %v367_v5 = vld [vmem:[%s2981_s10 + $0x18] sm:$0xff]  ;;  %v364_v6 = vld [vmem:[%s2981_s10] sm:$0xff]  ;;  %s298_s30 = scalar_lea.vmem %s5421_s7, %s2972_s28 }
  0x13   : > { %v2528_v8 = vpack.c.bf16 %v367_v5, %v365_v4  ;;  %v366_v9 = vld [vmem:[%s2981_s10 + $0x10] sm:$0xff]  ;;  %v369_v10 = vld [vmem:[%s2981_s10 + $0x28] sm:$0xff]  ;;  %v371_v11 = vld [vmem:[%s2981_s10 + $0x38] sm:$0xff] }
  0x14   : > { %386 = vperm.xlu0 %2570, %v382_v3   ;;  %v2530_v12 = vpack.c.bf16 %v366_v9, %v364_v6  ;;  %v2532_v13 = vpack.c.bf16 %v371_v11, %v369_v10  ;;  %v368_v14 = vld [vmem:[%s2981_s10 + $0x20] sm:$0xff]  ;;  %v370_v15 = vld [vmem:[%s2981_s10 + $0x30] sm:$0xff]  ;;  %v373_v16 = vld [vmem:[%s2987_s13 + $0x8] sm:$0xff] }
  0x15   : > { %2529 = vmatprep.subr.bf16.mxu0 %v2528_v8  ;;  %v375_v17 = vld [vmem:[%s2987_s13 + $0x18] sm:$0xff]  ;;  %v2534_v18 = vpack.c.bf16 %v370_v15, %v368_v14  ;;  %v372_v20 = vld [vmem:[%s2987_s13] sm:$0xff]  ;;  %v374_v21 = vld [vmem:[%s2987_s13 + $0x10] sm:$0xff] }
  0x16   : > { %2531 = vmatpush1.bf16.msra.mxu0 %v2530_v12  ;;  %v2536_v19 = vpack.c.bf16 %v375_v17, %v373_v16  ;;  %v377_v22 = vld [vmem:[%s2987_s13 + $0x28] sm:$0xff]  ;;  %v379_v23 = vld [vmem:[%s2987_s13 + $0x38] sm:$0xff]  ;;  %v2538_v26 = vpack.c.bf16 %v374_v21, %v372_v20  ;;  %v376_v28 = vld [vmem:[%s2987_s13 + $0x20] sm:$0xff] }
  0x17   : > { %2533 = vmatprep.subr.bf16.mxu0 %v2532_v13  ;;  %v2540_v27 = vpack.c.bf16 %v379_v23, %v377_v22  ;;  %v378_v29 = vld [vmem:[%s2987_s13 + $0x30] sm:$0xff]  ;;  %v344_v2 = vld [vmem:[%s5414_s0 + $0x160] sm:$0xff] }
  0x18   : > { %488 = vperm.xlu0 %2570, %v482_v7   ;;  %v2542_v32 = vpack.c.bf16 %v378_v29, %v376_v28 }
  0x1a   : > { %2535 = vmatpush1.bf16.msra.mxu0 %v2534_v18 }
  0x1b   : > { %2537 = vmatprep.subr.bf16.mxu0 %v2536_v19 }
  0x1c   : > { %493 = vperm.xlu0 %2570, %v483_v24  }
  0x1d   : > { %2477 = vmatmul.mubr.msk.f32.vlgmr.msra.gmra.mrb[0].mxu0 %vm394_vm0, %v380_v25 }
  0x1e   : > { %2539 = vmatpush1.bf16.msra.mxu0 %v2538_v26  ;;  %471 = vmatprep.mubr.f32.mxu0 %v5424_v0 }
  0x1f   : > { %2541 = vmatprep.subr.bf16.mxu0 %v2540_v27 }
  0x20   : > { %498 = vperm.xlu0 %2570, %v484_v30  }
  0x21   : > { %2478 = vmatmul.mubr.msk.f32.gmra.mrb[2].mxu0 %vm394_vm0, %v381_v31 }
  0x22   : > { %2543 = vmatpush1.bf16.msra.mxu0 %v2542_v32  ;;  %582 = vmatprep.mubr.f32.mxu0 %v5424_v0 }
  0x24   : > { %503 = vperm.xlu0 %2570, %v485_v33  }
  0x25   : > { %2479 = vmatmul.mubr.msk.f32.vlgmr.msra.gmra.mrb[4].mxu0 %vm394_vm0, %v478_v34 }
  0x26   : > { %588 = vmatprep.mubr.f32.mxu0 %v5424_v0 }
  0x28   : > { %1398 = vperm.xlu0 %2570, %v1390_v35  }
  0x29   : > { %2480 = vmatmul.mubr.msk.f32.gmra.mrb[6].mxu0 %vm394_vm0, %v479_v36 }
  0x2a   : > { %594 = vmatprep.mubr.f32.mxu0 %v5424_v0 }
  0x2c   : > { %1393 = vperm.xlu0 %2570, %v1389_v37   ;;  %v300_v37 = vld [vmem:[%s5414_s0] sm:$0xff] }
  0x2d   : > { %2481 = vmatmul.mubr.msk.f32.gmra.mrb[8].mxu0 %vm394_vm0, %v480_v38  ;;  %v304_v38 = vld [vmem:[%s5414_s0 + $0x20] sm:$0xff] }
  0x2e   : > { %600 = vmatprep.mubr.f32.mxu0 %v5424_v0  ;;  %v340_v0 = vld [vmem:[%s5414_s0 + $0x140] sm:$0xff] }
  0x31   : > { %2482 = vmatmul.mubr.msk.f32.gmra.mrb[10].mxu0 %vm394_vm0, %v481_v39  ;;  %v301_v39 = vld [vmem:[%s5414_s0 + $0x8] sm:$0xff] }
  0x32   : > { %731 = vmatprep.mubr.bf16.mxu0 %v5422_v1 }
  0x8f   : > { %v392_v40 = vpop.permute.xlu0 %391 }
  0x93   : > { %v387_v41 = vpop.permute.xlu0 %386 }
  0x97   : > { %v489_v45 = vpop.permute.xlu0 %488 }
  0x9b   : > { %v494_v54 = vpop.permute.xlu0 %493 }
  0x9f   : > { %v499_v61 = vpop.permute.xlu0 %498 }
  0xa3   : > { %v504_v6 = vpop.permute.xlu0 %503 }
  0xf0   : > { %v467_v42 = vpop.f32.mrb[0].mxu0 }
  0xf1   : > { %v468_v43 = vadd.f32 %v467_v42, %v387_v41  ;;  %v469_v44 = vpop.f32.mrb[1].mxu0 }
  0xf2   : > { %v470_v46 = vadd.f32 %v469_v44, %v387_v41  ;;  %v302_v41 = vld [vmem:[%s5414_s0 + $0x10] sm:$0xff] }
  0xf3   : > { %v607_v47 = vpack.c.bf16 %v468_v43, %v468_v43  ;;  %v306_v43 = vld [vmem:[%s5414_s0 + $0x30] sm:$0xff] }
  0xf4   : > { %v608_v48 = vpack.c.bf16 %v470_v46, %v470_v46  ;;  %v473_v49 = vpop.f32.mrb[2].mxu0 }
  0xf5   : > { %v694_v50 = vsel %vm692_vm1, %v607_v47, 0  ;;  %v475_v51 = vpop.f32.mrb[3].mxu0  ;;  %v474_v52 = vadd.f32 %v473_v49, %v392_v40 }
  0xf6   : > { %2483 = vmatprep.subr.msk.bf16.mxu0 %vm692_vm1, %v608_v48  ;;  %v476_v15 = vadd.f32 %v475_v51, %v392_v40  ;;  %v305_v40 = vld [vmem:[%s5414_s0 + $0x28] sm:$0xff]  ;;  %v307_v48 = vld [vmem:[%s5414_s0 + $0x38] sm:$0xff] }
  0xf7   : > { %700 = vmatpush1.bf16.msra.mxu0 %v694_v50  ;;  %v609_v53 = vpack.c.bf16 %v474_v52, %v474_v52 }
  0xf8   : > { %v584_v55 = vpop.f32.mrb[4].mxu0  ;;  %v610_v16 = vpack.c.bf16 %v476_v15, %v476_v15 }
  0xf9   : > { %v586_v56 = vpop.f32.mrb[5].mxu0  ;;  %611 = vxpose.xlu1.c.b16.start.end [1/1] (short) %v609_v53, 128  ;;  %v3055_v58 = vadd.f32 %v584_v55, %v489_v45 }
  0xfa   : > { %v3059_v62 = vadd.f32 %v586_v56, %v489_v45  ;;  %v303_v45 = vld [vmem:[%s5414_s0 + $0x18] sm:$0xff] }
  0xfb   : > { %5550 = vst [vmem:[#allocation2_spill] sm:$0xff] %v3055_v58  ;;  %v349_v58 = vld [vmem:[%s5414_s0 + $0x188] sm:$0xff] }
  0xfc   : > { %v590_v57 = vpop.f32.mrb[6].mxu0 }
  0xfd   : > { %v3057_v59 = vadd.f32 %v590_v57, %v494_v54  ;;  %v592_v60 = vpop.f32.mrb[7].mxu0 }
  0xfe   : > { %v3061_v63 = vadd.f32 %v592_v60, %v494_v54 }
  0xff   : > { %5551 = vst [vmem:[#allocation3_spill] sm:$0xff] %v3057_v59 }
 0x100   : > { %v1331_v3 = vpack.c.bf16 %v3061_v63, %v3059_v62  ;;  %v596_v4 = vpop.f32.mrb[8].mxu0  ;;  %v308_v63 = vld [vmem:[%s5414_s0 + $0x40] sm:$0xff] }
 0x101   : > { %v598_v5 = vpop.f32.mrb[9].mxu0  ;;  %v3067_v8 = vadd.f32 %v596_v4, %v499_v61 }
 0x102   : > { %v3071_v11 = vadd.f32 %v598_v5, %v499_v61  ;;  %v310_v5 = vld [vmem:[%s5414_s0 + $0x50] sm:$0xff] }
 0x103   : > { %5552 = vst [vmem:[#allocation4_spill] sm:$0xff] %v3067_v8 }
 0x104   : > { %v602_v7 = vpop.f32.mrb[10].mxu0  ;;  %5554 = vst [vmem:[#allocation6_spill] sm:$0xff] %v3071_v11  ;;  %v350_v11 = vld [vmem:[%s5414_s0 + $0x190] sm:$0xff] }
 0x105   : > { %v3069_v9 = vadd.f32 %v602_v7, %v504_v6  ;;  %v604_v10 = vpop.f32.mrb[11].mxu0 }
 0x106   : > { %v3073_v12 = vadd.f32 %v604_v10, %v504_v6  ;;  %v311_v10 = vld [vmem:[%s5414_s0 + $0x58] sm:$0xff] }
 0x107   : > { %5553 = vst [vmem:[#allocation5_spill] sm:$0xff] %v3069_v9 }
 0x108   : > { %5555 = vst [vmem:[#allocation7_spill] sm:$0xff] %v3073_v12 }
 0x116   : > { %627 = vxpose.xlu1.c.b16.start.end [1/1] (short) %v610_v16, 128 }
 0x15f   : > { %v619_v17 = vpop.trf.xlu1 }
 0x160   : > { %2484 = vmatmul.mubr.msk.bf16.vlgmr.msra.gmra.mrb[12].mxu0 %vm643_vm2, %v619_v17 }
 0x161   : > { %741 = vmatprep.mubr.bf16.mxu0 %v5422_v1 }
 0x163   : > { %v620_v18 = vpop.trf.xlu1 }
 0x167   : > { %v621_v19 = vpop.trf.xlu1 }
 0x168   : > { %2485 = vmatmul.mubr.msk.bf16.gmra.mrb[16].mxu0 %vm643_vm2, %v620_v18 }
 0x169   : > { %751 = vmatprep.mubr.bf16.mxu0 %v5422_v1 }
 0x16b   : > { %v622_v20 = vpop.trf.xlu1 }
 0x16f   : > { %v623_v21 = vpop.trf.xlu1 }
 0x170   : > { %2486 = vmatmul.mubr.msk.bf16.gmra.mrb[20].mxu0 %vm643_vm2, %v621_v19 }
 0x171   : > { %761 = vmatprep.mubr.bf16.mxu0 %v5422_v1 }
 0x173   : > { %v624_v22 = vpop.trf.xlu1 }
 0x177   : > { %v625_v23 = vpop.trf.xlu1 }
 0x178   : > { %2487 = vmatmul.mubr.msk.bf16.gmra.mrb[24].mxu0 %vm643_vm2, %v622_v20 }
 0x179   : > { %771 = vmatprep.mubr.bf16.mxu0 %v5422_v1 }
 0x17b   : > { %v626_v24 = vpop.trf.xlu1 }
 0x17f   : > { %v635_v25 = vpop.trf.xlu1 }
 0x180   : > { %2488 = vmatmul.mubr.msk.bf16.gmra.mrb[28].mxu0 %vm643_vm2, %v623_v21 }
 0x181   : > { %781 = vmatprep.mubr.bf16.mxu0 %v5422_v1 }
 0x183   : > { %v636_v26 = vpop.trf.xlu1 }
 0x187   : > { %v637_v27 = vpop.trf.xlu1 }
 0x188   : > { %2489 = vmatmul.mubr.msk.bf16.gmra.mrb[32].mxu0 %vm643_vm2, %v624_v22 }
 0x189   : > { %791 = vmatprep.mubr.bf16.mxu0 %v5422_v1 }
 0x18b   : > { %v638_v28 = vpop.trf.xlu1 }
 0x18f   : > { %v639_v29 = vpop.trf.xlu1 }
 0x190   : > { %2490 = vmatmul.mubr.msk.bf16.gmra.mrb[36].mxu0 %vm643_vm2, %v625_v23 }
 0x191   : > { %801 = vmatprep.mubr.bf16.mxu0 %v5422_v1 }
 0x193   : > { %v640_v30 = vpop.trf.xlu1 }
 0x197   : > { %v641_v31 = vpop.trf.xlu1 }
 0x198   : > { %2491 = vmatmul.mubr.msk.bf16.gmra.mrb[40].mxu0 %vm643_vm2, %v626_v24  ;;  %v312_v24 = vld [vmem:[%s5414_s0 + $0x60] sm:$0xff] }
 0x199   : > { %811 = vmatprep.mubr.bf16.mxu0 %v5422_v1 }
 0x19b   : > { %v642_v32 = vpop.trf.xlu1 }
 0x1a0   : > { %2492 = vmatmul.mubr.msk.bf16.gmra.mrb[44].mxu0 %vm643_vm2, %v635_v25  ;;  %v313_v25 = vld [vmem:[%s5414_s0 + $0x68] sm:$0xff] }
 0x1a1   : > { %821 = vmatprep.mubr.bf16.mxu0 %v5422_v1 }
 0x1a8   : > { %2493 = vmatmul.mubr.msk.bf16.gmra.mrb[48].mxu0 %vm643_vm2, %v636_v26 }
 0x1a9   : > { %831 = vmatprep.mubr.bf16.mxu0 %v5422_v1 }
 0x1b0   : > { %2494 = vmatmul.mubr.msk.bf16.gmra.mrb[52].mxu0 %vm643_vm2, %v637_v27  ;;  %v314_v27 = vld [vmem:[%s5414_s0 + $0x70] sm:$0xff] }
 0x1b1   : > { %841 = vmatprep.mubr.bf16.mxu0 %v5422_v1 }
 0x1b8   : > { %2495 = vmatmul.mubr.msk.bf16.gmra.mrb[56].mxu0 %vm643_vm2, %v638_v28 }
 0x1b9   : > { %851 = vmatprep.mubr.bf16.mxu0 %v5422_v1 }
 0x1c0   : > { %2496 = vmatmul.mubr.msk.bf16.gmra.mrb[60].mxu0 %vm643_vm2, %v639_v29 }
 0x1c1   : > { %861 = vmatprep.mubr.bf16.mxu0 %v5422_v1 }
 0x1c8   : > { %2497 = vmatmul.mubr.msk.bf16.gmra.mrb[64].mxu0 %vm643_vm2, %v640_v30  ;;  %v315_v30 = vld [vmem:[%s5414_s0 + $0x78] sm:$0xff] }
 0x1c9   : > { %871 = vmatprep.mubr.bf16.mxu0 %v5422_v1 }
 0x1d0   : > { %2498 = vmatmul.mubr.msk.bf16.gmra.mrb[68].mxu0 %vm643_vm2, %v641_v31 }
 0x1d1   : > { %881 = vmatprep.mubr.bf16.mxu0 %v5422_v1 }
 0x1d8   : > { %2499 = vmatmul.mubr.msk.bf16.gmra.mrb[72].mxu0 %vm643_vm2, %v642_v32 }
 0x1d9   : > { %1366 = vmatprep.mubr.bf16.mxu0 %v1331_v3  ;;  %v309_v3 = vld [vmem:[%s5414_s0 + $0x48] sm:$0xff] }
 0x233   : > { %v733_v33 = vpop.f32.mrb[12].mxu0 }
 0x234   : > { %v735_v34 = vpop.f32.mrb[13].mxu0  ;;  %v3131_v44 = vadd.f32 %v733_v33, %v300_v37 }
 0x235   : > { %v737_v35 = vpop.f32.mrb[14].mxu0  ;;  %v3141_v49 = vadd.f32 %v735_v34, %v301_v39 }
 0x236   : > { %v739_v36 = vpop.f32.mrb[15].mxu0  ;;  %v3145_v52 = vadd.f32 %v737_v35, %v302_v41  ;;  %v317_v41 = vld [vmem:[%s5414_s0 + $0x88] sm:$0xff] }
 0x237   : > { %v3151_v56 = vadd.f32 %v739_v36, %v303_v45 }
 0x23b   : > { %v743_v42 = vpop.f32.mrb[16].mxu0 }
 0x23c   : > { %v3136_v46 = vadd.f32 %v743_v42, %v304_v38  ;;  %v745_v47 = vpop.f32.mrb[17].mxu0 }
 0x23d   : > { %v3143_v50 = vadd.f32 %v745_v47, %v305_v40  ;;  %v747_v51 = vpop.f32.mrb[18].mxu0  ;;  %v316_v40 = vld [vmem:[%s5414_s0 + $0x80] sm:$0xff] }
 0x23e   : > { %v892_v53 = vmax.f32 %v3131_v44, %v3136_v46  ;;  %v3149_v54 = vadd.f32 %v747_v51, %v306_v43  ;;  %v749_v55 = vpop.f32.mrb[19].mxu0  ;;  %v318_v43 = vld [vmem:[%s5414_s0 + $0x90] sm:$0xff] }
 0x23f   : > { %v929_v57 = vmax.f32 %v3141_v49, %v3143_v50  ;;  %v3155_v60 = vadd.f32 %v749_v55, %v307_v48  ;;  %v319_v48 = vld [vmem:[%s5414_s0 + $0x98] sm:$0xff] }
 0x240   : > { %v893_v61 = vmax.f32 %v3145_v52, %v3149_v54 }
 0x241   : > { %v930_v62 = vmax.f32 %v3151_v56, %v3155_v60 }
 0x243   : > { %v753_v4 = vpop.f32.mrb[20].mxu0 }
 0x244   : > { %v3170_v6 = vadd.f32 %v753_v4, %v308_v63  ;;  %v755_v7 = vpop.f32.mrb[21].mxu0 }
 0x245   : > { %v3175_v15 = vadd.f32 %v755_v7, %v309_v3  ;;  %v757_v16 = vpop.f32.mrb[22].mxu0  ;;  %v321_v7 = vld [vmem:[%s5414_s0 + $0xa8] sm:$0xff] }
 0x246   : > { %v894_v17 = vmax.f32 %v892_v53, %v3170_v6  ;;  %v3178_v18 = vadd.f32 %v757_v16, %v310_v5  ;;  %v759_v19 = vpop.f32.mrb[23].mxu0  ;;  %v320_v5 = vld [vmem:[%s5414_s0 + $0xa0] sm:$0xff]  ;;  %v322_v16 = vld [vmem:[%s5414_s0 + $0xb0] sm:$0xff] }
 0x247   : > { %v931_v20 = vmax.f32 %v929_v57, %v3175_v15  ;;  %v3181_v21 = vadd.f32 %v759_v19, %v311_v10 }
 0x248   : > { %v895_v22 = vmax.f32 %v893_v61, %v3178_v18 }
 0x249   : > { %v932_v23 = vmax.f32 %v930_v62, %v3181_v21 }
 0x24b   : > { %v763_v26 = vpop.f32.mrb[24].mxu0 }
 0x24c   : > { %v3194_v28 = vadd.f32 %v763_v26, %v312_v24  ;;  %v765_v29 = vpop.f32.mrb[25].mxu0 }
 0x24d   : > { %v3199_v31 = vadd.f32 %v765_v29, %v313_v25  ;;  %v767_v32 = vpop.f32.mrb[26].mxu0 }
 0x24e   : > { %v896_v33 = vmax.f32 %v894_v17, %v3194_v28  ;;  %v3202_v34 = vadd.f32 %v767_v32, %v314_v27  ;;  %v769_v35 = vpop.f32.mrb[27].mxu0 }
 0x24f   : > { %v933_v36 = vmax.f32 %v931_v20, %v3199_v31  ;;  %v3205_v37 = vadd.f32 %v769_v35, %v315_v30  ;;  %v323_v20 = vld [vmem:[%s5414_s0 + $0xb8] sm:$0xff]  ;;  %v325_v35 = vld [vmem:[%s5414_s0 + $0xc8] sm:$0xff] }
 0x250   : > { %v897_v38 = vmax.f32 %v895_v22, %v3202_v34 }
 0x251   : > { %v934_v39 = vmax.f32 %v932_v23, %v3205_v37 }
 0x253   : > { %v773_v42 = vpop.f32.mrb[28].mxu0 }
 0x254   : > { %v3218_v45 = vadd.f32 %v773_v42, %v316_v40  ;;  %v775_v47 = vpop.f32.mrb[29].mxu0 }
 0x255   : > { %v3223_v51 = vadd.f32 %v775_v47, %v317_v41  ;;  %v777_v53 = vpop.f32.mrb[30].mxu0  ;;  %v327_v41 = vld [vmem:[%s5414_s0 + $0xd8] sm:$0xff] }
 0x256   : > { %v898_v55 = vmax.f32 %v896_v33, %v3218_v45  ;;  %v3226_v57 = vadd.f32 %v777_v53, %v318_v43  ;;  %v779_v61 = vpop.f32.mrb[31].mxu0  ;;  %v324_v33 = vld [vmem:[%s5414_s0 + $0xc0] sm:$0xff] }
 0x257   : > { %5556 = vst [vmem:[#allocation8_spill] sm:$0xff] %v3223_v51  ;;  %v935_v62 = vmax.f32 %v933_v36, %v3223_v51  ;;  %v3229_v63 = vadd.f32 %v779_v61, %v319_v48 }
 0x258   : > { %v899_v3 = vmax.f32 %v897_v38, %v3226_v57  ;;  %v326_v38 = vld [vmem:[%s5414_s0 + $0xd0] sm:$0xff] }
 0x259   : > { %5557 = vst [vmem:[#allocation9_spill] sm:$0xff] %v3229_v63  ;;  %v936_v4 = vmax.f32 %v934_v39, %v3229_v63 }
 0x25b   : > { %v783_v10 = vpop.f32.mrb[32].mxu0 }
 0x25c   : > { %v3242_v17 = vadd.f32 %v783_v10, %v320_v5  ;;  %v785_v19 = vpop.f32.mrb[33].mxu0  ;;  %v329_v5 = vld [vmem:[%s5414_s0 + $0xe8] sm:$0xff]  ;;  %v330_v10 = vld [vmem:[%s5414_s0 + $0xf0] sm:$0xff] }
 0x25d   : > { %v3247_v22 = vadd.f32 %v785_v19, %v321_v7  ;;  %v787_v23 = vpop.f32.mrb[34].mxu0 }
 0x25e   : > { %v900_v24 = vmax.f32 %v898_v55, %v3242_v17  ;;  %v3250_v25 = vadd.f32 %v787_v23, %v322_v16  ;;  %v789_v26 = vpop.f32.mrb[35].mxu0 }
 0x25f   : > { %5558 = vst [vmem:[#allocation10_spill] sm:$0xff] %v3247_v22  ;;  %v937_v27 = vmax.f32 %v935_v62, %v3247_v22  ;;  %v3253_v29 = vadd.f32 %v789_v26, %v323_v20  ;;  %v331_v20 = vld [vmem:[%s5414_s0 + $0xf8] sm:$0xff] }
 0x260   : > { %v901_v30 = vmax.f32 %v899_v3, %v3250_v25 }
 0x261   : > { %5559 = vst [vmem:[#allocation11_spill] sm:$0xff] %v3253_v29  ;;  %v938_v32 = vmax.f32 %v936_v4, %v3253_v29  ;;  %v328_v4 = vld [vmem:[%s5414_s0 + $0xe0] sm:$0xff] }
 0x263   : > { %v793_v36 = vpop.f32.mrb[36].mxu0 }
 0x264   : > { %v3266_v39 = vadd.f32 %v793_v36, %v324_v33  ;;  %v795_v40 = vpop.f32.mrb[37].mxu0 }
 0x265   : > { %v3271_v42 = vadd.f32 %v795_v40, %v325_v35  ;;  %v797_v43 = vpop.f32.mrb[38].mxu0  ;;  %v333_v40 = vld [vmem:[%s5414_s0 + $0x108] sm:$0xff] }
 0x266   : > { %v902_v47 = vmax.f32 %v900_v24, %v3266_v39  ;;  %v3274_v48 = vadd.f32 %v797_v43, %v326_v38  ;;  %v799_v53 = vpop.f32.mrb[39].mxu0  ;;  %v332_v38 = vld [vmem:[%s5414_s0 + $0x100] sm:$0xff]  ;;  %v334_v43 = vld [vmem:[%s5414_s0 + $0x110] sm:$0xff] }
 0x267   : > { %5560 = vst [vmem:[#allocation12_spill] sm:$0xff] %v3271_v42  ;;  %v939_v55 = vmax.f32 %v937_v27, %v3271_v42  ;;  %v3277_v61 = vadd.f32 %v799_v53, %v327_v41 }
 0x268   : > { %v903_v62 = vmax.f32 %v901_v30, %v3274_v48 }
 0x269   : > { %5561 = vst [vmem:[#allocation13_spill] sm:$0xff] %v3277_v61  ;;  %v940_v3 = vmax.f32 %v938_v32, %v3277_v61 }
 0x26b   : > { %v803_v7 = vpop.f32.mrb[40].mxu0 }
 0x26c   : > { %v3290_v16 = vadd.f32 %v803_v7, %v328_v4  ;;  %v805_v19 = vpop.f32.mrb[41].mxu0 }
 0x26d   : > { %v3295_v23 = vadd.f32 %v805_v19, %v329_v5  ;;  %v807_v24 = vpop.f32.mrb[42].mxu0 }
 0x26e   : > { %v904_v26 = vmax.f32 %v902_v47, %v3290_v16  ;;  %v3298_v27 = vadd.f32 %v807_v24, %v330_v10  ;;  %v809_v30 = vpop.f32.mrb[43].mxu0 }
 0x26f   : > { %5562 = vst [vmem:[#allocation14_spill] sm:$0xff] %v3295_v23  ;;  %v941_v32 = vmax.f32 %v939_v55, %v3295_v23  ;;  %v3301_v33 = vadd.f32 %v809_v30, %v331_v20  ;;  %v335_v55 = vld [vmem:[%s5414_s0 + $0x118] sm:$0xff]  ;;  %v336_v30 = vld [vmem:[%s5414_s0 + $0x120] sm:$0xff] }
 0x270   : > { %v905_v35 = vmax.f32 %v903_v62, %v3298_v27 }
 0x271   : > { %5563 = vst [vmem:[#allocation15_spill] sm:$0xff] %v3301_v33  ;;  %v942_v36 = vmax.f32 %v940_v3, %v3301_v33 }
 0x273   : > { %v813_v41 = vpop.f32.mrb[44].mxu0 }
 0x274   : > { %v3314_v47 = vadd.f32 %v813_v41, %v332_v38  ;;  %v815_v53 = vpop.f32.mrb[45].mxu0  ;;  %v337_v38 = vld [vmem:[%s5414_s0 + $0x128] sm:$0xff] }
 0x275   : > { %v3319_v62 = vadd.f32 %v815_v53, %v333_v40  ;;  %v817_v3 = vpop.f32.mrb[46].mxu0  ;;  %v338_v40 = vld [vmem:[%s5414_s0 + $0x130] sm:$0xff] }
 0x276   : > { %v906_v4 = vmax.f32 %v904_v26, %v3314_v47  ;;  %v3322_v5 = vadd.f32 %v817_v3, %v334_v43  ;;  %v819_v7 = vpop.f32.mrb[47].mxu0 }
 0x277   : > { %5564 = vst [vmem:[#allocation16_spill] sm:$0xff] %v3319_v62  ;;  %v943_v10 = vmax.f32 %v941_v32, %v3319_v62  ;;  %v3325_v19 = vadd.f32 %v819_v7, %v335_v55 }
 0x278   : > { %v907_v20 = vmax.f32 %v905_v35, %v3322_v5  ;;  %v339_v35 = vld [vmem:[%s5414_s0 + $0x138] sm:$0xff] }
 0x279   : > { %5565 = vst [vmem:[#allocation17_spill] sm:$0xff] %v3325_v19  ;;  %v944_v24 = vmax.f32 %v942_v36, %v3325_v19 }
 0x27b   : > { %v823_v26 = vpop.f32.mrb[48].mxu0 }
 0x27c   : > { %v3338_v32 = vadd.f32 %v823_v26, %v336_v30  ;;  %v825_v41 = vpop.f32.mrb[49].mxu0 }
 0x27d   : > { %v3343_v36 = vadd.f32 %v825_v41, %v337_v38  ;;  %v827_v43 = vpop.f32.mrb[50].mxu0  ;;  %v341_v38 = vld [vmem:[%s5414_s0 + $0x148] sm:$0xff] }
 0x27e   : > { %v908_v53 = vmax.f32 %v906_v4, %v3338_v32  ;;  %v3346_v55 = vadd.f32 %v827_v43, %v338_v40  ;;  %v829_v3 = vpop.f32.mrb[51].mxu0  ;;  %v342_v40 = vld [vmem:[%s5414_s0 + $0x150] sm:$0xff] }
 0x27f   : > { %5566 = vst [vmem:[#allocation18_spill] sm:$0xff] %v3343_v36  ;;  %v945_v7 = vmax.f32 %v943_v10, %v3343_v36  ;;  %v3349_v1 = vadd.f32 %v829_v3, %v339_v35 }
 0x280   : > { %v909_v30 = vmax.f32 %v907_v20, %v3346_v55 }
 0x281   : > { %5567 = vst [vmem:[#allocation19_spill] sm:$0xff] %v3349_v1  ;;  %v946_v26 = vmax.f32 %v944_v24, %v3349_v1 }
 0x283   : > { %v833_v4 = vpop.f32.mrb[52].mxu0 }
 0x284   : > { %v3362_v10 = vadd.f32 %v833_v4, %v340_v0  ;;  %v835_v41 = vpop.f32.mrb[53].mxu0  ;;  %v346_v0 = vld [vmem:[%s5414_s0 + $0x170] sm:$0xff] }
 0x285   : > { %v3364_v35 = vadd.f32 %v835_v41, %v341_v38  ;;  %v837_v20 = vpop.f32.mrb[54].mxu0 }
 0x286   : > { %v910_v24 = vmax.f32 %v908_v53, %v3362_v10  ;;  %v3367_v43 = vadd.f32 %v837_v20, %v342_v40  ;;  %v839_v3 = vpop.f32.mrb[55].mxu0  ;;  %v348_v20 = vld [vmem:[%s5414_s0 + $0x180] sm:$0xff] }
 0x287   : > { %5568 = vst [vmem:[#allocation20_spill] sm:$0xff] %v3364_v35  ;;  %v947_v13 = vmax.f32 %v945_v7, %v3364_v35 }
 0x288   : > { %v911_v14 = vmax.f32 %v909_v30, %v3367_v43 }
 0x28b   : > { %v843_v8 = vpop.f32.mrb[56].mxu0 }
 0x28c   : > { %v3377_v38 = vadd.f32 %v843_v8, %v344_v2  ;;  %v845_v4 = vpop.f32.mrb[57].mxu0  ;;  %v343_v2 = vld [vmem:[%s5414_s0 + $0x158] sm:$0xff]  ;;  %v345_v8 = vld [vmem:[%s5414_s0 + $0x168] sm:$0xff] }
 0x28d   : > { %v847_v53 = vpop.f32.mrb[58].mxu0  ;;  %v3406_v1 = vadd.f32 %v839_v3, %v343_v2  ;;  %v3408_v36 = vadd.f32 %v845_v4, %v345_v8  ;;  %v353_v3 = vld [vmem:[%s5414_s0 + $0x1a8] sm:$0xff] }
 0x28e   : > { %v912_v40 = vmax.f32 %v910_v24, %v3377_v38  ;;  %v3380_v41 = vadd.f32 %v847_v53, %v346_v0  ;;  %v849_v7 = vpop.f32.mrb[59].mxu0  ;;  %v347_v53 = vld [vmem:[%s5414_s0 + $0x178] sm:$0xff] }
 0x28f   : > { %5569 = vst [vmem:[#allocation21_spill] sm:$0xff] %v3406_v1  ;;  %5570 = vst [vmem:[#allocation22_spill] sm:$0xff] %v3408_v36  ;;  %v3414_v19 = vadd.f32 %v849_v7, %v347_v53  ;;  %v948_v4 = vmax.f32 %v946_v26, %v3406_v1 }
 0x290   : > { %v913_v30 = vmax.f32 %v911_v14, %v3380_v41 }
 0x291   : > { %5571 = vst [vmem:[#allocation23_spill] sm:$0xff] %v3414_v19  ;;  %v950_v53 = vmax.f32 %v948_v4, %v3414_v19  ;;  %v360_v19 = vld [vmem:[%s5414_s0 + $0x1e0] sm:$0xff] }
 0x293   : > { %v853_v9 = vpop.f32.mrb[60].mxu0 }
 0x294   : > { %v3395_v24 = vadd.f32 %v853_v9, %v348_v20  ;;  %v855_v14 = vpop.f32.mrb[61].mxu0  ;;  %v351_v20 = vld [vmem:[%s5414_s0 + $0x198] sm:$0xff] }
 0x295   : > { %v857_v0 = vpop.f32.mrb[62].mxu0 }
 0x296   : > { %v914_v12 = vmax.f32 %v912_v40, %v3395_v24  ;;  %v3404_v59 = vadd.f32 %v857_v0, %v350_v11  ;;  %v859_v35 = vpop.f32.mrb[63].mxu0  ;;  %v3416_v40 = vadd.f32 %v855_v14, %v349_v58  ;;  %v352_v11 = vld [vmem:[%s5414_s0 + $0x1a0] sm:$0xff]  ;;  %v354_v58 = vld [vmem:[%s5414_s0 + $0x1b0] sm:$0xff]  ;;  %v355_v0 = vld [vmem:[%s5414_s0 + $0x1b8] sm:$0xff] }
 0x297   : > { %v3426_v2 = vadd.f32 %v859_v35, %v351_v20 }
 0x298   : > { %v915_v9 = vmax.f32 %v913_v30, %v3404_v59  ;;  %5572 = vst [vmem:[#allocation24_spill] sm:$0xff] %v3416_v40  ;;  %v949_v30 = vmax.f32 %v947_v13, %v3408_v36 }
 0x299   : > { %5573 = vst [vmem:[#allocation25_spill] sm:$0xff] %v3426_v2 }
 0x29a   : > { %v951_v26 = vmax.f32 %v949_v30, %v3416_v40 }
 0x29b   : > { %v863_v8 = vpop.f32.mrb[64].mxu0 }
 0x29c   : > { %v3431_v7 = vadd.f32 %v863_v8, %v352_v11  ;;  %v865_v14 = vpop.f32.mrb[65].mxu0  ;;  %v952_v11 = vmax.f32 %v950_v53, %v3426_v2 }
 0x29d   : > { %v3438_v1 = vadd.f32 %v865_v14, %v353_v3  ;;  %v867_v13 = vpop.f32.mrb[66].mxu0  ;;  %v356_v3 = vld [vmem:[%s5414_s0 + $0x1c0] sm:$0xff] }
 0x29e   : > { %v916_v35 = vmax.f32 %v914_v12, %v3431_v7  ;;  %v3441_v20 = vadd.f32 %v867_v13, %v354_v58  ;;  %v869_v36 = vpop.f32.mrb[67].mxu0  ;;  %v357_v12 = vld [vmem:[%s5414_s0 + $0x1c8] sm:$0xff]  ;;  %v358_v58 = vld [vmem:[%s5414_s0 + $0x1d0] sm:$0xff] }
 0x29f   : > { %5574 = vst [vmem:[#allocation26_spill] sm:$0xff] %v3438_v1  ;;  %v953_v8 = vmax.f32 %v951_v26, %v3438_v1  ;;  %v3445_v62 = vadd.f32 %v869_v36, %v355_v0 }
 0x2a0   : > { %v917_v33 = vmax.f32 %v915_v9, %v3441_v20  ;;  %v359_v9 = vld [vmem:[%s5414_s0 + $0x1d8] sm:$0xff] }
 0x2a1   : > { %5575 = vst [vmem:[#allocation27_spill] sm:$0xff] %v3445_v62  ;;  %v954_v4 = vmax.f32 %v952_v11, %v3445_v62 }
 0x2a3   : > { %v873_v30 = vpop.f32.mrb[68].mxu0 }
 0x2a4   : > { %v3458_v14 = vadd.f32 %v873_v30, %v356_v3  ;;  %v875_v36 = vpop.f32.mrb[69].mxu0 }
 0x2a5   : > { %v3463_v0 = vadd.f32 %v875_v36, %v357_v12  ;;  %v877_v53 = vpop.f32.mrb[70].mxu0  ;;  %v361_v12 = vld [vmem:[%s5414_s0 + $0x1e8] sm:$0xff] }
 0x2a6   : > { %v918_v26 = vmax.f32 %v916_v35, %v3458_v14  ;;  %v3466_v13 = vadd.f32 %v877_v53, %v358_v58  ;;  %v879_v11 = vpop.f32.mrb[71].mxu0  ;;  %v362_v58 = vld [vmem:[%s5414_s0 + $0x1f0] sm:$0xff] }
 0x2a7   : > { %5576 = vst [vmem:[#allocation28_spill] sm:$0xff] %v3463_v0  ;;  %v955_v2 = vmax.f32 %v953_v8, %v3463_v0  ;;  %v3469_v40 = vadd.f32 %v879_v11, %v359_v9 }
 0x2a8   : > { %v919_v3 = vmax.f32 %v917_v33, %v3466_v13  ;;  %v363_v33 = vld [vmem:[%s5414_s0 + $0x1f8] sm:$0xff] }
 0x2a9   : > { %5577 = vst [vmem:[#allocation29_spill] sm:$0xff] %v3469_v40  ;;  %v956_v30 = vmax.f32 %v954_v4, %v3469_v40 }
 0x2ab   : > { %v883_v35 = vpop.f32.mrb[72].mxu0 }
 0x2ac   : > { %v3482_v8 = vadd.f32 %v883_v35, %v360_v19  ;;  %v885_v36 = vpop.f32.mrb[73].mxu0 }
 0x2ad   : > { %v3487_v4 = vadd.f32 %v885_v36, %v361_v12  ;;  %v887_v9 = vpop.f32.mrb[74].mxu0 }
 0x2ae   : > { %v920_v53 = vmax.f32 %v918_v26, %v3482_v8  ;;  %v3490_v11 = vadd.f32 %v887_v9, %v362_v58  ;;  %v889_v40 = vpop.f32.mrb[75].mxu0 }
 0x2af   : > { %v957_v0 = vmax.f32 %v955_v2, %v3487_v4  ;;  %v3493_v62 = vadd.f32 %v889_v40, %v363_v33 }
 0x2b0   : > { %v921_v19 = vmax.f32 %v919_v3, %v3490_v11 }
 0x2b1   : > { %v958_v35 = vmax.f32 %v956_v30, %v3493_v62 }
 0x2b2   : > { %v922_v1 = vmax.f32 %v920_v53, %v921_v19 }
 0x2b3   : > { %v959_v23 = vmax.f32 %v957_v0, %v958_v35  ;;  %v5586_v35 = vld [vmem:[#allocation15_spill] sm:$0xff] }
 0x2b4   : > { %v923_v61 = vrot.slane %v922_v1, 4 }
 0x2b5   : > { %v960_v42 = vrot.slane %v959_v23, 4 }
 0x2b6   : > { %v924_v12 = vmax.f32 %v922_v1, %v923_v61  ;;  %v5588_v61 = vld [vmem:[#allocation17_spill] sm:$0xff] }
 0x2b7   : > { %v961_v36 = vmax.f32 %v959_v23, %v960_v42 }
 0x2b8   : > { %v925_v29 = vrot.slane %v924_v12, 2 }
 0x2b9   : > { %v962_v22 = vrot.slane %v961_v36, 2 }
 0x2ba   : > { %v926_v26 = vmax.f32 %v924_v12, %v925_v29 }
 0x2bb   : > { %v963_v58 = vmax.f32 %v961_v36, %v962_v22 }
 0x2bc   : > { %v927_v9 = vrot.slane %v926_v26, 1 }
 0x2bd   : > { %v964_v63 = vrot.slane %v963_v58, 1 }
 0x2be   : > { %v3497_v51 = vmax.f32 %v926_v26, %v927_v9  ;;  %v5591_v26 = vld [vmem:[#allocation19_spill] sm:$0xff] }
 0x2bf   : > { %v3499_v40 = vmax.f32 %v963_v58, %v964_v63 }
 0x2c0   : > { %v966_v2 = vsub.f32 %v3131_v44, %v3497_v51  ;;  %v968_v0 = vsub.f32 %v3145_v52, %v3497_v51  ;;  %v970_v1 = vsub.f32 %v3136_v46, %v3497_v51  ;;  %v972_v42 = vsub.f32 %v3149_v54, %v3497_v51 }
 0x2c1   : > { %v974_v22 = vsub.f32 %v3170_v6, %v3497_v51  ;;  %v976_v29 = vsub.f32 %v3178_v18, %v3497_v51  ;;  %v978_v63 = vsub.f32 %v3194_v28, %v3497_v51  ;;  %v980_v44 = vsub.f32 %v3202_v34, %v3497_v51  ;;  %v5595_v34 = vld [vmem:[#allocation27_spill] sm:$0xff] }
 0x2c2   : > { %v982_v52 = vsub.f32 %v3218_v45, %v3497_v51  ;;  %v984_v46 = vsub.f32 %v3226_v57, %v3497_v51  ;;  %v986_v54 = vsub.f32 %v3242_v17, %v3497_v51  ;;  %v988_v6 = vsub.f32 %v3250_v25, %v3497_v51  ;;  %v5589_v57 = vld [vmem:[#allocation18_spill] sm:$0xff]  ;;  %v5597_v25 = vld [vmem:[#allocation29_spill] sm:$0xff] }
 0x2c3   : > { %v990_v18 = vsub.f32 %v3266_v39, %v3497_v51  ;;  %v1030_v53 = vmul.f32 1.442695, %v966_v2  ;;  %v1034_v12 = vmul.f32 1.442695, %v968_v0  ;;  %v1038_v33 = vmul.f32 1.442695, %v970_v1 }
 0x2c4   : > { %v1042_v58 = vmul.f32 1.442695, %v972_v42  ;;  %v1046_v9 = vmul.f32 1.442695, %v974_v22  ;;  %v1050_v30 = vmul.f32 1.442695, %v976_v29  ;;  %v5599_v0 = vsub.f32 %v3290_v16, %v3497_v51 }
 0x2c5   : > { %2572 = vpow2.f32 %v1030_v53  ;;  %v1054_v19 = vmul.f32 1.442695, %v978_v63  ;;  %v1058_v3 = vmul.f32 1.442695, %v980_v44  ;;  %v1062_v22 = vmul.f32 1.442695, %v982_v52 }
 0x2c6   : > { %2574 = vpow2.f32 %v1034_v12  ;;  %v5578_v44 = vld [vmem:[#allocation8_spill] sm:$0xff]  ;;  %v5579_v12 = vld [vmem:[#allocation9_spill] sm:$0xff]  ;;  %v5581_v52 = vld [vmem:[#allocation11_spill] sm:$0xff]  ;;  %v1066_v1 = vmul.f32 1.442695, %v984_v46  ;;  %v5602_v16 = vsub.f32 %v3322_v5, %v3497_v51 }
 0x2c7   : > { %2576 = vpow2.f32 %v1038_v33  ;;  %v5582_v63 = vld [vmem:[#allocation12_spill] sm:$0xff]  ;;  %v1074_v2 = vmul.f32 1.442695, %v988_v6  ;;  %v1078_v17 = vmul.f32 1.442695, %v990_v18 }
 0x2c8   : > { %2578 = vpow2.f32 %v1042_v58  ;;  %v5585_v58 = vld [vmem:[#allocation14_spill] sm:$0xff]  ;;  %v5587_v46 = vld [vmem:[#allocation16_spill] sm:$0xff]  ;;  %v1086_v6 = vmul.f32 1.442695, %v5599_v0  ;;  %v1098_v0 = vmul.f32 1.442695, %v5602_v16 }
 0x2c9   : > { %2580 = vpow2.f32 %v1046_v9  ;;  %v5580_v9 = vld [vmem:[#allocation10_spill] sm:$0xff]  ;;  %v5592_v42 = vld [vmem:[#allocation20_spill] sm:$0xff] }
 0x2ca   : > { %2582 = vpow2.f32 %v1050_v30  ;;  %v5583_v30 = vld [vmem:[#allocation13_spill] sm:$0xff] }
 0x2cb   : > { %2584 = vpow2.f32 %v1054_v19 }
 0x2cc   : > { %2586 = vpow2.f32 %v1058_v3  ;;  %v1070_v3 = vmul.f32 1.442695, %v986_v54 }
 0x2cd   : > { %2588 = vpow2.f32 %v1062_v22  ;;  %v5594_v22 = vld [vmem:[#allocation26_spill] sm:$0xff] }
 0x2ce   : > { %2590 = vpow2.f32 %v1066_v1 }
 0x2cf   : > { %v3577_v33 = vpop.eup %2572  ;;  %2592 = vpow2.f32 %v1070_v3 }
 0x2d0   : > { %v3585_v53 = vpop.eup %2574  ;;  %2594 = vpow2.f32 %v1074_v2  ;;  %v5600_v2 = vsub.f32 %v3298_v27, %v3497_v51 }
 0x2d1   : > { %v1158_v29 = vadd.f32 %v3585_v53, %v3577_v33  ;;  %v3599_v19 = vpop.eup %2576  ;;  %2596 = vpow2.f32 %v1078_v17 }
 0x2d2   : > { %5584 = vst [vmem:[#allocation8_spill] sm:$0xff] %v3599_v19  ;;  %v3612_v45 = vpop.eup %2578 }
 0x2d3   : > { %v1159_v36 = vadd.f32 %v3599_v19, %v1158_v29  ;;  %5590 = vst [vmem:[#allocation9_spill] sm:$0xff] %v3612_v45  ;;  %v3622_v28 = vpop.eup %2580 }
 0x2d4   : > { %5593 = vst [vmem:[#allocation10_spill] sm:$0xff] %v3622_v28  ;;  %v3637_v1 = vpop.eup %2582 }
 0x2d5   : > { %v1160_v29 = vadd.f32 %v3612_v45, %v1159_v36  ;;  %v5596_v36 = vld [vmem:[#allocation28_spill] sm:$0xff]  ;;  %v5598_v45 = vsub.f32 %v3274_v48, %v3497_v51  ;;  %v5601_v48 = vsub.f32 %v3314_v47, %v3497_v51  ;;  %v5605_v47 = vsub.f32 %v3151_v56, %v3499_v40 }
 0x2d7   : > { %v1161_v54 = vadd.f32 %v3622_v28, %v1160_v29  ;;  %v3646_v29 = vpop.eup %2584  ;;  %v1082_v23 = vmul.f32 1.442695, %v5598_v45  ;;  %v1094_v45 = vmul.f32 1.442695, %v5601_v48 }
 0x2d8   : > { %v3652_v28 = vpop.eup %2586 }
 0x2d9   : > { %v1162_v18 = vadd.f32 %v3637_v1, %v1161_v54  ;;  %v3658_v19 = vpop.eup %2588  ;;  %2598 = vpow2.f32 %v1082_v23  ;;  %v1090_v54 = vmul.f32 1.442695, %v5600_v2  ;;  %v5603_v23 = vsub.f32 %v3141_v49, %v3499_v40 }
 0x2da   : > { %v3667_v17 = vpop.eup %2590  ;;  %2600 = vpow2.f32 %v1086_v6  ;;  %v5606_v6 = vsub.f32 %v3338_v32, %v3497_v51  ;;  %v5608_v49 = vsub.f32 %v3143_v50, %v3499_v40  ;;  %v5611_v32 = vsub.f32 %v3155_v60, %v3499_v40 }
 0x2db   : > { %v1163_v3 = vadd.f32 %v3646_v29, %v1162_v18  ;;  %v1032_v27 = vmul.f32 1.442695, %v5603_v23  ;;  %v3676_v2 = vpop.eup %2592  ;;  %2602 = vpow2.f32 %v1090_v54  ;;  %v5609_v54 = vsub.f32 %v3346_v55, %v3497_v51 }
 0x2dc   : > { %5604 = vst [vmem:[#allocation11_spill] sm:$0xff] %v3676_v2  ;;  %2604 = vpow2.f32 %v1094_v45  ;;  %v1102_v48 = vmul.f32 1.442695, %v5606_v6  ;;  %v3685_v16 = vpop.eup %2594  ;;  %v5614_v55 = vsub.f32 %v3175_v15, %v3499_v40 }
 0x2dd   : > { %v1164_v39 = vadd.f32 %v3652_v28, %v1163_v3  ;;  %5607 = vst [vmem:[#allocation12_spill] sm:$0xff] %v3685_v16  ;;  %2606 = vpow2.f32 %v1098_v0  ;;  %v1106_v23 = vmul.f32 1.442695, %v5609_v54  ;;  %v3694_v45 = vpop.eup %2596  ;;  %v5612_v0 = vsub.f32 %v3362_v10, %v3497_v51 }
 0x2de   : > { %2608 = vpow2.f32 %v1032_v27  ;;  %5610 = vst [vmem:[#allocation13_spill] sm:$0xff] %v3694_v45  ;;  %v1048_v27 = vmul.f32 1.442695, %v5614_v55  ;;  %v5616_v10 = vsub.f32 %v3181_v21, %v3499_v40  ;;  %v5619_v21 = vsub.f32 %v3380_v41, %v3497_v51 }
 0x2df   : > { %v1165_v18 = vadd.f32 %v3658_v19, %v1164_v39  ;;  %v1036_v39 = vmul.f32 1.442695, %v5605_v47  ;;  %v1110_v50 = vmul.f32 1.442695, %v5612_v0 }
 0x2e1   : > { %v1166_v3 = vadd.f32 %v3667_v17, %v1165_v18  ;;  %v1040_v18 = vmul.f32 1.442695, %v5608_v49  ;;  %2610 = vpow2.f32 %v1036_v39  ;;  %v5615_v39 = vsub.f32 %v3367_v43, %v3497_v51 }
 0x2e2   : > { %2612 = vpow2.f32 %v1102_v48  ;;  %v1052_v49 = vmul.f32 1.442695, %v5616_v10  ;;  %v5618_v43 = vsub.f32 %v3199_v31, %v3499_v40  ;;  %v5621_v31 = vsub.f32 %v3395_v24, %v3497_v51 }
 0x2e3   : > { %v1167_v5 = vadd.f32 %v3676_v2, %v1166_v3  ;;  %v1044_v3 = vmul.f32 1.442695, %v5611_v32  ;;  %v3703_v6 = vpop.eup %2598  ;;  %2614 = vpow2.f32 %v1040_v18  ;;  %v1114_v60 = vmul.f32 1.442695, %v5615_v39 }
 0x2e4   : > { %5613 = vst [vmem:[#allocation14_spill] sm:$0xff] %v3703_v6  ;;  %2616 = vpow2.f32 %v1106_v23  ;;  %v5617_v18 = vsub.f32 %v3377_v38, %v3497_v51 }
 0x2e5   : > { %v1168_v56 = vadd.f32 %v3685_v16, %v1167_v5  ;;  %v3712_v5 = vpop.eup %2600  ;;  %2618 = vpow2.f32 %v1044_v3  ;;  %v1122_v3 = vmul.f32 1.442695, %v5619_v21 }
 0x2e6   : > { %2620 = vpow2.f32 %v1110_v50  ;;  %v1118_v15 = vmul.f32 1.442695, %v5617_v18  ;;  %v3721_v23 = vpop.eup %2602  ;;  %v5620_v50 = vsub.f32 %v3205_v37, %v3499_v40  ;;  %v5623_v37 = vsub.f32 %v3404_v59, %v3497_v51 }
 0x2e7   : > { %v1169_v47 = vadd.f32 %v3694_v45, %v1168_v56  ;;  %2622 = vpow2.f32 %v1048_v27  ;;  %v1056_v56 = vmul.f32 1.442695, %v5618_v43  ;;  %v3726_v32 = vpop.eup %2604  ;;  %v1126_v27 = vmul.f32 1.442695, %v5621_v31 }
 0x2e8   : > { %2624 = vpow2.f32 %v1114_v60  ;;  %v3732_v38 = vpop.eup %2606  ;;  %v5622_v60 = vsub.f32 %v5578_v44, %v3499_v40  ;;  %v5627_v31 = vsub.f32 %v3441_v20, %v3497_v51 }
 0x2e9   : > { %v1170_v48 = vadd.f32 %v3703_v6, %v1169_v47  ;;  %2626 = vpow2.f32 %v1052_v49  ;;  %v1060_v47 = vmul.f32 1.442695, %v5620_v50  ;;  %v3737_v55 = vpop.eup %2608  ;;  %v1130_v49 = vmul.f32 1.442695, %v5623_v37 }
 0x2ea   : > { %2628 = vpow2.f32 %v1118_v15  ;;  %v5626_v50 = vsub.f32 %v5580_v9, %v3499_v40 }
 0x2eb   : > { %v1171_v54 = vadd.f32 %v3712_v5, %v1170_v48  ;;  %v3743_v41 = vpop.eup %2610  ;;  %2630 = vpow2.f32 %v1056_v56  ;;  %v1064_v48 = vmul.f32 1.442695, %v5622_v60  ;;  %v5625_v56 = vsub.f32 %v3431_v7, %v3497_v51 }
 0x2ec   : > { %v3748_v10 = vpop.eup %2612  ;;  %2632 = vpow2.f32 %v1122_v3  ;;  %v1195_v24 = vadd.f32 %v3743_v41, %v3737_v55 }
 0x2ed   : > { %v1172_v0 = vadd.f32 %v3721_v23, %v1171_v54  ;;  %v3756_v15 = vpop.eup %2614  ;;  %2634 = vpow2.f32 %v1060_v47  ;;  %v5624_v54 = vsub.f32 %v5579_v12, %v3499_v40  ;;  %v1134_v59 = vmul.f32 1.442695, %v5625_v56 }
 0x2ee   : > { %v3761_v43 = vpop.eup %2616  ;;  %2636 = vpow2.f32 %v1126_v27  ;;  %v1196_v3 = vadd.f32 %v3756_v15, %v1195_v24  ;;  %v1072_v47 = vmul.f32 1.442695, %v5626_v50  ;;  %v1138_v27 = vmul.f32 1.442695, %v5627_v31 }
 0x2ef   : > { %v1173_v39 = vadd.f32 %v3726_v32, %v1172_v0  ;;  %v1068_v44 = vmul.f32 1.442695, %v5624_v54  ;;  %v3768_v0 = vpop.eup %2618  ;;  %2638 = vpow2.f32 %v1064_v48  ;;  %v5628_v48 = vsub.f32 %v5581_v52, %v3499_v40 }
 0x2f0   : > { %v3773_v12 = vpop.eup %2620  ;;  %2640 = vpow2.f32 %v1130_v49  ;;  %v5629_v49 = vsub.f32 %v3458_v14, %v3497_v51 }
 0x2f1   : > { %v1174_v18 = vadd.f32 %v3732_v38, %v1173_v39  ;;  %v1197_v39 = vadd.f32 %v3768_v0, %v1196_v3  ;;  %v3780_v60 = vpop.eup %2622  ;;  %2642 = vpow2.f32 %v1068_v44  ;;  %v1076_v37 = vmul.f32 1.442695, %v5628_v48 }
 0x2f2   : > { %v3785_v9 = vpop.eup %2624  ;;  %2644 = vpow2.f32 %v1134_v59  ;;  %v5630_v44 = vsub.f32 %v5582_v63, %v3499_v40  ;;  %v5631_v59 = vsub.f32 %v3466_v13, %v3497_v51 }
 0x2f3   : > { %v1175_v21 = vadd.f32 %v3748_v10, %v1174_v18  ;;  %v1142_v18 = vmul.f32 1.442695, %v5629_v49  ;;  %v1198_v24 = vadd.f32 %v3780_v60, %v1197_v39  ;;  %v3792_v54 = vpop.eup %2626  ;;  %2646 = vpow2.f32 %v1072_v47 }
 0x2f4   : > { %v1080_v56 = vmul.f32 1.442695, %v5630_v44  ;;  %v3797_v52 = vpop.eup %2628  ;;  %2648 = vpow2.f32 %v1138_v27  ;;  %v5632_v47 = vsub.f32 %v5583_v30, %v3499_v40  ;;  %v5633_v27 = vsub.f32 %v3482_v8, %v3497_v51 }
 0x2f5   : > { %v1176_v7 = vadd.f32 %v3761_v43, %v1175_v21  ;;  %v1146_v21 = vmul.f32 1.442695, %v5631_v59  ;;  %v1199_v3 = vadd.f32 %v3792_v54, %v1198_v24  ;;  %v3804_v50 = vpop.eup %2630  ;;  %2650 = vpow2.f32 %v1076_v37 }
 0x2f6   : > { %v1084_v31 = vmul.f32 1.442695, %v5632_v47  ;;  %v3809_v63 = vpop.eup %2632  ;;  %2652 = vpow2.f32 %v1142_v18  ;;  %v5634_v37 = vsub.f32 %v5585_v58, %v3499_v40  ;;  %v5635_v18 = vsub.f32 %v3490_v11, %v3497_v51 }
 0x2f7   : > { %v1177_v20 = vadd.f32 %v3773_v12, %v1176_v7  ;;  %v1150_v7 = vmul.f32 1.442695, %v5633_v27  ;;  %v1200_v39 = vadd.f32 %v3804_v50, %v1199_v3  ;;  %v3816_v48 = vpop.eup %2634  ;;  %2654 = vpow2.f32 %v1080_v56 }
 0x2f8   : > { %v1088_v49 = vmul.f32 1.442695, %v5634_v37  ;;  %v3821_v30 = vpop.eup %2636  ;;  %2656 = vpow2.f32 %v1146_v21  ;;  %v5636_v56 = vsub.f32 %v5586_v35, %v3499_v40  ;;  %v5637_v11 = vsub.f32 %v5587_v46, %v3499_v40 }
 0x2f9   : > { %v1178_v14 = vadd.f32 %v3785_v9, %v1177_v20  ;;  %v1154_v20 = vmul.f32 1.442695, %v5635_v18  ;;  %v1201_v24 = vadd.f32 %v3816_v48, %v1200_v39  ;;  %v3828_v44 = vpop.eup %2638  ;;  %2658 = vpow2.f32 %v1084_v31 }
 0x2fa   : > { %v1092_v59 = vmul.f32 1.442695, %v5636_v56  ;;  %v3833_v58 = vpop.eup %2640  ;;  %2660 = vpow2.f32 %v1150_v7  ;;  %v1096_v3 = vmul.f32 1.442695, %v5637_v11  ;;  %v5639_v7 = vsub.f32 %v5588_v61, %v3499_v40 }
 0x2fb   : > { %v1179_v13 = vadd.f32 %v3797_v52, %v1178_v14  ;;  %v1202_v14 = vadd.f32 %v3828_v44, %v1201_v24  ;;  %v3837_v51 = vpop.eup %2642  ;;  %2662 = vpow2.f32 %v1088_v49  ;;  %v5641_v18 = vsub.f32 %v5589_v57, %v3499_v40 }
 0x2fc   : > { %v3842_v47 = vpop.eup %2644  ;;  %2664 = vpow2.f32 %v1154_v20 }
 0x2fd   : > { %v1180_v8 = vadd.f32 %v3809_v63, %v1179_v13  ;;  %v1203_v31 = vadd.f32 %v3837_v51, %v1202_v14  ;;  %v3846_v27 = vpop.eup %2646  ;;  %2666 = vpow2.f32 %v1092_v59  ;;  %v1100_v13 = vmul.f32 1.442695, %v5639_v7  ;;  %v5643_v59 = vld [vmem:[#allocation21_spill] sm:$0xff]  ;;  %v5646_v7 = vld [vmem:[#allocation22_spill] sm:$0xff] }
 0x2fe   : > { %5638 = vst [vmem:[#allocation15_spill] sm:$0xff] %v3846_v27  ;;  %v3851_v39 = vpop.eup %2648  ;;  %2668 = vpow2.f32 %v1096_v3  ;;  %v1104_v20 = vmul.f32 1.442695, %v5641_v18  ;;  %v5644_v14 = vsub.f32 %v5591_v26, %v3499_v40 }
 0x2ff   : > { %v1181_v21 = vadd.f32 %v3821_v30, %v1180_v8  ;;  %v1204_v46 = vadd.f32 %v3846_v27, %v1203_v31  ;;  %v3855_v49 = vpop.eup %2650  ;;  %2670 = vpow2.f32 %v1100_v13 }
 0x300   : > { %5640 = vst [vmem:[#allocation16_spill] sm:$0xff] %v3855_v49  ;;  %v3860_v8 = vpop.eup %2652  ;;  %v1108_v11 = vmul.f32 1.442695, %v5644_v14  ;;  %2672 = vpow2.f32 %v1104_v20 }
 0x301   : > { %v1182_v35 = vadd.f32 %v3833_v58, %v1181_v21  ;;  %v1205_v61 = vadd.f32 %v3855_v49, %v1204_v46  ;;  %v3864_v56 = vpop.eup %2654  ;;  %v1009_v21 = vsub.f32 %v5643_v59, %v3499_v40  ;;  %v5647_v46 = vsub.f32 %v5592_v42, %v3499_v40 }
 0x302   : > { %5642 = vst [vmem:[#allocation17_spill] sm:$0xff] %v3864_v56  ;;  %v3871_v3 = vpop.eup %2656  ;;  %2674 = vpow2.f32 %v1108_v11 }
 0x303   : > { %v1183_v37 = vadd.f32 %v3842_v47, %v1182_v35  ;;  %v1206_v35 = vadd.f32 %v3864_v56, %v1205_v61  ;;  %v3875_v31 = vpop.eup %2658  ;;  %v1112_v13 = vmul.f32 1.442695, %v5647_v46  ;;  %v1116_v6 = vmul.f32 1.442695, %v1009_v21  ;;  %v5649_v46 = vld [vmem:[#allocation24_spill] sm:$0xff]  ;;  %v5650_v21 = vld [vmem:[#allocation25_spill] sm:$0xff] }
 0x304   : > { %5645 = vst [vmem:[#allocation18_spill] sm:$0xff] %v3875_v31  ;;  %v3882_v18 = vpop.eup %2660  ;;  %v1017_v11 = vsub.f32 %v5650_v21, %v3499_v40 }
 0x305   : > { %v1184_v24 = vadd.f32 %v3851_v39, %v1183_v37  ;;  %v1011_v37 = vsub.f32 %v5646_v7, %v3499_v40  ;;  %v1207_v59 = vadd.f32 %v3875_v31, %v1206_v35  ;;  %v3886_v14 = vpop.eup %2662  ;;  %2676 = vpow2.f32 %v1112_v13 }
 0x306   : > { %v3890_v45 = vpop.eup %2664  ;;  %2678 = vpow2.f32 %v1116_v6  ;;  %v5651_v6 = vsub.f32 %v5594_v22, %v3499_v40  ;;  %v5653_v22 = vsub.f32 %v5596_v36, %v3499_v40 }
 0x307   : > { %v1185_v57 = vadd.f32 %v3860_v8, %v1184_v24  ;;  %v5648_v24 = vld [vmem:[#allocation23_spill] sm:$0xff]  ;;  %v1208_v42 = vadd.f32 %v3886_v14, %v1207_v59  ;;  %v3894_v7 = vpop.eup %2666  ;;  %v1120_v35 = vmul.f32 1.442695, %v1011_v37 }
 0x308   : > { %v1013_v61 = vsub.f32 %v5648_v24, %v3499_v40  ;;  %v3900_v24 = vpop.eup %2668 }
 0x309   : > { %v1186_v26 = vadd.f32 %v3871_v3, %v1185_v57  ;;  %v1015_v57 = vsub.f32 %v5649_v46, %v3499_v40  ;;  %v1209_v56 = vadd.f32 %v3894_v7, %v1208_v42  ;;  %v3905_v2 = vpop.eup %2670  ;;  %2680 = vpow2.f32 %v1120_v35 }
 0x30a   : > { %v1132_v42 = vmul.f32 1.442695, %v1017_v11 }
 0x30b   : > { %v1187_v20 = vadd.f32 %v3882_v18, %v1186_v26  ;;  %v1124_v26 = vmul.f32 1.442695, %v1013_v61  ;;  %v1210_v59 = vadd.f32 %v3900_v24, %v1209_v56  ;;  %v1128_v46 = vmul.f32 1.442695, %v1015_v57 }
 0x30c   : > { %v1136_v56 = vmul.f32 1.442695, %v5651_v6 }
 0x30d   : > { %v1188_v31 = vadd.f32 %v3890_v45, %v1187_v20  ;;  %v1211_v37 = vadd.f32 %v3905_v2, %v1210_v59  ;;  %v3908_v20 = vpop.eup %2672  ;;  %2682 = vpow2.f32 %v1124_v26 }
 0x30e   : > { %v3911_v21 = vpop.eup %2674  ;;  %2684 = vpow2.f32 %v1128_v46  ;;  %v1144_v46 = vmul.f32 1.442695, %v5653_v22 }
 0x30f   : > { %v1189_v16 = vrot.slane %v1188_v31, 4  ;;  %v1212_v27 = vadd.f32 %v3908_v20, %v1211_v37  ;;  %2686 = vpow2.f32 %v1132_v42 }
 0x310   : > { %2688 = vpow2.f32 %v1136_v56  ;;  %v5655_v56 = vsub.f32 %v3487_v4, %v3499_v40 }
 0x311   : > { %v1190_v13 = vadd.f32 %v1189_v16, %v1188_v31  ;;  %v1213_v57 = vadd.f32 %v3911_v21, %v1212_v27  ;;  %v3917_v16 = vpop.eup %2676  ;;  %v5652_v31 = vsub.f32 %v5595_v34, %v3499_v40  ;;  %v5654_v27 = vsub.f32 %v5597_v25, %v3499_v40 }
 0x312   : > { %v3923_v59 = vpop.eup %2678  ;;  %v1152_v36 = vmul.f32 1.442695, %v5655_v56 }
 0x313   : > { %v1191_v49 = vrot.slane %v1190_v13, 2  ;;  %v1140_v35 = vmul.f32 1.442695, %v5652_v31  ;;  %v1214_v26 = vadd.f32 %v3917_v16, %v1213_v57  ;;  %v3932_v37 = vpop.eup %2680  ;;  %v5656_v31 = vsub.f32 %v3493_v62, %v3499_v40 }
 0x315   : > { %v1192_v61 = vadd.f32 %v1191_v49, %v1190_v13  ;;  %v1148_v49 = vmul.f32 1.442695, %v5654_v27  ;;  %v1215_v13 = vadd.f32 %v3923_v59, %v1214_v26  ;;  %2690 = vpow2.f32 %v1140_v35 }
 0x316   : > { %2692 = vpow2.f32 %v1144_v46 }
 0x317   : > { %v1193_v11 = vrot.slane %v1192_v61, 1  ;;  %v1216_v42 = vadd.f32 %v3932_v37, %v1215_v13  ;;  %v3935_v6 = vpop.eup %2682  ;;  %2694 = vpow2.f32 %v1148_v49 }
 0x318   : > { %v3941_v25 = vpop.eup %2684 }
 0x319   : > { %v1194_v34 = vadd.f32 %v1193_v11, %v1192_v61  ;;  %v1217_v57 = vadd.f32 %v3935_v6, %v1216_v42  ;;  %v1156_v61 = vmul.f32 1.442695, %v5656_v31  ;;  %v3947_v11 = vpop.eup %2686 }
 0x31a   : > { %v3950_v22 = vpop.eup %2688 }
 0x31b   : > { %2696 = vrcp.f32 %v1194_v34  ;;  %v1218_v35 = vadd.f32 %v3941_v25, %v1217_v57 }
 0x31c   : > { %2698 = vpow2.f32 %v1152_v36 }
 0x31d   : > { %v1219_v26 = vadd.f32 %v3947_v11, %v1218_v35  ;;  %2700 = vpow2.f32 %v1156_v61 }
 0x31f   : > { %v1220_v4 = vadd.f32 %v3950_v22, %v1219_v26  ;;  %v3953_v46 = vpop.eup %2690 }
 0x320   : > { %v3956_v49 = vpop.eup %2692 }
 0x321   : > { %v1221_v27 = vadd.f32 %v3953_v46, %v1220_v4  ;;  %v3958_v62 = vpop.eup %2694 }
 0x323   : > { %v1222_v40 = vadd.f32 %v3956_v49, %v1221_v27 }
 0x325   : > { %v3961_v13 = vpop.eup %2696  ;;  %v1223_v34 = vadd.f32 %v3958_v62, %v1222_v40 }
 0x326   : > { %v3964_v42 = vpop.eup %2698  ;;  %v3969_v36 = vmul.f32 %v3961_v13, %v3712_v5  ;;  %v3973_v57 = vmul.f32 %v3961_v13, %v3721_v23  ;;  %v3979_v61 = vmul.f32 %v3961_v13, %v3726_v32  ;;  %v3983_v35 = vmul.f32 %v3961_v13, %v3732_v38 }
 0x327   : > { %v1224_v56 = vadd.f32 %v3964_v42, %v1223_v34  ;;  %v3975_v31 = vpop.eup %2700  ;;  %v3990_v4 = vmul.f32 %v3961_v13, %v3748_v10  ;;  %v3994_v23 = vmul.f32 %v3961_v13, %v3761_v43  ;;  %v4000_v38 = vmul.f32 %v3961_v13, %v3773_v12 }
 0x328   : > { %v4004_v27 = vmul.f32 %v3961_v13, %v3785_v9  ;;  %v4008_v40 = vmul.f32 %v3961_v13, %v3797_v52  ;;  %v4014_v34 = vmul.f32 %v3961_v13, %v3809_v63  ;;  %v4018_v12 = vmul.f32 %v3961_v13, %v3821_v30 }
 0x329   : > { %v1225_v26 = vadd.f32 %v3975_v31, %v1224_v56  ;;  %v4024_v56 = vmul.f32 %v3961_v13, %v3833_v58  ;;  %v4028_v52 = vmul.f32 %v3961_v13, %v3842_v47  ;;  %v4032_v43 = vmul.f32 %v3961_v13, %v3851_v39 }
 0x32a   : > { %5657 = vst [vmem:[#allocation19_spill] sm:$0xff] %v4018_v12  ;;  %v4038_v32 = vmul.f32 %v3961_v13, %v3860_v8  ;;  %v4042_v58 = vmul.f32 %v3961_v13, %v3871_v3  ;;  %v4050_v39 = vmul.f32 %v3961_v13, %v3882_v18  ;;  %v1234_v18 = vmul.f32 %v3961_v13, %v3577_v33  ;;  %v5661_v12 = vld [vmem:[#allocation9_spill] sm:$0xff] }
 0x32b   : > { %v1226_v10 = vrot.slane %v1225_v26, 4  ;;  %5658 = vst [vmem:[#allocation20_spill] sm:$0xff] %v4028_v52  ;;  %5659 = vst [vmem:[#allocation26_spill] sm:$0xff] %v4032_v43  ;;  %v5660_v52 = vld [vmem:[#allocation8_spill] sm:$0xff] }
 0x32c   : > { %v1238_v43 = vmul.f32 %v3961_v13, %v5660_v52 }
 0x32d   : > { %v1227_v63 = vadd.f32 %v1226_v10, %v1225_v26  ;;  %v4054_v26 = vmul.f32 %v3961_v13, %v3890_v45  ;;  %v1236_v45 = vmul.f32 %v3961_v13, %v3585_v53  ;;  %v1240_v10 = vmul.f32 %v3961_v13, %v5661_v12 }
 0x32f   : > { %v1228_v8 = vrot.slane %v1227_v63, 2  ;;  %v1298_v12 = vpack.c.bf16 %v1236_v45, %v1234_v18 }
 0x331   : > { %v1229_v30 = vadd.f32 %v1228_v8, %v1227_v63  ;;  %v5662_v8 = vld [vmem:[#allocation10_spill] sm:$0xff] }
 0x333   : > { %v1230_v47 = vrot.slane %v1229_v30, 1 }
 0x335   : > { %v1231_v5 = vadd.f32 %v1230_v47, %v1229_v30 }
 0x337   : > { %2702 = vrcp.f32 %v1231_v5 }
 0x341   : > { %v4060_v9 = vpop.eup %2702 }
 0x342   : > { %v1235_v63 = vmul.f32 %v4060_v9, %v3737_v55  ;;  %v1237_v5 = vmul.f32 %v4060_v9, %v3743_v41  ;;  %v1239_v30 = vmul.f32 %v4060_v9, %v3756_v15  ;;  %v1241_v33 = vmul.f32 %v4060_v9, %v3768_v0 }
 0x343   : > { %v1243_v53 = vmul.f32 %v4060_v9, %v3780_v60  ;;  %v1245_v52 = vmul.f32 %v4060_v9, %v3792_v54  ;;  %v1242_v55 = vmul.f32 %v3961_v13, %v5662_v8  ;;  %v1244_v41 = vmul.f32 %v3961_v13, %v3637_v1 }
 0x344   : > { %v1299_v47 = vpack.c.bf16 %v1237_v5, %v1235_v63  ;;  %v1246_v15 = vmul.f32 %v3961_v13, %v3646_v29  ;;  %v1301_v3 = vpack.c.bf16 %v1241_v33, %v1239_v30  ;;  %v1300_v0 = vpack.c.bf16 %v1240_v10, %v1238_v43 }
 0x345   : > { %v1247_v63 = vmul.f32 %v4060_v9, %v3804_v50  ;;  %v4092_v60 = vmul.f32 %v4060_v9, %v3886_v14  ;;  %v1249_v54 = vmul.f32 %v4060_v9, %v3816_v48  ;;  %v1265_v1 = vmul.f32 %v4060_v9, %v3894_v7 }
 0x346   : > { %1334 = vmatprep.subr.bf16.mxu0 %v1299_v47  ;;  %v1267_v29 = vmul.f32 %v4060_v9, %v3900_v24  ;;  %v1269_v43 = vmul.f32 %v4060_v9, %v3905_v2  ;;  %v1303_v10 = vpack.c.bf16 %v1245_v52, %v1243_v53  ;;  %v1271_v50 = vmul.f32 %v4060_v9, %v3908_v20 }
 0x347   : > { %1335 = vmatpush1.bf16.msra.mxu0 %v1298_v12  ;;  %v1273_v14 = vmul.f32 %v4060_v9, %v3911_v21  ;;  %v1275_v48 = vmul.f32 %v4060_v9, %v3917_v16  ;;  %v1313_v18 = vpack.c.bf16 %v1265_v1, %v4092_v60  ;;  %v1277_v24 = vmul.f32 %v4060_v9, %v3923_v59  ;;  %v5667_v1 = vld [vmem:[#allocation17_spill] sm:$0xff] }
 0x348   : > { %1336 = vmatprep.subr.bf16.mxu0 %v1301_v3  ;;  %v1315_v7 = vpack.c.bf16 %v1269_v43, %v1267_v29  ;;  %v1279_v2 = vmul.f32 %v4060_v9, %v3932_v37  ;;  %v1281_v45 = vmul.f32 %v4060_v9, %v3935_v6  ;;  %v1283_v20 = vmul.f32 %v4060_v9, %v3941_v25  ;;  %v5668_v29 = vld [vmem:[#allocation18_spill] sm:$0xff] }
 0x349   : > { %v1317_v3 = vpack.c.bf16 %v1273_v14, %v1271_v50  ;;  %v1285_v21 = vmul.f32 %v4060_v9, %v3947_v11  ;;  %v1319_v16 = vpack.c.bf16 %v1277_v24, %v1275_v48  ;;  %v1287_v5 = vmul.f32 %v4060_v9, %v3950_v22  ;;  %v5669_v50 = vld [vmem:[#allocation13_spill] sm:$0xff]  ;;  %v5670_v48 = vld [vmem:[#allocation14_spill] sm:$0xff] }
 0x34a   : > { %v1289_v59 = vmul.f32 %v4060_v9, %v3953_v46  ;;  %v1291_v37 = vmul.f32 %v4060_v9, %v3956_v49  ;;  %v1321_v30 = vpack.c.bf16 %v1281_v45, %v1279_v2  ;;  %v1293_v25 = vmul.f32 %v4060_v9, %v3958_v62 }
 0x34b   : > { %1337 = vmatpush1.bf16.msra.mxu0 %v1300_v0  ;;  %v1323_v6 = vpack.c.bf16 %v1285_v21, %v1283_v20  ;;  %v1295_v11 = vmul.f32 %v4060_v9, %v3964_v42  ;;  %v1302_v33 = vpack.c.bf16 %v1244_v41, %v1242_v55  ;;  %v1248_v47 = vmul.f32 %v3961_v13, %v3652_v28  ;;  %v5664_v0 = vld [vmem:[#allocation16_spill] sm:$0xff] }
 0x34c   : > { %1338 = vmatprep.subr.bf16.mxu0 %v1303_v10  ;;  %v1325_v22 = vpack.c.bf16 %v1289_v59, %v1287_v5  ;;  %v1297_v46 = vmul.f32 %v4060_v9, %v3975_v31  ;;  %v1305_v53 = vpack.c.bf16 %v1249_v54, %v1247_v63  ;;  %v1251_v49 = vmul.f32 %v4060_v9, %v3828_v44  ;;  %v5663_v31 = vld [vmem:[#allocation15_spill] sm:$0xff]  ;;  %v5690_v5 = vld [vmem:[#allocation4_spill] sm:$0xff] }
 0x34d   : > { %v1253_v52 = vmul.f32 %v4060_v9, %v3837_v51  ;;  %v1327_v12 = vpack.c.bf16 %v1293_v25, %v1291_v37  ;;  %v1304_v42 = vpack.c.bf16 %v1248_v47, %v1246_v15  ;;  %v1250_v8 = vmul.f32 %v3961_v13, %v3658_v19  ;;  %v5665_v63 = vld [vmem:[#allocation11_spill] sm:$0xff]  ;;  %v5666_v15 = vld [vmem:[#allocation12_spill] sm:$0xff]  ;;  %v2839_v47 = vld [vmem:[%s2981_s10] sm:$0xff] }
 0x34e   : > { %v1329_v62 = vpack.c.bf16 %v1297_v46, %v1295_v11  ;;  %v1252_v28 = vmul.f32 %v3961_v13, %v3667_v17  ;;  %v1255_v41 = vmul.f32 %v4060_v9, %v5663_v31  ;;  %v1257_v44 = vmul.f32 %v4060_v9, %v5664_v0  ;;  %v2838_v11 = vld [vmem:[%s2981_s10 + $0x18] sm:$0xff]  ;;  %v2843_v0 = vld [vmem:[%s2981_s10 + $0x20] sm:$0xff] }
 0x34f   : > { %1339 = vmatpush1.bf16.msra.mxu0 %v1302_v33  ;;  %v1307_v55 = vpack.c.bf16 %v1253_v52, %v1251_v49  ;;  %v1254_v60 = vmul.f32 %v3961_v13, %v5665_v63  ;;  %v1256_v54 = vmul.f32 %v3961_v13, %v5666_v15  ;;  %v1259_v17 = vmul.f32 %v4060_v9, %v5667_v1  ;;  %v2842_v31 = vld [vmem:[%s2981_s10 + $0x38] sm:$0xff] }
 0x350   : > { %1340 = vmatprep.subr.bf16.mxu0 %v1305_v53  ;;  %v1306_v51 = vpack.c.bf16 %v1252_v28, %v1250_v8  ;;  %v1309_v19 = vpack.c.bf16 %v1257_v44, %v1255_v41  ;;  %v1261_v43 = vmul.f32 %v4060_v9, %v5668_v29  ;;  %v1258_v14 = vmul.f32 %v3961_v13, %v5669_v50  ;;  %v2841_v28 = vld [vmem:[%s2981_s10 + $0x28] sm:$0xff]  ;;  %v1485_v1 = vld [vmem:[%s5419_s5 + $0x18] sm:$0xff] }
 0x351   : > { %v1308_v10 = vpack.c.bf16 %v1256_v54, %v1254_v60  ;;  %v1260_v24 = vmul.f32 %v3961_v13, %v5670_v48  ;;  %v5671_v20 = vpack.c.bf16 %v3973_v57, %v3969_v36  ;;  %v5672_v9 = vpack.c.bf16 %v3983_v35, %v3979_v61  ;;  %v5676_v57 = vld [vmem:[#allocation19_spill] sm:$0xff]  ;;  %v5678_v35 = vld [vmem:[#allocation26_spill] sm:$0xff] }
 0x352   : > { %v1311_v2 = vpack.c.bf16 %v1261_v43, %v1259_v17  ;;  %v5673_v21 = vpack.c.bf16 %v3994_v23, %v3990_v4  ;;  %v5674_v13 = vpack.c.bf16 %v4004_v27, %v4000_v38  ;;  %v5675_v36 = vpack.c.bf16 %v4014_v34, %v4008_v40  ;;  %v5679_v4 = vld [vmem:[#allocation20_spill] sm:$0xff]  ;;  %v5683_v40 = vld [vmem:[#allocation3_spill] sm:$0xff]  ;;  %v5684_v34 = vld [vmem:[#allocation2_spill] sm:$0xff] }
 0x353   : > { %1341 = vmatpush1.bf16.msra.mxu0 %v1304_v42  ;;  %v1310_v45 = vpack.c.bf16 %v1260_v24, %v1258_v14  ;;  %v5677_v61 = vpack.c.bf16 %v4024_v56, %v5676_v57  ;;  %v5680_v23 = vpack.c.bf16 %v5678_v35, %v5679_v4  ;;  %v5681_v38 = vpack.c.bf16 %v4042_v58, %v4038_v32  ;;  %v1387_v60 = vld [vmem:[%s5419_s5] sm:$0xff]  ;;  %v1388_v54 = vld [vmem:[%s5419_s5 + $0x8] sm:$0xff]  ;;  %v1489_v4 = vld [vmem:[%s5420_s6 + $0x18] sm:$0xff] }
 0x354   : > { %1342 = vmatprep.subr.bf16.mxu0 %v1307_v55  ;;  %v5682_v27 = vpack.c.bf16 %v4054_v26, %v4050_v39  ;;  %v5685_v56 = vpack.c.bf16 %v5683_v40, %v5684_v34  ;;  %v2837_v26 = vld [vmem:[%s2981_s10 + $0x8] sm:$0xff]  ;;  %v5700_v15 = vmov 0.0   ;;  %v1486_v17 = vld [vmem:[%s5419_s5 + $0x20] sm:$0xff]  ;;  %v5701_v43 = vmov 0   ;;  %v1488_v40 = vld [vmem:[%s5420_s6 + $0x10] sm:$0xff] }
 0x355   : > { %v1487_v29 = vld [vmem:[%s5419_s5 + $0x28] sm:$0xff] }
 0x357   : > { %1343 = vmatpush1.bf16.msra.mxu0 %v1306_v51 }
 0x358   : > { %1344 = vmatprep.subr.bf16.mxu0 %v1309_v19  ;;  %v1484_v19 = vld [vmem:[%s5419_s5 + $0x10] sm:$0xff] }
 0x35b   : > { %1345 = vmatpush1.bf16.msra.mxu0 %v1308_v10  ;;  %v1399_v10 = vpop.permute.xlu0 %1398 }
 0x35c   : > { %1346 = vmatprep.subr.bf16.mxu0 %v1311_v2 }
 0x35f   : > { %1347 = vmatpush1.bf16.msra.mxu0 %v1310_v45  ;;  %v1394_v50 = vpop.permute.xlu0 %1393 }
 0x360   : > { %1348 = vmatprep.subr.bf16.mxu0 %v1313_v18  ;;  %v5686_v18 = vld [vmem:[#allocation7_spill] sm:$0xff] }
 0x363   : > { %1349 = vmatpush1.bf16.msra.mxu0 %v5671_v20 }
 0x364   : > { %1350 = vmatprep.subr.bf16.mxu0 %v1315_v7  ;;  %v5687_v7 = vld [vmem:[#allocation6_spill] sm:$0xff] }
 0x367   : > { %1351 = vmatpush1.bf16.msra.mxu0 %v5672_v9 }
 0x368   : > { %1352 = vmatprep.subr.bf16.mxu0 %v1317_v3  ;;  %v5688_v3 = vpack.c.bf16 %v5686_v18, %v5687_v7  ;;  %v1491_v18 = vld [vmem:[%s5420_s6 + $0x28] sm:$0xff] }
 0x36b   : > { %1353 = vmatpush1.bf16.msra.mxu0 %v5673_v21 }
 0x36c   : > { %1354 = vmatprep.subr.bf16.mxu0 %v1319_v16  ;;  %v5689_v16 = vld [vmem:[#allocation5_spill] sm:$0xff] }
 0x36d   : > { %v5691_v59 = vpack.c.bf16 %v5689_v16, %v5690_v5 }
 0x36f   : > { %1355 = vmatpush1.bf16.msra.mxu0 %v5674_v13 }
 0x370   : > { %1356 = vmatprep.subr.bf16.mxu0 %v1321_v30  ;;  %v2836_v30 = vld [vmem:[%s2981_s10 + $0x10] sm:$0xff] }
 0x373   : > { %1357 = vmatpush1.bf16.msra.mxu0 %v5675_v36 }
 0x374   : > { %1358 = vmatprep.subr.bf16.mxu0 %v1323_v6 }
 0x377   : > { %1359 = vmatpush1.bf16.msra.mxu0 %v5677_v61 }
 0x378   : > { %1360 = vmatprep.subr.bf16.mxu0 %v1325_v22 }
 0x37b   : > { %1361 = vmatpush1.bf16.msra.mxu0 %v5680_v23 }
 0x37c   : > { %1362 = vmatprep.subr.bf16.mxu0 %v1327_v12 }
 0x37f   : > { %1363 = vmatpush1.bf16.msra.mxu0 %v5681_v38 }
 0x380   : > { %1364 = vmatprep.subr.bf16.mxu0 %v1329_v62  ;;  %v2840_v62 = vld [vmem:[%s2981_s10 + $0x30] sm:$0xff] }
 0x383   : > { %1365 = vmatpush1.bf16.msra.mxu0 %v5682_v27 }
 0x386   : > { %1367 = vmatmul.mubr.bf16.vlgmr.msra.gmra.mrb[76].mxu0 %v5685_v56  ;;  %v1490_v56 = vld [vmem:[%s5420_s6 + $0x20] sm:$0xff] }
 0x387   : > { %1376 = vmatprep.mubr.bf16.mxu0 %v5688_v3 }
 0x38e   : > { %1377 = vmatmul.mubr.bf16.gmra.mrb[80].mxu0 %v5691_v59 }
 0x459   : > { %v1368_v32 = vpop.f32.mrb[76].mxu0 }
 0x45a   : > { %v1370_v58 = vpop.f32.mrb[77].mxu0  ;;  %v4203_v22 = vadd.f32 %v2839_v47, %v1368_v32 }
 0x45b   : > { %v1372_v37 = vpop.f32.mrb[78].mxu0  ;;  %v4197_v25 = vadd.f32 %v2837_v26, %v1370_v58 }
 0x45c   : > { %v4194_v6 = vadd.f32 %v2836_v30, %v1372_v37  ;;  %v1374_v39 = vpop.f32.mrb[79].mxu0  ;;  %5695 = vst [vmem:[#allocation21_spill] sm:$0xff] %v4203_v22 }
 0x45d   : > { %5693 = vst [vmem:[#allocation28_spill] sm:$0xff] %v4197_v25  ;;  %v4200_v33 = vadd.f32 %v2838_v11, %v1374_v39 }
 0x45e   : > { %5692 = vst [vmem:[#allocation27_spill] sm:$0xff] %v4194_v6  ;;  %v2546_v53 = vpack.c.bf16 %v4194_v6, %v4203_v22 }
 0x45f   : > { %5694 = vst [vmem:[#allocation29_spill] sm:$0xff] %v4200_v33  ;;  %v2544_v46 = vpack.c.bf16 %v4200_v33, %v4197_v25 }
 0x461   : > { %v1378_v49 = vpop.f32.mrb[80].mxu0  ;;  %2545 = vmatprep.subr.bf16.mxu1 %v2544_v46 }
 0x462   : > { %v1380_v52 = vpop.f32.mrb[81].mxu0  ;;  %2547 = vmatpush1.bf16.msra.mxu1 %v2546_v53  ;;  %v4219_v44 = vadd.f32 %v2843_v0, %v1378_v49 }
 0x463   : > { %v1382_v12 = vpop.f32.mrb[82].mxu0  ;;  %v4213_v55 = vadd.f32 %v2841_v28, %v1380_v52 }
 0x464   : > { %v4210_v42 = vadd.f32 %v2840_v62, %v1382_v12  ;;  %v1384_v8 = vpop.f32.mrb[83].mxu0  ;;  %5699 = vst [vmem:[#allocation25_spill] sm:$0xff] %v4219_v44 }
 0x465   : > { %5697 = vst [vmem:[#allocation23_spill] sm:$0xff] %v4213_v55  ;;  %v4216_v41 = vadd.f32 %v2842_v31, %v1384_v8 }
 0x466   : > { %5696 = vst [vmem:[#allocation22_spill] sm:$0xff] %v4210_v42  ;;  %v2550_v63 = vpack.c.bf16 %v4210_v42, %v4219_v44 }
 0x467   : > { %5698 = vst [vmem:[#allocation24_spill] sm:$0xff] %v4216_v41  ;;  %v2548_v51 = vpack.c.bf16 %v4216_v41, %v4213_v55  ;;  %v2884_v55 = vld [vmem:[%s5414_s0 + $0x140] sm:$0xff] }
 0x469   : > { %2549 = vmatprep.subr.bf16.mxu1 %v2548_v51 }
 0x46a   : > { %2551 = vmatpush1.bf16.msra.mxu1 %v2550_v63 }
 0x46b   : > { %2553 = vmatprep.subr.bf16.mxu1 %v2544_v46 }
 0x46d   : > { %2500 = vmatmul.mubr.msk.f32.vlgmr.msra.gmra.mrb[0].mxu1 %vm394_vm0, %v1387_v60 }
 0x46e   : > { %2555 = vmatpush1.bf16.msra.mxu1 %v2546_v53  ;;  %1477 = vmatprep.mubr.f32.mxu1 %v5700_v15 }
 0x46f   : > { %2557 = vmatprep.subr.bf16.mxu1 %v2548_v51 }
 0x471   : > { %2501 = vmatmul.mubr.msk.f32.gmra.mrb[2].mxu1 %vm394_vm0, %v1388_v54 }
 0x472   : > { %2559 = vmatpush1.bf16.msra.mxu1 %v2550_v63  ;;  %1588 = vmatprep.mubr.f32.mxu1 %v5700_v15 }
 0x475   : > { %2502 = vmatmul.mubr.msk.f32.vlgmr.msra.gmra.mrb[4].mxu1 %vm394_vm0, %v1484_v19 }
 0x476   : > { %1594 = vmatprep.mubr.f32.mxu1 %v5700_v15 }
 0x479   : > { %2503 = vmatmul.mubr.msk.f32.gmra.mrb[6].mxu1 %vm394_vm0, %v1485_v1 }
 0x47a   : > { %1600 = vmatprep.mubr.f32.mxu1 %v5700_v15 }
 0x47d   : > { %2504 = vmatmul.mubr.msk.f32.gmra.mrb[8].mxu1 %vm394_vm0, %v1486_v17 }
 0x47e   : > { %1606 = vmatprep.mubr.f32.mxu1 %v5700_v15 }
 0x481   : > { %2505 = vmatmul.mubr.msk.f32.gmra.mrb[10].mxu1 %vm394_vm0, %v1487_v29 }
 0x482   : > { %1735 = vmatprep.mubr.bf16.mxu1 %v5701_v43 }
 0x540   : > { %v1473_v14 = vpop.f32.mrb[0].mxu1 }
 0x541   : > { %v1474_v48 = vadd.f32 %v1473_v14, %v1394_v50  ;;  %v1475_v24 = vpop.f32.mrb[1].mxu1 }
 0x542   : > { %v1476_v2 = vadd.f32 %v1475_v24, %v1394_v50 }
 0x543   : > { %v1613_v45 = vpack.c.bf16 %v1474_v48, %v1474_v48  ;;  %v2880_v48 = vld [vmem:[%s5414_s0 + $0x120] sm:$0xff] }
 0x544   : > { %v1614_v20 = vpack.c.bf16 %v1476_v2, %v1476_v2  ;;  %v1479_v9 = vpop.f32.mrb[2].mxu1 }
 0x545   : > { %v1698_v21 = vsel %vm692_vm1, %v1613_v45, 0  ;;  %v1480_v13 = vadd.f32 %v1479_v9, %v1399_v10  ;;  %v1481_v36 = vpop.f32.mrb[3].mxu1 }
 0x546   : > { %v1482_v57 = vadd.f32 %v1481_v36, %v1399_v10  ;;  %2506 = vmatprep.subr.msk.bf16.mxu1 %vm692_vm1, %v1614_v20  ;;  %v2845_v36 = vld [vmem:[%s5414_s0 + $0x20] sm:$0xff] }
 0x547   : > { %v1615_v61 = vpack.c.bf16 %v1480_v13, %v1480_v13  ;;  %1704 = vmatpush1.bf16.msra.mxu1 %v1698_v21  ;;  %v2844_v21 = vld [vmem:[%s5414_s0] sm:$0xff] }
 0x548   : > { %v1616_v35 = vpack.c.bf16 %v1482_v57, %v1482_v57  ;;  %v1590_v23 = vpop.f32.mrb[4].mxu1 }
 0x549   : > { %1617 = vxpose.xlu0.c.b16.start.end [1/1] (short) %v1615_v61, 128  ;;  %v1592_v38 = vpop.f32.mrb[5].mxu1  ;;  %v2846_v61 = vld [vmem:[%s5414_s0 + $0x8] sm:$0xff] }
 0x54a   : > { %1633 = vxpose.xlu1.c.b16.start.end [1/1] (short) %v1616_v35, 128 }
 0x54c   : > { %v1596_v27 = vpop.f32.mrb[6].mxu1 }
 0x54d   : > { %v1598_v34 = vpop.f32.mrb[7].mxu1 }
 0x54e   : > { %2571 = vset.pattern.permute.xlu1 %v5701_v43 }
 0x550   : > { %v1602_v32 = vpop.f32.mrb[8].mxu1 }
 0x551   : > { %v1604_v58 = vpop.f32.mrb[9].mxu1 }
 0x554   : > { %v1608_v39 = vpop.f32.mrb[10].mxu1 }
 0x555   : > { %v1610_v26 = vpop.f32.mrb[11].mxu1 }
 0x56a   : > { %1499 = vperm.xlu1 %2571, %v1489_v4   ;;  %v2847_v4 = vld [vmem:[%s5414_s0 + $0x28] sm:$0xff] }
 0x56e   : > { %1494 = vperm.xlu0 %2570, %v1488_v40   ;;  %1504 = vperm.xlu1 %2571, %v1490_v56   ;;  %v2849_v56 = vld [vmem:[%s5414_s0 + $0x30] sm:$0xff] }
 0x572   : > { %1509 = vperm.xlu1 %2571, %v1491_v18  }
 0x5af   : > { %v1625_v7 = vpop.trf.xlu0 }
 0x5b0   : > { %2507 = vmatmul.mubr.msk.bf16.vlgmr.msra.gmra.mrb[12].mxu1 %vm643_vm2, %v1625_v7  ;;  %v1641_v16 = vpop.trf.xlu1 }
 0x5b1   : > { %1745 = vmatprep.mubr.bf16.mxu1 %v5701_v43 }
 0x5b3   : > { %v1626_v3 = vpop.trf.xlu0 }
 0x5b4   : > { %v1642_v59 = vpop.trf.xlu1 }
 0x5b7   : > { %v1627_v5 = vpop.trf.xlu0 }
 0x5b8   : > { %2508 = vmatmul.mubr.msk.bf16.gmra.mrb[16].mxu1 %vm643_vm2, %v1626_v3  ;;  %v1643_v30 = vpop.trf.xlu1  ;;  %v2850_v3 = vld [vmem:[%s5414_s0 + $0x18] sm:$0xff] }
 0x5b9   : > { %1755 = vmatprep.mubr.bf16.mxu1 %v5701_v43 }
 0x5bb   : > { %v1628_v37 = vpop.trf.xlu0 }
 0x5bc   : > { %v1644_v11 = vpop.trf.xlu1 }
 0x5bf   : > { %v1629_v47 = vpop.trf.xlu0 }
 0x5c0   : > { %2509 = vmatmul.mubr.msk.bf16.gmra.mrb[20].mxu1 %vm643_vm2, %v1627_v5  ;;  %v1645_v46 = vpop.trf.xlu1 }
 0x5c1   : > { %1765 = vmatprep.mubr.bf16.mxu1 %v5701_v43 }
 0x5c3   : > { %v1630_v53 = vpop.trf.xlu0 }
 0x5c4   : > { %v1646_v49 = vpop.trf.xlu1 }
 0x5c7   : > { %v1631_v52 = vpop.trf.xlu0 }
 0x5c8   : > { %2510 = vmatmul.mubr.msk.bf16.gmra.mrb[24].mxu1 %vm643_vm2, %v1628_v37  ;;  %v1647_v12 = vpop.trf.xlu1 }
 0x5c9   : > { %1775 = vmatprep.mubr.bf16.mxu1 %v5701_v43 }
 0x5cb   : > { %v1632_v8 = vpop.trf.xlu0 }
 0x5cc   : > { %v1648_v62 = vpop.trf.xlu1 }
 0x5d0   : > { %2511 = vmatmul.mubr.msk.bf16.gmra.mrb[28].mxu1 %vm643_vm2, %v1629_v47  ;;  %v2853_v47 = vld [vmem:[%s5414_s0 + $0x48] sm:$0xff] }
 0x5d1   : > { %1785 = vmatprep.mubr.bf16.mxu1 %v5701_v43 }
 0x5d8   : > { %2512 = vmatmul.mubr.msk.bf16.gmra.mrb[32].mxu1 %vm643_vm2, %v1630_v53 }
 0x5d9   : > { %1795 = vmatprep.mubr.bf16.mxu1 %v5701_v43 }
 0x5e0   : > { %2513 = vmatmul.mubr.msk.bf16.gmra.mrb[36].mxu1 %vm643_vm2, %v1631_v52  ;;  %v2854_v52 = vld [vmem:[%s5414_s0 + $0x50] sm:$0xff] }
 0x5e1   : > { %1805 = vmatprep.mubr.bf16.mxu1 %v5701_v43 }
 0x5e8   : > { %2514 = vmatmul.mubr.msk.bf16.gmra.mrb[40].mxu1 %vm643_vm2, %v1632_v8 }
 0x5e9   : > { %v1500_v28 = vpop.permute.xlu1 %1499  ;;  %1815 = vmatprep.mubr.bf16.mxu1 %v5701_v43 }
 0x5ea   : > { %v4286_v31 = vadd.f32 %v1596_v27, %v1500_v28  ;;  %v1599_v0 = vadd.f32 %v1598_v34, %v1500_v28  ;;  %v2848_v27 = vld [vmem:[%s5414_s0 + $0x10] sm:$0xff]  ;;  %v2855_v28 = vld [vmem:[%s5414_s0 + $0x58] sm:$0xff] }
 0x5ec   : > { %5702 = vst [vmem:[#allocation8_spill] sm:$0xff] %v4286_v31  ;;  %v2894_v31 = vld [vmem:[%s5414_s0 + $0x188] sm:$0xff] }
 0x5ed   : > { %v1495_v51 = vpop.permute.xlu0 %1494  ;;  %v1505_v19 = vpop.permute.xlu1 %1504 }
 0x5ee   : > { %v4288_v63 = vadd.f32 %v1590_v23, %v1495_v51  ;;  %v1593_v60 = vadd.f32 %v1592_v38, %v1495_v51  ;;  %v4294_v1 = vadd.f32 %v1602_v32, %v1505_v19  ;;  %v4296_v17 = vadd.f32 %v1604_v58, %v1505_v19  ;;  %v2856_v19 = vld [vmem:[%s5414_s0 + $0x60] sm:$0xff] }
 0x5f0   : > { %5703 = vst [vmem:[#allocation9_spill] sm:$0xff] %v4288_v63  ;;  %v2335_v54 = vpack.c.bf16 %v1599_v0, %v1593_v60  ;;  %2515 = vmatmul.mubr.msk.bf16.gmra.mrb[44].mxu1 %vm643_vm2, %v1641_v16  ;;  %5704 = vst [vmem:[#allocation10_spill] sm:$0xff] %v4294_v1 }
 0x5f1   : > { %1825 = vmatprep.mubr.bf16.mxu1 %v5701_v43  ;;  %5705 = vst [vmem:[#allocation15_spill] sm:$0xff] %v4296_v17  ;;  %v1510_v29 = vpop.permute.xlu1 %1509 }
 0x5f2   : > { %v4300_v10 = vadd.f32 %v1608_v39, %v1510_v29  ;;  %v4302_v50 = vadd.f32 %v1610_v26, %v1510_v29  ;;  %v2852_v39 = vld [vmem:[%s5414_s0 + $0x40] sm:$0xff] }
 0x5f4   : > { %5706 = vst [vmem:[#allocation16_spill] sm:$0xff] %v4300_v10  ;;  %5707 = vst [vmem:[#allocation11_spill] sm:$0xff] %v4302_v50  ;;  %v2889_v10 = vld [vmem:[%s5414_s0 + $0x180] sm:$0xff]  ;;  %v2890_v50 = vld [vmem:[%s5414_s0 + $0x190] sm:$0xff] }
 0x5f8   : > { %2516 = vmatmul.mubr.msk.bf16.gmra.mrb[48].mxu1 %vm643_vm2, %v1642_v59  ;;  %v2851_v59 = vld [vmem:[%s5414_s0 + $0x38] sm:$0xff] }
 0x5f9   : > { %1835 = vmatprep.mubr.bf16.mxu1 %v5701_v43 }
 0x600   : > { %2517 = vmatmul.mubr.msk.bf16.gmra.mrb[52].mxu1 %vm643_vm2, %v1643_v30 }
 0x601   : > { %1845 = vmatprep.mubr.bf16.mxu1 %v5701_v43 }
 0x608   : > { %2518 = vmatmul.mubr.msk.bf16.gmra.mrb[56].mxu1 %vm643_vm2, %v1644_v11 }
 0x609   : > { %1855 = vmatprep.mubr.bf16.mxu1 %v5701_v43 }
 0x610   : > { %2519 = vmatmul.mubr.msk.bf16.gmra.mrb[60].mxu1 %vm643_vm2, %v1645_v46 }
 0x611   : > { %1865 = vmatprep.mubr.bf16.mxu1 %v5701_v43 }
 0x618   : > { %2520 = vmatmul.mubr.msk.bf16.gmra.mrb[64].mxu1 %vm643_vm2, %v1646_v49 }
 0x619   : > { %1875 = vmatprep.mubr.bf16.mxu1 %v5701_v43 }
 0x620   : > { %2521 = vmatmul.mubr.msk.bf16.gmra.mrb[68].mxu1 %vm643_vm2, %v1647_v12 }
 0x621   : > { %1885 = vmatprep.mubr.bf16.mxu1 %v5701_v43 }
 0x628   : > { %2522 = vmatmul.mubr.msk.bf16.gmra.mrb[72].mxu1 %vm643_vm2, %v1648_v62 }
 0x629   : > { %2370 = vmatprep.mubr.bf16.mxu1 %v2335_v54 }
 0x683   : > { %v1737_v24 = vpop.f32.mrb[12].mxu1 }
 0x684   : > { %v1739_v2 = vpop.f32.mrb[13].mxu1  ;;  %v4322_v13 = vadd.f32 %v2844_v21, %v1737_v24  ;;  %v2858_v21 = vld [vmem:[%s5414_s0 + $0x70] sm:$0xff] }
 0x685   : > { %v1741_v45 = vpop.f32.mrb[14].mxu1  ;;  %v4332_v35 = vadd.f32 %v2846_v61, %v1739_v2  ;;  %v2857_v2 = vld [vmem:[%s5414_s0 + $0x68] sm:$0xff] }
 0x686   : > { %v1743_v20 = vpop.f32.mrb[15].mxu1  ;;  %v4342_v40 = vadd.f32 %v2848_v27, %v1741_v45 }
 0x687   : > { %v4354_v16 = vadd.f32 %v2850_v3, %v1743_v20 }
 0x68b   : > { %v1747_v9 = vpop.f32.mrb[16].mxu1 }
 0x68c   : > { %v4327_v57 = vadd.f32 %v2845_v36, %v1747_v9  ;;  %v1749_v43 = vpop.f32.mrb[17].mxu1 }
 0x68d   : > { %v4337_v23 = vadd.f32 %v2847_v4, %v1749_v43  ;;  %v1751_v38 = vpop.f32.mrb[18].mxu1  ;;  %v2859_v4 = vld [vmem:[%s5414_s0 + $0x78] sm:$0xff] }
 0x68e   : > { %v1896_v34 = vmax.f32 %v4322_v13, %v4327_v57  ;;  %v4349_v18 = vadd.f32 %v2849_v56, %v1751_v38  ;;  %v1753_v7 = vpop.f32.mrb[19].mxu1 }
 0x68f   : > { %v1933_v5 = vmax.f32 %v4332_v35, %v4337_v23  ;;  %v4361_v32 = vadd.f32 %v2851_v59, %v1753_v7  ;;  %v2860_v7 = vld [vmem:[%s5414_s0 + $0x80] sm:$0xff]  ;;  %v2861_v59 = vld [vmem:[%s5414_s0 + $0x88] sm:$0xff] }
 0x690   : > { %v1897_v58 = vmax.f32 %v4342_v40, %v4349_v18 }
 0x691   : > { %v1934_v37 = vmax.f32 %v4354_v16, %v4361_v32 }
 0x693   : > { %v1757_v30 = vpop.f32.mrb[20].mxu1 }
 0x694   : > { %v4370_v26 = vadd.f32 %v2852_v39, %v1757_v30  ;;  %v1759_v11 = vpop.f32.mrb[21].mxu1  ;;  %v2862_v39 = vld [vmem:[%s5414_s0 + $0x90] sm:$0xff] }
 0x695   : > { %v4375_v46 = vadd.f32 %v2853_v47, %v1759_v11  ;;  %v1761_v53 = vpop.f32.mrb[22].mxu1 }
 0x696   : > { %v1898_v49 = vmax.f32 %v1896_v34, %v4370_v26  ;;  %v4381_v12 = vadd.f32 %v2854_v52, %v1761_v53  ;;  %v1763_v62 = vpop.f32.mrb[23].mxu1 }
 0x697   : > { %v1935_v8 = vmax.f32 %v1933_v5, %v4375_v46  ;;  %v4387_v0 = vadd.f32 %v2855_v28, %v1763_v62 }
 0x698   : > { %v1899_v51 = vmax.f32 %v1897_v58, %v4381_v12 }
 0x699   : > { %v1936_v60 = vmax.f32 %v1934_v37, %v4387_v0 }
 0x69b   : > { %v1767_v54 = vpop.f32.mrb[24].mxu1 }
 0x69c   : > { %v4394_v29 = vadd.f32 %v2856_v19, %v1767_v54  ;;  %v1769_v24 = vpop.f32.mrb[25].mxu1  ;;  %v2865_v19 = vld [vmem:[%s5414_s0 + $0xa8] sm:$0xff] }
 0x69d   : > { %v4399_v45 = vadd.f32 %v2857_v2, %v1769_v24  ;;  %v1771_v20 = vpop.f32.mrb[26].mxu1 }
 0x69e   : > { %v1900_v9 = vmax.f32 %v1898_v49, %v4394_v29  ;;  %v4405_v36 = vadd.f32 %v2858_v21, %v1771_v20  ;;  %v1773_v43 = vpop.f32.mrb[27].mxu1  ;;  %v2863_v49 = vld [vmem:[%s5414_s0 + $0x98] sm:$0xff] }
 0x69f   : > { %v1937_v61 = vmax.f32 %v1935_v8, %v4399_v45  ;;  %v4411_v38 = vadd.f32 %v2859_v4, %v1773_v43  ;;  %v2867_v4 = vld [vmem:[%s5414_s0 + $0xb8] sm:$0xff] }
 0x6a0   : > { %v1901_v27 = vmax.f32 %v1899_v51, %v4405_v36  ;;  %v2864_v51 = vld [vmem:[%s5414_s0 + $0xa0] sm:$0xff] }
 0x6a1   : > { %v1938_v34 = vmax.f32 %v1936_v60, %v4411_v38 }
 0x6a3   : > { %v1777_v56 = vpop.f32.mrb[28].mxu1 }
 0x6a4   : > { %v4418_v3 = vadd.f32 %v2860_v7, %v1777_v56  ;;  %v1779_v5 = vpop.f32.mrb[29].mxu1 }
 0x6a5   : > { %v4423_v58 = vadd.f32 %v2861_v59, %v1779_v5  ;;  %v1781_v37 = vpop.f32.mrb[30].mxu1  ;;  %v2868_v5 = vld [vmem:[%s5414_s0 + $0xc0] sm:$0xff] }
 0x6a6   : > { %v1902_v30 = vmax.f32 %v1900_v9, %v4418_v3  ;;  %v4429_v11 = vadd.f32 %v2862_v39, %v1781_v37  ;;  %v1783_v47 = vpop.f32.mrb[31].mxu1  ;;  %v2866_v9 = vld [vmem:[%s5414_s0 + $0xb0] sm:$0xff] }
 0x6a7   : > { %v1939_v53 = vmax.f32 %v1937_v61, %v4423_v58  ;;  %v4435_v52 = vadd.f32 %v2863_v49, %v1783_v47  ;;  %v2870_v49 = vld [vmem:[%s5414_s0 + $0xd0] sm:$0xff] }
 0x6a8   : > { %v1903_v62 = vmax.f32 %v1901_v27, %v4429_v11 }
 0x6a9   : > { %v1940_v8 = vmax.f32 %v1938_v34, %v4435_v52 }
 0x6ab   : > { %v1787_v28 = vpop.f32.mrb[32].mxu1 }
 0x6ac   : > { %v4442_v60 = vadd.f32 %v2864_v51, %v1787_v28  ;;  %v1789_v54 = vpop.f32.mrb[33].mxu1  ;;  %v2871_v51 = vld [vmem:[%s5414_s0 + $0xd8] sm:$0xff] }
 0x6ad   : > { %v4447_v24 = vadd.f32 %v2865_v19, %v1789_v54  ;;  %v1791_v2 = vpop.f32.mrb[34].mxu1 }
 0x6ae   : > { %v1904_v20 = vmax.f32 %v1902_v30, %v4442_v60  ;;  %v4453_v21 = vadd.f32 %v2866_v9, %v1791_v2  ;;  %v1793_v43 = vpop.f32.mrb[35].mxu1  ;;  %v2869_v30 = vld [vmem:[%s5414_s0 + $0xc8] sm:$0xff]  ;;  %v2872_v9 = vld [vmem:[%s5414_s0 + $0xe0] sm:$0xff] }
 0x6af   : > { %5708 = vst [vmem:[#allocation12_spill] sm:$0xff] %v4447_v24  ;;  %v1941_v61 = vmax.f32 %v1939_v53, %v4447_v24  ;;  %v4459_v27 = vadd.f32 %v2867_v4, %v1793_v43 }
 0x6b0   : > { %v1905_v34 = vmax.f32 %v1903_v62, %v4453_v21 }
 0x6b1   : > { %5709 = vst [vmem:[#allocation17_spill] sm:$0xff] %v4459_v27  ;;  %v1942_v56 = vmax.f32 %v1940_v8, %v4459_v27 }
 0x6b3   : > { %v1797_v7 = vpop.f32.mrb[36].mxu1 }
 0x6b4   : > { %v4466_v59 = vadd.f32 %v2868_v5, %v1797_v7  ;;  %v1799_v37 = vpop.f32.mrb[37].mxu1 }
 0x6b5   : > { %v4471_v39 = vadd.f32 %v2869_v30, %v1799_v37  ;;  %v1801_v47 = vpop.f32.mrb[38].mxu1 }
 0x6b6   : > { %v1906_v53 = vmax.f32 %v1904_v20, %v4466_v59  ;;  %v4477_v62 = vadd.f32 %v2870_v49, %v1801_v47  ;;  %v1803_v8 = vpop.f32.mrb[39].mxu1  ;;  %v2875_v49 = vld [vmem:[%s5414_s0 + $0xf8] sm:$0xff] }
 0x6b7   : > { %5710 = vst [vmem:[#allocation18_spill] sm:$0xff] %v4471_v39  ;;  %v1943_v28 = vmax.f32 %v1941_v61, %v4471_v39  ;;  %v4483_v54 = vadd.f32 %v2871_v51, %v1803_v8  ;;  %v2873_v61 = vld [vmem:[%s5414_s0 + $0xe8] sm:$0xff] }
 0x6b8   : > { %v1907_v19 = vmax.f32 %v1905_v34, %v4477_v62  ;;  %v2874_v34 = vld [vmem:[%s5414_s0 + $0xf0] sm:$0xff] }
 0x6b9   : > { %5711 = vst [vmem:[#allocation13_spill] sm:$0xff] %v4483_v54  ;;  %v1944_v2 = vmax.f32 %v1942_v56, %v4483_v54 }
 0x6bb   : > { %v1807_v20 = vpop.f32.mrb[40].mxu1 }
 0x6bc   : > { %v4490_v43 = vadd.f32 %v2872_v9, %v1807_v20  ;;  %v1809_v4 = vpop.f32.mrb[41].mxu1  ;;  %v2876_v9 = vld [vmem:[%s5414_s0 + $0x100] sm:$0xff] }
 0x6bd   : > { %v4495_v7 = vadd.f32 %v2873_v61, %v1809_v4  ;;  %v1811_v5 = vpop.f32.mrb[42].mxu1 }
 0x6be   : > { %v1908_v37 = vmax.f32 %v1906_v53, %v4490_v43  ;;  %v4501_v56 = vadd.f32 %v2874_v34, %v1811_v5  ;;  %v1813_v30 = vpop.f32.mrb[43].mxu1 }
 0x6bf   : > { %5712 = vst [vmem:[#allocation14_spill] sm:$0xff] %v4495_v7  ;;  %v1945_v47 = vmax.f32 %v1943_v28, %v4495_v7  ;;  %v4507_v8 = vadd.f32 %v2875_v49, %v1813_v30  ;;  %v2877_v28 = vld [vmem:[%s5414_s0 + $0x108] sm:$0xff] }
 0x6c0   : > { %v1909_v51 = vmax.f32 %v1907_v19, %v4501_v56  ;;  %v2878_v19 = vld [vmem:[%s5414_s0 + $0x110] sm:$0xff] }
 0x6c1   : > { %5713 = vst [vmem:[#allocation19_spill] sm:$0xff] %v4507_v8  ;;  %v1946_v20 = vmax.f32 %v1944_v2, %v4507_v8 }
 0x6c3   : > { %v1817_v53 = vpop.f32.mrb[44].mxu1 }
 0x6c4   : > { %v4514_v4 = vadd.f32 %v2876_v9, %v1817_v53  ;;  %v1819_v61 = vpop.f32.mrb[45].mxu1  ;;  %v2879_v9 = vld [vmem:[%s5414_s0 + $0x118] sm:$0xff] }
 0x6c5   : > { %v4519_v5 = vadd.f32 %v2877_v28, %v1819_v61  ;;  %v1821_v34 = vpop.f32.mrb[46].mxu1 }
 0x6c6   : > { %v1910_v30 = vmax.f32 %v1908_v37, %v4514_v4  ;;  %v4525_v2 = vadd.f32 %v2878_v19, %v1821_v34  ;;  %v1823_v49 = vpop.f32.mrb[47].mxu1 }
 0x6c7   : > { %5714 = vst [vmem:[#allocation26_spill] sm:$0xff] %v4519_v5  ;;  %v1947_v53 = vmax.f32 %v1945_v47, %v4519_v5  ;;  %v4531_v14 = vadd.f32 %v2879_v9, %v1823_v49  ;;  %v2881_v47 = vld [vmem:[%s5414_s0 + $0x128] sm:$0xff] }
 0x6c8   : > { %v1911_v61 = vmax.f32 %v1909_v51, %v4525_v2  ;;  %v2882_v51 = vld [vmem:[%s5414_s0 + $0x130] sm:$0xff] }
 0x6c9   : > { %5715 = vst [vmem:[#allocation20_spill] sm:$0xff] %v4531_v14  ;;  %v1948_v28 = vmax.f32 %v1946_v20, %v4531_v14 }
 0x6cb   : > { %v1827_v37 = vpop.f32.mrb[48].mxu1 }
 0x6cc   : > { %v4538_v34 = vadd.f32 %v2880_v48, %v1827_v37  ;;  %v1829_v19 = vpop.f32.mrb[49].mxu1  ;;  %v2883_v37 = vld [vmem:[%s5414_s0 + $0x138] sm:$0xff] }
 0x6cd   : > { %v4543_v15 = vadd.f32 %v2881_v47, %v1829_v19  ;;  %v1831_v49 = vpop.f32.mrb[50].mxu1 }
 0x6ce   : > { %v1912_v9 = vmax.f32 %v1910_v30, %v4538_v34  ;;  %v4549_v20 = vadd.f32 %v2882_v51, %v1831_v49  ;;  %v1833_v41 = vpop.f32.mrb[51].mxu1 }
 0x6cf   : > { %5716 = vst [vmem:[#allocation3_spill] sm:$0xff] %v4543_v15  ;;  %v1949_v48 = vmax.f32 %v1947_v53, %v4543_v15  ;;  %v4555_v42 = vadd.f32 %v2883_v37, %v1833_v41  ;;  %v2885_v53 = vld [vmem:[%s5414_s0 + $0x148] sm:$0xff] }
 0x6d0   : > { %v1913_v19 = vmax.f32 %v1911_v61, %v4549_v20  ;;  %v2886_v61 = vld [vmem:[%s5414_s0 + $0x150] sm:$0xff] }
 0x6d1   : > { %5717 = vst [vmem:[#allocation2_spill] sm:$0xff] %v4555_v42  ;;  %v1950_v47 = vmax.f32 %v1948_v28, %v4555_v42 }
 0x6d3   : > { %v1837_v30 = vpop.f32.mrb[52].mxu1 }
 0x6d4   : > { %v4562_v49 = vadd.f32 %v2884_v55, %v1837_v30  ;;  %v1839_v51 = vpop.f32.mrb[53].mxu1 }
 0x6d5   : > { %v4567_v44 = vadd.f32 %v2885_v53, %v1839_v51  ;;  %v1841_v41 = vpop.f32.mrb[54].mxu1  ;;  %v2887_v51 = vld [vmem:[%s5414_s0 + $0x160] sm:$0xff] }
 0x6d6   : > { %v1914_v37 = vmax.f32 %v1912_v9, %v4562_v49  ;;  %v4573_v28 = vadd.f32 %v2886_v61, %v1841_v41  ;;  %v1843_v33 = vpop.f32.mrb[55].mxu1  ;;  %v2888_v41 = vld [vmem:[%s5414_s0 + $0x170] sm:$0xff] }
 0x6d7   : > { %5718 = vst [vmem:[#allocation7_spill] sm:$0xff] %v4567_v44  ;;  %v1951_v55 = vmax.f32 %v1949_v48, %v4567_v44 }
 0x6d8   : > { %v1915_v30 = vmax.f32 %v1913_v19, %v4573_v28 }
 0x6db   : > { %v1847_v6 = vpop.f32.mrb[56].mxu1 }
 0x6dc   : > { %v4580_v53 = vadd.f32 %v2887_v51, %v1847_v6  ;;  %v1849_v25 = vpop.f32.mrb[57].mxu1 }
 0x6dd   : > { %v1851_v9 = vpop.f32.mrb[58].mxu1 }
 0x6de   : > { %v1916_v22 = vmax.f32 %v1914_v37, %v4580_v53  ;;  %v4586_v61 = vadd.f32 %v2888_v41, %v1851_v9  ;;  %v1853_v48 = vpop.f32.mrb[59].mxu1 }
 0x6e0   : > { %v1917_v19 = vmax.f32 %v1915_v30, %v4586_v61  ;;  %v2891_v30 = vld [vmem:[%s5414_s0 + $0x158] sm:$0xff] }
 0x6e1   : > { %v4603_v63 = vadd.f32 %v2891_v30, %v1843_v33 }
 0x6e3   : > { %v1857_v1 = vpop.f32.mrb[60].mxu1  ;;  %5719 = vst [vmem:[#allocation6_spill] sm:$0xff] %v4603_v63  ;;  %v1952_v30 = vmax.f32 %v1950_v47, %v4603_v63 }
 0x6e4   : > { %v4592_v6 = vadd.f32 %v2889_v10, %v1857_v1  ;;  %v1859_v51 = vpop.f32.mrb[61].mxu1  ;;  %v2892_v1 = vld [vmem:[%s5414_s0 + $0x168] sm:$0xff] }
 0x6e5   : > { %v1861_v17 = vpop.f32.mrb[62].mxu1  ;;  %v4608_v10 = vadd.f32 %v2892_v1, %v1849_v25  ;;  %v4619_v33 = vadd.f32 %v2894_v31, %v1859_v51  ;;  %v2895_v25 = vld [vmem:[%s5414_s0 + $0x198] sm:$0xff] }
 0x6e6   : > { %v1918_v37 = vmax.f32 %v1916_v22, %v4592_v6  ;;  %v4598_v9 = vadd.f32 %v2890_v50, %v1861_v17  ;;  %v1863_v41 = vpop.f32.mrb[63].mxu1  ;;  %v2893_v17 = vld [vmem:[%s5414_s0 + $0x178] sm:$0xff] }
 0x6e7   : > { %5720 = vst [vmem:[#allocation5_spill] sm:$0xff] %v4608_v10  ;;  %v4614_v50 = vadd.f32 %v2893_v17, %v1853_v48  ;;  %5722 = vst [vmem:[#allocation30_spill] sm:$0xff] %v4619_v33  ;;  %v1953_v44 = vmax.f32 %v1951_v55, %v4608_v10  ;;  %v2896_v48 = vld [vmem:[%s5414_s0 + $0x1a0] sm:$0xff]  ;;  %v2897_v55 = vld [vmem:[%s5414_s0 + $0x1a8] sm:$0xff] }
 0x6e8   : > { %v1919_v22 = vmax.f32 %v1917_v19, %v4598_v9  ;;  %v4626_v19 = vadd.f32 %v2895_v25, %v1863_v41  ;;  %v2898_v10 = vld [vmem:[%s5414_s0 + $0x1b0] sm:$0xff] }
 0x6e9   : > { %5721 = vst [vmem:[#allocation4_spill] sm:$0xff] %v4614_v50  ;;  %v1954_v31 = vmax.f32 %v1952_v30, %v4614_v50  ;;  %v1955_v47 = vmax.f32 %v1953_v44, %v4619_v33  ;;  %v2899_v33 = vld [vmem:[%s5414_s0 + $0x1b8] sm:$0xff] }
 0x6ea   : > { %5723 = vst [vmem:[#allocation31_spill] sm:$0xff] %v4626_v19 }
 0x6eb   : > { %v1867_v1 = vpop.f32.mrb[64].mxu1  ;;  %v1956_v30 = vmax.f32 %v1954_v31, %v4626_v19 }
 0x6ec   : > { %v4631_v17 = vadd.f32 %v2896_v48, %v1867_v1  ;;  %v1869_v42 = vpop.f32.mrb[65].mxu1 }
 0x6ed   : > { %v4638_v51 = vadd.f32 %v2897_v55, %v1869_v42  ;;  %v1871_v41 = vpop.f32.mrb[66].mxu1 }
 0x6ee   : > { %v1920_v25 = vmax.f32 %v1918_v37, %v4631_v17  ;;  %v4644_v1 = vadd.f32 %v2898_v10, %v1871_v41  ;;  %v1873_v48 = vpop.f32.mrb[67].mxu1  ;;  %v2900_v10 = vld [vmem:[%s5414_s0 + $0x1c0] sm:$0xff] }
 0x6ef   : > { %5724 = vst [vmem:[#allocation32_spill] sm:$0xff] %v4638_v51  ;;  %v1957_v44 = vmax.f32 %v1955_v47, %v4638_v51  ;;  %v4651_v42 = vadd.f32 %v2899_v33, %v1873_v48  ;;  %v2901_v47 = vld [vmem:[%s5414_s0 + $0x1c8] sm:$0xff]  ;;  %v2904_v51 = vld [vmem:[%s5414_s0 + $0x1e0] sm:$0xff] }
 0x6f0   : > { %v1921_v55 = vmax.f32 %v1919_v22, %v4644_v1  ;;  %v2902_v22 = vld [vmem:[%s5414_s0 + $0x1d0] sm:$0xff] }
 0x6f1   : > { %5725 = vst [vmem:[#allocation33_spill] sm:$0xff] %v4651_v42  ;;  %v1958_v37 = vmax.f32 %v1956_v30, %v4651_v42 }
 0x6f3   : > { %v1877_v50 = vpop.f32.mrb[68].mxu1 }
 0x6f4   : > { %v4658_v41 = vadd.f32 %v2900_v10, %v1877_v50  ;;  %v1879_v31 = vpop.f32.mrb[69].mxu1  ;;  %v2903_v10 = vld [vmem:[%s5414_s0 + $0x1d8] sm:$0xff] }
 0x6f5   : > { %v4663_v19 = vadd.f32 %v2901_v47, %v1879_v31  ;;  %v1881_v33 = vpop.f32.mrb[70].mxu1 }
 0x6f6   : > { %v1922_v48 = vmax.f32 %v1920_v25, %v4658_v41  ;;  %v4669_v30 = vadd.f32 %v2902_v22, %v1881_v33  ;;  %v1883_v63 = vpop.f32.mrb[71].mxu1 }
 0x6f7   : > { %5726 = vst [vmem:[#allocation34_spill] sm:$0xff] %v4663_v19  ;;  %v1959_v50 = vmax.f32 %v1957_v44, %v4663_v19  ;;  %v4675_v42 = vadd.f32 %v2903_v10, %v1883_v63  ;;  %v2905_v44 = vld [vmem:[%s5414_s0 + $0x1e8] sm:$0xff] }
 0x6f8   : > { %v1923_v31 = vmax.f32 %v1921_v55, %v4669_v30  ;;  %v2906_v55 = vld [vmem:[%s5414_s0 + $0x1f0] sm:$0xff] }
 0x6f9   : > { %5727 = vst [vmem:[#allocation35_spill] sm:$0xff] %v4675_v42  ;;  %v1960_v47 = vmax.f32 %v1958_v37, %v4675_v42 }
 0x6fb   : > { %v1887_v25 = vpop.f32.mrb[72].mxu1 }
 0x6fc   : > { %v4682_v33 = vadd.f32 %v2904_v51, %v1887_v25  ;;  %v1889_v22 = vpop.f32.mrb[73].mxu1  ;;  %v2907_v25 = vld [vmem:[%s5414_s0 + $0x1f8] sm:$0xff] }
 0x6fd   : > { %v4687_v19 = vadd.f32 %v2905_v44, %v1889_v22  ;;  %v1891_v63 = vpop.f32.mrb[74].mxu1 }
 0x6fe   : > { %v1924_v10 = vmax.f32 %v1922_v48, %v4682_v33  ;;  %v4693_v37 = vadd.f32 %v2906_v55, %v1891_v63  ;;  %v1893_v42 = vpop.f32.mrb[75].mxu1 }
 0x6ff   : > { %5728 = vst [vmem:[#allocation36_spill] sm:$0xff] %v4687_v19  ;;  %v1961_v51 = vmax.f32 %v1959_v50, %v4687_v19  ;;  %v4699_v15 = vadd.f32 %v2907_v25, %v1893_v42 }
 0x700   : > { %v1925_v22 = vmax.f32 %v1923_v31, %v4693_v37 }
 0x701   : > { %v1962_v44 = vmax.f32 %v1960_v47, %v4699_v15 }
 0x702   : > { %v1926_v48 = vmax.f32 %v1924_v10, %v1925_v22 }
 0x703   : > { %v1963_v14 = vmax.f32 %v1961_v51, %v1962_v44 }
 0x704   : > { %v1927_v5 = vrot.slane %v1926_v48, 4 }
 0x705   : > { %v1964_v8 = vrot.slane %v1963_v14, 4 }
 0x706   : > { %v1928_v7 = vmax.f32 %v1926_v48, %v1927_v5 }
 0x707   : > { %v1965_v63 = vmax.f32 %v1963_v14, %v1964_v8 }
 0x708   : > { %v1929_v55 = vrot.slane %v1928_v7, 2 }
 0x709   : > { %v1966_v54 = vrot.slane %v1965_v63, 2 }
 0x70a   : > { %v1930_v39 = vmax.f32 %v1928_v7, %v1929_v55  ;;  %v5738_v7 = vld [vmem:[#allocation3_spill] sm:$0xff] }
 0x70b   : > { %v1967_v50 = vmax.f32 %v1965_v63, %v1966_v54  ;;  %v5737_v63 = vld [vmem:[#allocation20_spill] sm:$0xff] }
 0x70c   : > { %v1931_v19 = vrot.slane %v1930_v39, 1 }
 0x70d   : > { %v1968_v27 = vrot.slane %v1967_v50, 1 }
 0x70e   : > { %v4703_v24 = vmax.f32 %v1930_v39, %v1931_v19 }
 0x70f   : > { %v4705_v42 = vmax.f32 %v1967_v50, %v1968_v27 }
 0x710   : > { %v1970_v31 = vsub.f32 %v4322_v13, %v4703_v24  ;;  %v1972_v47 = vsub.f32 %v4342_v40, %v4703_v24  ;;  %v1974_v5 = vsub.f32 %v4327_v57, %v4703_v24  ;;  %v1976_v14 = vsub.f32 %v4349_v18, %v4703_v24 }
 0x711   : > { %v1978_v54 = vsub.f32 %v4370_v26, %v4703_v24  ;;  %v1980_v39 = vsub.f32 %v4381_v12, %v4703_v24  ;;  %v1982_v27 = vsub.f32 %v4394_v29, %v4703_v24  ;;  %v1984_v13 = vsub.f32 %v4405_v36, %v4703_v24 }
 0x712   : > { %v1986_v40 = vsub.f32 %v4418_v3, %v4703_v24  ;;  %v1988_v57 = vsub.f32 %v4429_v11, %v4703_v24  ;;  %v1990_v18 = vsub.f32 %v4442_v60, %v4703_v24  ;;  %v1992_v26 = vsub.f32 %v4453_v21, %v4703_v24  ;;  %v5744_v3 = vld [vmem:[#allocation33_spill] sm:$0xff]  ;;  %v5746_v21 = vld [vmem:[#allocation35_spill] sm:$0xff] }
 0x713   : > { %v1994_v12 = vsub.f32 %v4466_v59, %v4703_v24  ;;  %v2034_v51 = vmul.f32 1.442695, %v1970_v31  ;;  %v2038_v48 = vmul.f32 1.442695, %v1972_v47  ;;  %v2042_v10 = vmul.f32 1.442695, %v1974_v5 }
 0x714   : > { %v2046_v50 = vmul.f32 1.442695, %v1976_v14  ;;  %v2050_v25 = vmul.f32 1.442695, %v1978_v54  ;;  %v2054_v19 = vmul.f32 1.442695, %v1980_v39  ;;  %v5748_v29 = vsub.f32 %v4477_v62, %v4703_v24 }
 0x715   : > { %2704 = vpow2.f32 %v2034_v51  ;;  %v2058_v22 = vmul.f32 1.442695, %v1982_v27  ;;  %v2062_v8 = vmul.f32 1.442695, %v1984_v13  ;;  %v2066_v54 = vmul.f32 1.442695, %v1986_v40 }
 0x716   : > { %2706 = vpow2.f32 %v2038_v48  ;;  %v5730_v40 = vld [vmem:[#allocation17_spill] sm:$0xff]  ;;  %v2070_v44 = vmul.f32 1.442695, %v1988_v57  ;;  %v5731_v27 = vld [vmem:[#allocation18_spill] sm:$0xff]  ;;  %v5735_v48 = vld [vmem:[#allocation19_spill] sm:$0xff]  ;;  %v5751_v62 = vsub.f32 %v4514_v4, %v4703_v24  ;;  %v5755_v4 = vsub.f32 %v4354_v16, %v4705_v42 }
 0x717   : > { %2708 = vpow2.f32 %v2042_v10  ;;  %v5732_v13 = vld [vmem:[#allocation13_spill] sm:$0xff]  ;;  %v5734_v51 = vld [vmem:[#allocation14_spill] sm:$0xff]  ;;  %v2078_v5 = vmul.f32 1.442695, %v1992_v26  ;;  %v2082_v60 = vmul.f32 1.442695, %v1994_v12 }
 0x718   : > { %2710 = vpow2.f32 %v2046_v50  ;;  %v5736_v57 = vld [vmem:[#allocation26_spill] sm:$0xff]  ;;  %v5741_v50 = vld [vmem:[#allocation7_spill] sm:$0xff]  ;;  %v5747_v14 = vld [vmem:[#allocation36_spill] sm:$0xff]  ;;  %v2086_v47 = vmul.f32 1.442695, %v5748_v29 }
 0x719   : > { %2712 = vpow2.f32 %v2050_v25  ;;  %v5729_v25 = vld [vmem:[#allocation12_spill] sm:$0xff]  ;;  %v5740_v31 = vld [vmem:[#allocation2_spill] sm:$0xff]  ;;  %v2098_v29 = vmul.f32 1.442695, %v5751_v62 }
 0x71a   : > { %2714 = vpow2.f32 %v2054_v19 }
 0x71b   : > { %2716 = vpow2.f32 %v2058_v22 }
 0x71c   : > { %2718 = vpow2.f32 %v2062_v8  ;;  %v2074_v8 = vmul.f32 1.442695, %v1990_v18 }
 0x71d   : > { %2720 = vpow2.f32 %v2066_v54  ;;  %v5743_v54 = vld [vmem:[#allocation32_spill] sm:$0xff] }
 0x71e   : > { %2722 = vpow2.f32 %v2070_v44 }
 0x71f   : > { %v4783_v10 = vpop.eup %2704  ;;  %2724 = vpow2.f32 %v2074_v8 }
 0x720   : > { %v4791_v19 = vpop.eup %2706  ;;  %2726 = vpow2.f32 %v2078_v5  ;;  %v5750_v5 = vsub.f32 %v4501_v56, %v4703_v24 }
 0x721   : > { %v2162_v39 = vadd.f32 %v4791_v19, %v4783_v10  ;;  %v4805_v22 = vpop.eup %2708  ;;  %2728 = vpow2.f32 %v2082_v60 }
 0x722   : > { %5733 = vst [vmem:[#allocation12_spill] sm:$0xff] %v4805_v22  ;;  %v4818_v11 = vpop.eup %2710  ;;  %2730 = vpow2.f32 %v2086_v47  ;;  %v5753_v47 = vsub.f32 %v4332_v35, %v4705_v42  ;;  %v5758_v35 = vsub.f32 %v4337_v23, %v4705_v42 }
 0x723   : > { %v2163_v55 = vadd.f32 %v4805_v22, %v2162_v39  ;;  %5739 = vst [vmem:[#allocation17_spill] sm:$0xff] %v4818_v11  ;;  %v4828_v36 = vpop.eup %2712 }
 0x724   : > { %5742 = vst [vmem:[#allocation18_spill] sm:$0xff] %v4828_v36  ;;  %v4843_v44 = vpop.eup %2714  ;;  %v2036_v56 = vmul.f32 1.442695, %v5753_v47 }
 0x725   : > { %v2164_v39 = vadd.f32 %v4818_v11, %v2163_v55  ;;  %v5745_v55 = vld [vmem:[#allocation34_spill] sm:$0xff]  ;;  %v5749_v11 = vsub.f32 %v4490_v43, %v4703_v24  ;;  %v5752_v43 = vsub.f32 %v4525_v2, %v4703_v24 }
 0x727   : > { %v2165_v18 = vadd.f32 %v4828_v36, %v2164_v39  ;;  %v4852_v39 = vpop.eup %2716  ;;  %v2090_v26 = vmul.f32 1.442695, %v5749_v11  ;;  %v2102_v11 = vmul.f32 1.442695, %v5752_v43 }
 0x728   : > { %v4858_v36 = vpop.eup %2718 }
 0x729   : > { %v2166_v12 = vadd.f32 %v4843_v44, %v2165_v18  ;;  %v4864_v22 = vpop.eup %2720  ;;  %v2094_v18 = vmul.f32 1.442695, %v5750_v5  ;;  %2732 = vpow2.f32 %v2090_v26  ;;  %v5756_v26 = vsub.f32 %v4538_v34, %v4703_v24 }
 0x72a   : > { %v4873_v60 = vpop.eup %2722  ;;  %v5761_v34 = vsub.f32 %v4361_v32, %v4705_v42 }
 0x72b   : > { %v2167_v8 = vadd.f32 %v4852_v39, %v2166_v12  ;;  %v4882_v5 = vpop.eup %2724  ;;  %2734 = vpow2.f32 %v2094_v18  ;;  %v2106_v62 = vmul.f32 1.442695, %v5756_v26  ;;  %v5759_v18 = vsub.f32 %v4549_v20, %v4703_v24 }
 0x72c   : > { %5754 = vst [vmem:[#allocation13_spill] sm:$0xff] %v4882_v5  ;;  %2736 = vpow2.f32 %v2098_v29  ;;  %v4891_v43 = vpop.eup %2726  ;;  %v5764_v20 = vsub.f32 %v4375_v46, %v4705_v42 }
 0x72d   : > { %v2168_v59 = vadd.f32 %v4858_v36, %v2167_v8  ;;  %5757 = vst [vmem:[#allocation14_spill] sm:$0xff] %v4891_v43  ;;  %2738 = vpow2.f32 %v2102_v11  ;;  %v2110_v47 = vmul.f32 1.442695, %v5759_v18  ;;  %v4900_v29 = vpop.eup %2728  ;;  %v5762_v11 = vsub.f32 %v4562_v49, %v4703_v24 }
 0x72e   : > { %2740 = vpow2.f32 %v2036_v56  ;;  %5760 = vst [vmem:[#allocation19_spill] sm:$0xff] %v4900_v29  ;;  %v4909_v26 = vpop.eup %2730  ;;  %v2052_v56 = vmul.f32 1.442695, %v5764_v20  ;;  %v5766_v49 = vsub.f32 %v4387_v0, %v4705_v42  ;;  %v5769_v0 = vsub.f32 %v4586_v61, %v4703_v24 }
 0x72f   : > { %v2169_v12 = vadd.f32 %v4864_v22, %v2168_v59  ;;  %v2040_v59 = vmul.f32 1.442695, %v5755_v4  ;;  %v2114_v23 = vmul.f32 1.442695, %v5762_v11  ;;  %5763 = vst [vmem:[#allocation26_spill] sm:$0xff] %v4909_v26 }
 0x731   : > { %v2170_v8 = vadd.f32 %v4873_v60, %v2169_v12  ;;  %v2044_v12 = vmul.f32 1.442695, %v5758_v35  ;;  %2742 = vpow2.f32 %v2040_v59  ;;  %v5765_v59 = vsub.f32 %v4573_v28, %v4703_v24 }
 0x732   : > { %2744 = vpow2.f32 %v2106_v62  ;;  %v2056_v35 = vmul.f32 1.442695, %v5766_v49  ;;  %v5768_v28 = vsub.f32 %v4399_v45, %v4705_v42  ;;  %v5771_v45 = vsub.f32 %v4592_v6, %v4703_v24 }
 0x733   : > { %v2171_v2 = vadd.f32 %v4882_v5, %v2170_v8  ;;  %v2048_v8 = vmul.f32 1.442695, %v5761_v34  ;;  %2746 = vpow2.f32 %v2044_v12  ;;  %v2118_v32 = vmul.f32 1.442695, %v5765_v59 }
 0x734   : > { %2748 = vpow2.f32 %v2110_v47  ;;  %v5767_v12 = vsub.f32 %v4580_v53, %v4703_v24 }
 0x735   : > { %v2172_v16 = vadd.f32 %v4891_v43, %v2171_v2  ;;  %v4918_v2 = vpop.eup %2732  ;;  %2750 = vpow2.f32 %v2048_v8  ;;  %v2126_v8 = vmul.f32 1.442695, %v5769_v0 }
 0x736   : > { %2752 = vpow2.f32 %v2114_v23  ;;  %v2122_v46 = vmul.f32 1.442695, %v5767_v12  ;;  %v4927_v47 = vpop.eup %2734  ;;  %v5770_v23 = vsub.f32 %v4411_v38, %v4705_v42  ;;  %v5773_v38 = vsub.f32 %v4598_v9, %v4703_v24 }
 0x737   : > { %v2173_v4 = vadd.f32 %v4900_v29, %v2172_v16  ;;  %2754 = vpow2.f32 %v2052_v56  ;;  %v2060_v16 = vmul.f32 1.442695, %v5768_v28  ;;  %v4932_v34 = vpop.eup %2736  ;;  %v2130_v56 = vmul.f32 1.442695, %v5771_v45 }
 0x738   : > { %2756 = vpow2.f32 %v2118_v32  ;;  %v4938_v53 = vpop.eup %2738  ;;  %v5772_v32 = vsub.f32 %v4423_v58, %v4705_v42  ;;  %v5777_v45 = vsub.f32 %v4644_v1, %v4703_v24 }
 0x739   : > { %v2174_v62 = vadd.f32 %v4909_v26, %v2173_v4  ;;  %2758 = vpow2.f32 %v2056_v35  ;;  %v2064_v4 = vmul.f32 1.442695, %v5770_v23  ;;  %v4943_v20 = vpop.eup %2740  ;;  %v2134_v35 = vmul.f32 1.442695, %v5773_v38 }
 0x73a   : > { %2760 = vpow2.f32 %v2122_v46  ;;  %v5776_v23 = vsub.f32 %v5729_v25, %v4705_v42 }
 0x73b   : > { %v2175_v18 = vadd.f32 %v4918_v2, %v2174_v62  ;;  %v4949_v61 = vpop.eup %2742  ;;  %2762 = vpow2.f32 %v2060_v16  ;;  %v2068_v62 = vmul.f32 1.442695, %v5772_v32  ;;  %v5775_v16 = vsub.f32 %v4631_v17, %v4703_v24 }
 0x73c   : > { %v4954_v49 = vpop.eup %2744  ;;  %2764 = vpow2.f32 %v2126_v8  ;;  %v2199_v6 = vadd.f32 %v4949_v61, %v4943_v20 }
 0x73d   : > { %v2176_v11 = vadd.f32 %v4927_v47, %v2175_v18  ;;  %v4962_v46 = vpop.eup %2746  ;;  %2766 = vpow2.f32 %v2064_v4  ;;  %v5774_v18 = vsub.f32 %v4435_v52, %v4705_v42  ;;  %v2138_v9 = vmul.f32 1.442695, %v5775_v16 }
 0x73e   : > { %v4967_v28 = vpop.eup %2748  ;;  %2768 = vpow2.f32 %v2130_v56  ;;  %v2200_v8 = vadd.f32 %v4962_v46, %v2199_v6  ;;  %v2076_v4 = vmul.f32 1.442695, %v5776_v23  ;;  %v2142_v56 = vmul.f32 1.442695, %v5777_v45 }
 0x73f   : > { %v2177_v59 = vadd.f32 %v4932_v34, %v2176_v11  ;;  %v2072_v58 = vmul.f32 1.442695, %v5774_v18  ;;  %v4974_v11 = vpop.eup %2750  ;;  %2770 = vpow2.f32 %v2068_v62  ;;  %v5778_v62 = vsub.f32 %v5730_v40, %v4705_v42 }
 0x740   : > { %v4979_v52 = vpop.eup %2752  ;;  %2772 = vpow2.f32 %v2134_v35  ;;  %v5779_v35 = vsub.f32 %v4658_v41, %v4703_v24 }
 0x741   : > { %v2178_v12 = vadd.f32 %v4938_v53, %v2177_v59  ;;  %v2201_v59 = vadd.f32 %v4974_v11, %v2200_v8  ;;  %v4986_v32 = vpop.eup %2754  ;;  %2774 = vpow2.f32 %v2072_v58  ;;  %v2080_v38 = vmul.f32 1.442695, %v5778_v62 }
 0x742   : > { %v4991_v25 = vpop.eup %2756  ;;  %2776 = vpow2.f32 %v2138_v9  ;;  %v5780_v58 = vsub.f32 %v5731_v27, %v4705_v42  ;;  %v5781_v9 = vsub.f32 %v4669_v30, %v4703_v24 }
 0x743   : > { %v2179_v0 = vadd.f32 %v4954_v49, %v2178_v12  ;;  %v2146_v12 = vmul.f32 1.442695, %v5779_v35  ;;  %v2202_v6 = vadd.f32 %v4986_v32, %v2201_v59  ;;  %v4998_v18 = vpop.eup %2758  ;;  %2778 = vpow2.f32 %v2076_v4 }
 0x744   : > { %v2084_v16 = vmul.f32 1.442695, %v5780_v58  ;;  %v5003_v40 = vpop.eup %2760  ;;  %2780 = vpow2.f32 %v2142_v56  ;;  %v5782_v4 = vsub.f32 %v5732_v13, %v4705_v42  ;;  %v5783_v56 = vsub.f32 %v4682_v33, %v4703_v24 }
 0x745   : > { %v2180_v17 = vadd.f32 %v4967_v28, %v2179_v0  ;;  %v2150_v0 = vmul.f32 1.442695, %v5781_v9  ;;  %v2203_v8 = vadd.f32 %v4998_v18, %v2202_v6  ;;  %v5010_v23 = vpop.eup %2762  ;;  %2782 = vpow2.f32 %v2080_v38 }
 0x746   : > { %v2088_v45 = vmul.f32 1.442695, %v5782_v4  ;;  %v5015_v27 = vpop.eup %2764  ;;  %2784 = vpow2.f32 %v2146_v12  ;;  %v5784_v38 = vsub.f32 %v5734_v51, %v4705_v42  ;;  %v5785_v12 = vsub.f32 %v4693_v37, %v4703_v24 }
 0x747   : > { %v2181_v1 = vadd.f32 %v4979_v52, %v2180_v17  ;;  %v2154_v17 = vmul.f32 1.442695, %v5783_v56  ;;  %v2204_v59 = vadd.f32 %v5010_v23, %v2203_v8  ;;  %v5022_v62 = vpop.eup %2766  ;;  %2786 = vpow2.f32 %v2084_v16 }
 0x748   : > { %v2092_v35 = vmul.f32 1.442695, %v5784_v38  ;;  %v5027_v13 = vpop.eup %2768  ;;  %2788 = vpow2.f32 %v2150_v0  ;;  %v5786_v16 = vsub.f32 %v5735_v48, %v4705_v42  ;;  %v5787_v37 = vsub.f32 %v5736_v57, %v4705_v42 }
 0x749   : > { %v2182_v41 = vadd.f32 %v4991_v25, %v2181_v1  ;;  %v2158_v1 = vmul.f32 1.442695, %v5785_v12  ;;  %v2205_v6 = vadd.f32 %v5022_v62, %v2204_v59  ;;  %v5034_v58 = vpop.eup %2770  ;;  %2790 = vpow2.f32 %v2088_v45 }
 0x74a   : > { %v2096_v9 = vmul.f32 1.442695, %v5786_v16  ;;  %v5039_v51 = vpop.eup %2772  ;;  %2792 = vpow2.f32 %v2154_v17  ;;  %v2100_v8 = vmul.f32 1.442695, %v5787_v37  ;;  %v5789_v17 = vsub.f32 %v5737_v63, %v4705_v42 }
 0x74b   : > { %v2183_v30 = vadd.f32 %v5003_v40, %v2182_v41  ;;  %v2206_v41 = vadd.f32 %v5034_v58, %v2205_v6  ;;  %v5043_v24 = vpop.eup %2774  ;;  %2794 = vpow2.f32 %v2092_v35  ;;  %v5791_v12 = vsub.f32 %v5738_v7, %v4705_v42 }
 0x74c   : > { %v5048_v4 = vpop.eup %2776  ;;  %2796 = vpow2.f32 %v2158_v1 }
 0x74d   : > { %v2184_v33 = vadd.f32 %v5015_v27, %v2183_v30  ;;  %v2207_v45 = vadd.f32 %v5043_v24, %v2206_v41  ;;  %v5052_v56 = vpop.eup %2778  ;;  %2798 = vpow2.f32 %v2096_v9  ;;  %v2104_v30 = vmul.f32 1.442695, %v5789_v17  ;;  %v5793_v9 = vld [vmem:[#allocation6_spill] sm:$0xff]  ;;  %v5796_v17 = vld [vmem:[#allocation5_spill] sm:$0xff] }
 0x74e   : > { %5788 = vst [vmem:[#allocation20_spill] sm:$0xff] %v5052_v56  ;;  %v5057_v59 = vpop.eup %2780  ;;  %2800 = vpow2.f32 %v2100_v8  ;;  %v2108_v1 = vmul.f32 1.442695, %v5791_v12  ;;  %v5794_v41 = vsub.f32 %v5740_v31, %v4705_v42 }
 0x74f   : > { %v2185_v0 = vadd.f32 %v5027_v13, %v2184_v33  ;;  %v2208_v57 = vadd.f32 %v5052_v56, %v2207_v45  ;;  %v5061_v35 = vpop.eup %2782  ;;  %2802 = vpow2.f32 %v2104_v30 }
 0x750   : > { %5790 = vst [vmem:[#allocation3_spill] sm:$0xff] %v5061_v35  ;;  %v5066_v33 = vpop.eup %2784  ;;  %v2112_v37 = vmul.f32 1.442695, %v5794_v41  ;;  %2804 = vpow2.f32 %v2108_v1 }
 0x751   : > { %v2186_v48 = vadd.f32 %v5039_v51, %v2185_v0  ;;  %v2209_v63 = vadd.f32 %v5061_v35, %v2208_v57  ;;  %v5070_v16 = vpop.eup %2786  ;;  %v2013_v0 = vsub.f32 %v5793_v9, %v4705_v42  ;;  %v5797_v57 = vsub.f32 %v5741_v50, %v4705_v42 }
 0x752   : > { %5792 = vst [vmem:[#allocation2_spill] sm:$0xff] %v5070_v16  ;;  %v5077_v8 = vpop.eup %2788  ;;  %2806 = vpow2.f32 %v2112_v37 }
 0x753   : > { %v2187_v38 = vadd.f32 %v5048_v4, %v2186_v48  ;;  %v2210_v48 = vadd.f32 %v5070_v16, %v2209_v63  ;;  %v5081_v45 = vpop.eup %2790  ;;  %v2116_v30 = vmul.f32 1.442695, %v5797_v57  ;;  %v2120_v26 = vmul.f32 1.442695, %v2013_v0  ;;  %v5799_v57 = vld [vmem:[#allocation30_spill] sm:$0xff]  ;;  %v5800_v0 = vld [vmem:[#allocation31_spill] sm:$0xff] }
 0x754   : > { %5795 = vst [vmem:[#allocation7_spill] sm:$0xff] %v5081_v45  ;;  %v5088_v12 = vpop.eup %2792  ;;  %v2021_v37 = vsub.f32 %v5800_v0, %v4705_v42 }
 0x755   : > { %v2188_v6 = vadd.f32 %v5057_v59, %v2187_v38  ;;  %v2015_v38 = vsub.f32 %v5796_v17, %v4705_v42  ;;  %v2211_v9 = vadd.f32 %v5081_v45, %v2210_v48  ;;  %v5092_v41 = vpop.eup %2794  ;;  %2808 = vpow2.f32 %v2116_v30 }
 0x756   : > { %v5096_v29 = vpop.eup %2796  ;;  %2810 = vpow2.f32 %v2120_v26  ;;  %v5801_v26 = vsub.f32 %v5743_v54, %v4705_v42  ;;  %v5803_v54 = vsub.f32 %v5745_v55, %v4705_v42 }
 0x757   : > { %v2189_v7 = vadd.f32 %v5066_v33, %v2188_v6  ;;  %v5798_v6 = vld [vmem:[#allocation4_spill] sm:$0xff]  ;;  %v2212_v50 = vadd.f32 %v5092_v41, %v2211_v9  ;;  %v5100_v17 = vpop.eup %2798  ;;  %v2124_v48 = vmul.f32 1.442695, %v2015_v38 }
 0x758   : > { %v2017_v63 = vsub.f32 %v5798_v6, %v4705_v42  ;;  %v5106_v6 = vpop.eup %2800 }
 0x759   : > { %v2190_v31 = vadd.f32 %v5077_v8, %v2189_v7  ;;  %v2019_v7 = vsub.f32 %v5799_v57, %v4705_v42  ;;  %v2213_v16 = vadd.f32 %v5100_v17, %v2212_v50  ;;  %v5111_v5 = vpop.eup %2802  ;;  %2812 = vpow2.f32 %v2124_v48 }
 0x75a   : > { %v2136_v50 = vmul.f32 1.442695, %v2021_v37 }
 0x75b   : > { %v2191_v1 = vadd.f32 %v5088_v12, %v2190_v31  ;;  %v2128_v31 = vmul.f32 1.442695, %v2017_v63  ;;  %v2214_v9 = vadd.f32 %v5106_v6, %v2213_v16  ;;  %v2132_v57 = vmul.f32 1.442695, %v2019_v7 }
 0x75c   : > { %v2140_v16 = vmul.f32 1.442695, %v5801_v26 }
 0x75d   : > { %v2192_v45 = vadd.f32 %v5096_v29, %v2191_v1  ;;  %v2215_v38 = vadd.f32 %v5111_v5, %v2214_v9  ;;  %v5114_v1 = vpop.eup %2804  ;;  %2814 = vpow2.f32 %v2128_v31 }
 0x75e   : > { %v5117_v0 = vpop.eup %2806  ;;  %2816 = vpow2.f32 %v2132_v57  ;;  %v2148_v57 = vmul.f32 1.442695, %v5803_v54 }
 0x75f   : > { %v2193_v43 = vrot.slane %v2192_v45, 4  ;;  %v2216_v56 = vadd.f32 %v5114_v1, %v2215_v38  ;;  %2818 = vpow2.f32 %v2136_v50 }
 0x760   : > { %2820 = vpow2.f32 %v2140_v16  ;;  %v5805_v16 = vsub.f32 %v5747_v14, %v4705_v42 }
 0x761   : > { %v2194_v30 = vadd.f32 %v2193_v43, %v2192_v45  ;;  %v2217_v7 = vadd.f32 %v5117_v0, %v2216_v56  ;;  %v5123_v43 = vpop.eup %2808  ;;  %v5802_v45 = vsub.f32 %v5744_v3, %v4705_v42  ;;  %v5804_v56 = vsub.f32 %v5746_v21, %v4705_v42 }
 0x762   : > { %v5129_v9 = vpop.eup %2810  ;;  %v2156_v55 = vmul.f32 1.442695, %v5805_v16 }
 0x763   : > { %v2195_v35 = vrot.slane %v2194_v30, 2  ;;  %v2144_v48 = vmul.f32 1.442695, %v5802_v45  ;;  %v2218_v31 = vadd.f32 %v5123_v43, %v2217_v7  ;;  %v5138_v38 = vpop.eup %2812  ;;  %v5806_v45 = vsub.f32 %v4699_v15, %v4705_v42 }
 0x765   : > { %v2196_v63 = vadd.f32 %v2195_v35, %v2194_v30  ;;  %v2152_v35 = vmul.f32 1.442695, %v5804_v56  ;;  %v2219_v30 = vadd.f32 %v5129_v9, %v2218_v31  ;;  %2822 = vpow2.f32 %v2144_v48 }
 0x766   : > { %2824 = vpow2.f32 %v2148_v57 }
 0x767   : > { %v2197_v37 = vrot.slane %v2196_v63, 1  ;;  %v2220_v50 = vadd.f32 %v5138_v38, %v2219_v30  ;;  %v5141_v26 = vpop.eup %2814  ;;  %2826 = vpow2.f32 %v2152_v35 }
 0x768   : > { %v5147_v21 = vpop.eup %2816 }
 0x769   : > { %v2198_v3 = vadd.f32 %v2197_v37, %v2196_v63  ;;  %v2221_v7 = vadd.f32 %v5141_v26, %v2220_v50  ;;  %v2160_v63 = vmul.f32 1.442695, %v5806_v45  ;;  %v5153_v37 = vpop.eup %2818 }
 0x76a   : > { %v5156_v54 = vpop.eup %2820 }
 0x76b   : > { %2828 = vrcp.f32 %v2198_v3  ;;  %v2222_v48 = vadd.f32 %v5147_v21, %v2221_v7 }
 0x76c   : > { %2830 = vpow2.f32 %v2156_v55 }
 0x76d   : > { %v2223_v31 = vadd.f32 %v5153_v37, %v2222_v48  ;;  %2832 = vpow2.f32 %v2160_v63 }
 0x76f   : > { %v2224_v14 = vadd.f32 %v5156_v54, %v2223_v31  ;;  %v5159_v57 = vpop.eup %2822 }
 0x770   : > { %v5162_v35 = vpop.eup %2824 }
 0x771   : > { %v2225_v56 = vadd.f32 %v5159_v57, %v2224_v14  ;;  %v5164_v15 = vpop.eup %2826 }
 0x773   : > { %v2226_v42 = vadd.f32 %v5162_v35, %v2225_v56 }
 0x775   : > { %v5167_v30 = vpop.eup %2828  ;;  %v2227_v3 = vadd.f32 %v5164_v15, %v2226_v42 }
 0x776   : > { %v5170_v50 = vpop.eup %2830  ;;  %v5175_v55 = vmul.f32 %v5167_v30, %v4918_v2  ;;  %v5179_v7 = vmul.f32 %v5167_v30, %v4927_v47  ;;  %v5185_v63 = vmul.f32 %v5167_v30, %v4932_v34  ;;  %v5189_v48 = vmul.f32 %v5167_v30, %v4938_v53 }
 0x777   : > { %v2228_v16 = vadd.f32 %v5170_v50, %v2227_v3  ;;  %v5181_v45 = vpop.eup %2832  ;;  %v5196_v14 = vmul.f32 %v5167_v30, %v4954_v49  ;;  %v5200_v47 = vmul.f32 %v5167_v30, %v4967_v28  ;;  %v5206_v53 = vmul.f32 %v5167_v30, %v4979_v52 }
 0x778   : > { %v5210_v56 = vmul.f32 %v5167_v30, %v4991_v25  ;;  %v5214_v42 = vmul.f32 %v5167_v30, %v5003_v40  ;;  %v5220_v3 = vmul.f32 %v5167_v30, %v5015_v27  ;;  %v5224_v52 = vmul.f32 %v5167_v30, %v5027_v13 }
 0x779   : > { %v2229_v31 = vadd.f32 %v5181_v45, %v2228_v16  ;;  %v5230_v16 = vmul.f32 %v5167_v30, %v5039_v51  ;;  %v5234_v40 = vmul.f32 %v5167_v30, %v5048_v4  ;;  %v5238_v28 = vmul.f32 %v5167_v30, %v5057_v59 }
 0x77a   : > { %5807 = vst [vmem:[#allocation32_spill] sm:$0xff] %v5224_v52  ;;  %v5244_v34 = vmul.f32 %v5167_v30, %v5066_v33  ;;  %v5248_v51 = vmul.f32 %v5167_v30, %v5077_v8  ;;  %v5256_v59 = vmul.f32 %v5167_v30, %v5088_v12  ;;  %v2238_v12 = vmul.f32 %v5167_v30, %v4783_v10  ;;  %v5811_v52 = vld [vmem:[#allocation17_spill] sm:$0xff] }
 0x77b   : > { %v2230_v49 = vrot.slane %v2229_v31, 4  ;;  %5808 = vst [vmem:[#allocation33_spill] sm:$0xff] %v5234_v40  ;;  %5809 = vst [vmem:[#allocation34_spill] sm:$0xff] %v5238_v28  ;;  %v5810_v40 = vld [vmem:[#allocation12_spill] sm:$0xff] }
 0x77c   : > { %v2242_v28 = vmul.f32 %v5167_v30, %v5810_v40 }
 0x77d   : > { %v2231_v27 = vadd.f32 %v2230_v49, %v2229_v31  ;;  %v5260_v31 = vmul.f32 %v5167_v30, %v5096_v29  ;;  %v2240_v29 = vmul.f32 %v5167_v30, %v4791_v19  ;;  %v2244_v49 = vmul.f32 %v5167_v30, %v5811_v52 }
 0x77f   : > { %v2232_v33 = vrot.slane %v2231_v27, 2  ;;  %v2302_v52 = vpack.c.bf16 %v2240_v29, %v2238_v12 }
 0x781   : > { %v2233_v13 = vadd.f32 %v2232_v33, %v2231_v27  ;;  %v5812_v33 = vld [vmem:[#allocation18_spill] sm:$0xff] }
 0x783   : > { %v2234_v4 = vrot.slane %v2233_v13, 1 }
 0x785   : > { %v2235_v2 = vadd.f32 %v2234_v4, %v2233_v13 }
 0x787   : > { %2834 = vrcp.f32 %v2235_v2 }
 0x791   : > { %v5266_v25 = vpop.eup %2834 }
 0x792   : > { %v2239_v27 = vmul.f32 %v5266_v25, %v4943_v20  ;;  %v2241_v2 = vmul.f32 %v5266_v25, %v4949_v61  ;;  %v2243_v13 = vmul.f32 %v5266_v25, %v4962_v46  ;;  %v2245_v10 = vmul.f32 %v5266_v25, %v4974_v11 }
 0x793   : > { %v2247_v19 = vmul.f32 %v5266_v25, %v4986_v32  ;;  %v2249_v40 = vmul.f32 %v5266_v25, %v4998_v18  ;;  %v2246_v20 = vmul.f32 %v5167_v30, %v5812_v33  ;;  %v2248_v61 = vmul.f32 %v5167_v30, %v4843_v44 }
 0x794   : > { %v2303_v4 = vpack.c.bf16 %v2241_v2, %v2239_v27  ;;  %v2250_v46 = vmul.f32 %v5167_v30, %v4852_v39  ;;  %v2305_v8 = vpack.c.bf16 %v2245_v10, %v2243_v13  ;;  %v2304_v11 = vpack.c.bf16 %v2244_v49, %v2242_v28 }
 0x795   : > { %v2251_v27 = vmul.f32 %v5266_v25, %v5010_v23  ;;  %v5298_v32 = vmul.f32 %v5266_v25, %v5092_v41  ;;  %v2253_v18 = vmul.f32 %v5266_v25, %v5022_v62  ;;  %v2269_v44 = vmul.f32 %v5266_v25, %v5100_v17 }
 0x796   : > { %2338 = vmatprep.subr.bf16.mxu1 %v2303_v4  ;;  %v2271_v39 = vmul.f32 %v5266_v25, %v5106_v6  ;;  %v2273_v28 = vmul.f32 %v5266_v25, %v5111_v5  ;;  %v2307_v49 = vpack.c.bf16 %v2249_v40, %v2247_v19  ;;  %v2275_v23 = vmul.f32 %v5266_v25, %v5114_v1 }
 0x797   : > { %2339 = vmatpush1.bf16.msra.mxu1 %v2302_v52  ;;  %v2277_v41 = vmul.f32 %v5266_v25, %v5117_v0  ;;  %v2279_v62 = vmul.f32 %v5266_v25, %v5123_v43  ;;  %v2317_v12 = vpack.c.bf16 %v2269_v44, %v5298_v32  ;;  %v2281_v6 = vmul.f32 %v5266_v25, %v5129_v9  ;;  %v5817_v44 = vld [vmem:[#allocation2_spill] sm:$0xff] }
 0x798   : > { %2340 = vmatprep.subr.bf16.mxu1 %v2305_v8  ;;  %v2319_v17 = vpack.c.bf16 %v2273_v28, %v2271_v39  ;;  %v2283_v5 = vmul.f32 %v5266_v25, %v5138_v38  ;;  %v2285_v29 = vmul.f32 %v5266_v25, %v5141_v26  ;;  %v2287_v1 = vmul.f32 %v5266_v25, %v5147_v21  ;;  %v5818_v39 = vld [vmem:[#allocation7_spill] sm:$0xff] }
 0x799   : > { %v2321_v8 = vpack.c.bf16 %v2277_v41, %v2275_v23  ;;  %v2289_v0 = vmul.f32 %v5266_v25, %v5153_v37  ;;  %v2323_v43 = vpack.c.bf16 %v2281_v6, %v2279_v62  ;;  %v2291_v2 = vmul.f32 %v5266_v25, %v5156_v54  ;;  %v5819_v23 = vld [vmem:[#allocation19_spill] sm:$0xff]  ;;  %v5820_v62 = vld [vmem:[#allocation26_spill] sm:$0xff] }
 0x79a   : > { %v2293_v9 = vmul.f32 %v5266_v25, %v5159_v57  ;;  %v2295_v38 = vmul.f32 %v5266_v25, %v5162_v35  ;;  %v2325_v13 = vpack.c.bf16 %v2285_v29, %v2283_v5  ;;  %v2297_v21 = vmul.f32 %v5266_v25, %v5164_v15 }
 0x79b   : > { %2341 = vmatpush1.bf16.msra.mxu1 %v2304_v11  ;;  %v2327_v26 = vpack.c.bf16 %v2289_v0, %v2287_v1  ;;  %v2299_v37 = vmul.f32 %v5266_v25, %v5170_v50  ;;  %v2306_v10 = vpack.c.bf16 %v2248_v61, %v2246_v20  ;;  %v2252_v4 = vmul.f32 %v5167_v30, %v4858_v36  ;;  %v5814_v11 = vld [vmem:[#allocation3_spill] sm:$0xff] }
 0x79c   : > { %2342 = vmatprep.subr.bf16.mxu1 %v2307_v49  ;;  %v2329_v54 = vpack.c.bf16 %v2293_v9, %v2291_v2  ;;  %v2301_v57 = vmul.f32 %v5266_v25, %v5181_v45  ;;  %v2309_v19 = vpack.c.bf16 %v2253_v18, %v2251_v27  ;;  %v2255_v35 = vmul.f32 %v5266_v25, %v5034_v58  ;;  %v5813_v45 = vld [vmem:[#allocation20_spill] sm:$0xff]  ;;  %v5815_v27 = vld [vmem:[#allocation13_spill] sm:$0xff]  ;;  %v5840_v2 = vld [vmem:[#allocation10_spill] sm:$0xff] }
 0x79d   : > { %v2257_v40 = vmul.f32 %v5266_v25, %v5043_v24  ;;  %v2331_v52 = vpack.c.bf16 %v2297_v21, %v2295_v38  ;;  %v2308_v50 = vpack.c.bf16 %v2252_v4, %v2250_v46  ;;  %v2254_v33 = vmul.f32 %v5167_v30, %v4864_v22  ;;  %v5816_v46 = vld [vmem:[#allocation14_spill] sm:$0xff]  ;;  %v5843_v38 = vld [vmem:[#allocation28_spill] sm:$0xff]  ;;  %v5844_v21 = vld [vmem:[#allocation27_spill] sm:$0xff] }
 0x79e   : > { %v2333_v15 = vpack.c.bf16 %v2301_v57, %v2299_v37  ;;  %v2256_v36 = vmul.f32 %v5167_v30, %v4873_v60  ;;  %v2259_v61 = vmul.f32 %v5266_v25, %v5813_v45  ;;  %v2261_v58 = vmul.f32 %v5266_v25, %v5814_v11  ;;  %v5845_v4 = vld [vmem:[#allocation29_spill] sm:$0xff]  ;;  %v5849_v45 = vld [vmem:[#allocation24_spill] sm:$0xff] }
 0x79f   : > { %2343 = vmatpush1.bf16.msra.mxu1 %v2306_v10  ;;  %v2311_v20 = vpack.c.bf16 %v2257_v40, %v2255_v35  ;;  %v2258_v32 = vmul.f32 %v5167_v30, %v5815_v27  ;;  %v2260_v18 = vmul.f32 %v5167_v30, %v5816_v46  ;;  %v2263_v60 = vmul.f32 %v5266_v25, %v5817_v44 }
 0x7a0   : > { %2344 = vmatprep.subr.bf16.mxu1 %v2309_v19  ;;  %v2310_v24 = vpack.c.bf16 %v2256_v36, %v2254_v33  ;;  %v2313_v22 = vpack.c.bf16 %v2261_v58, %v2259_v61  ;;  %v2265_v28 = vmul.f32 %v5266_v25, %v5818_v39  ;;  %v2262_v41 = vmul.f32 %v5167_v30, %v5819_v23  ;;  %v5846_v19 = vld [vmem:[#allocation25_spill] sm:$0xff]  ;;  %v5848_v33 = vld [vmem:[#allocation22_spill] sm:$0xff] }
 0x7a1   : > { %v2312_v49 = vpack.c.bf16 %v2260_v18, %v2258_v32  ;;  %v2264_v6 = vmul.f32 %v5167_v30, %v5820_v62  ;;  %v5821_v1 = vpack.c.bf16 %v5179_v7, %v5175_v55  ;;  %v5822_v25 = vpack.c.bf16 %v5189_v48, %v5185_v63  ;;  %v5826_v7 = vld [vmem:[#allocation32_spill] sm:$0xff]  ;;  %v5828_v48 = vld [vmem:[#allocation34_spill] sm:$0xff] }
 0x7a2   : > { %v2315_v5 = vpack.c.bf16 %v2265_v28, %v2263_v60  ;;  %v5823_v0 = vpack.c.bf16 %v5200_v47, %v5196_v14  ;;  %v5824_v30 = vpack.c.bf16 %v5210_v56, %v5206_v53  ;;  %v5825_v55 = vpack.c.bf16 %v5220_v3, %v5214_v42  ;;  %v5829_v14 = vld [vmem:[#allocation33_spill] sm:$0xff]  ;;  %v5833_v42 = vld [vmem:[#allocation8_spill] sm:$0xff] }
 0x7a3   : > { %2345 = vmatpush1.bf16.msra.mxu1 %v2308_v50  ;;  %v2314_v29 = vpack.c.bf16 %v2264_v6, %v2262_v41  ;;  %v5827_v63 = vpack.c.bf16 %v5230_v16, %v5826_v7  ;;  %v5830_v47 = vpack.c.bf16 %v5828_v48, %v5829_v14  ;;  %v5831_v53 = vpack.c.bf16 %v5248_v51, %v5244_v34  ;;  %v5834_v3 = vld [vmem:[#allocation9_spill] sm:$0xff]  ;;  %v5836_v16 = vld [vmem:[#allocation11_spill] sm:$0xff] }
 0x7a4   : > { %2346 = vmatprep.subr.bf16.mxu1 %v2311_v20  ;;  %v5832_v56 = vpack.c.bf16 %v5260_v31, %v5256_v59  ;;  %v5842_v51 = vld [vmem:[#allocation21_spill] sm:$0xff] }
 0x7a7   : > { %2347 = vmatpush1.bf16.msra.mxu1 %v2310_v24 }
 0x7a8   : > { %2348 = vmatprep.subr.bf16.mxu1 %v2313_v22 }
 0x7ab   : > { %2349 = vmatpush1.bf16.msra.mxu1 %v2312_v49 }
 0x7ac   : > { %2350 = vmatprep.subr.bf16.mxu1 %v2315_v5 }
 0x7af   : > { %2351 = vmatpush1.bf16.msra.mxu1 %v2314_v29 }
 0x7b0   : > { %2352 = vmatprep.subr.bf16.mxu1 %v2317_v12  ;;  %v5835_v12 = vpack.c.bf16 %v5833_v42, %v5834_v3 }
 0x7b3   : > { %2353 = vmatpush1.bf16.msra.mxu1 %v5821_v1 }
 0x7b4   : > { %2354 = vmatprep.subr.bf16.mxu1 %v2319_v17  ;;  %v5837_v17 = vld [vmem:[#allocation15_spill] sm:$0xff] }
 0x7b7   : > { %2355 = vmatpush1.bf16.msra.mxu1 %v5822_v25 }
 0x7b8   : > { %2356 = vmatprep.subr.bf16.mxu1 %v2321_v8  ;;  %v5838_v8 = vpack.c.bf16 %v5836_v16, %v5837_v17 }
 0x7bb   : > { %2357 = vmatpush1.bf16.msra.mxu1 %v5823_v0 }
 0x7bc   : > { %2358 = vmatprep.subr.bf16.mxu1 %v2323_v43  ;;  %v5839_v43 = vld [vmem:[#allocation16_spill] sm:$0xff] }
 0x7bd   : > { %v5841_v9 = vpack.c.bf16 %v5839_v43, %v5840_v2 }
 0x7bf   : > { %2359 = vmatpush1.bf16.msra.mxu1 %v5824_v30 }
 0x7c0   : > { %2360 = vmatprep.subr.bf16.mxu1 %v2325_v13 }
 0x7c3   : > { %2361 = vmatpush1.bf16.msra.mxu1 %v5825_v55 }
 0x7c4   : > { %2362 = vmatprep.subr.bf16.mxu1 %v2327_v26 }
 0x7c7   : > { %2363 = vmatpush1.bf16.msra.mxu1 %v5827_v63 }
 0x7c8   : > { %2364 = vmatprep.subr.bf16.mxu1 %v2329_v54 }
 0x7cb   : > { %2365 = vmatpush1.bf16.msra.mxu1 %v5830_v47 }
 0x7cc   : > { %2366 = vmatprep.subr.bf16.mxu1 %v2331_v52  ;;  %v5847_v52 = vld [vmem:[#allocation23_spill] sm:$0xff] }
 0x7cf   : > { %2367 = vmatpush1.bf16.msra.mxu1 %v5831_v53 }
 0x7d0   : > { %2368 = vmatprep.subr.bf16.mxu1 %v2333_v15 }
 0x7d3   : > { %2369 = vmatpush1.bf16.msra.mxu1 %v5832_v56 }
 0x7d6   : > { %2371 = vmatmul.mubr.bf16.vlgmr.msra.gmra.mrb[76].mxu1 %v5835_v12 }
 0x7d7   : > { %2380 = vmatprep.mubr.bf16.mxu1 %v5838_v8 }
 0x7de   : > { %2381 = vmatmul.mubr.bf16.gmra.mrb[80].mxu1 %v5841_v9 }
 0x8a9   : > { %v2372_v34 = vpop.f32.mrb[76].mxu1 }
 0x8aa   : > { %v2373_v59 = vadd.f32 %v2372_v34, %v5842_v51  ;;  %v2374_v31 = vpop.f32.mrb[77].mxu1 }
 0x8ab   : > { %v2375_v13 = vadd.f32 %v2374_v31, %v5843_v38  ;;  %v2376_v26 = vpop.f32.mrb[78].mxu1 }
 0x8ac   : > { %2391 = vst [vmem:[%s298_s30] sm:$0xff] %v2373_v59  ;;  %v2377_v37 = vadd.f32 %v2376_v26, %v5844_v21  ;;  %v2378_v10 = vpop.f32.mrb[79].mxu1 }
 0x8ad   : > { %2392 = vst [vmem:[%s298_s30 + $0x8] sm:$0xff] %v2375_v13  ;;  %v2379_v54 = vadd.f32 %v2378_v10, %v5845_v4 }
 0x8ae   : > { %2393 = vst [vmem:[%s298_s30 + $0x10] sm:$0xff] %v2377_v37 }
 0x8af   : > { %2394 = vst [vmem:[%s298_s30 + $0x18] sm:$0xff] %v2379_v54 }
 0x8b1   : > { %v2382_v57 = vpop.f32.mrb[80].mxu1 }
 0x8b2   : > { %v2383_v35 = vadd.f32 %v2382_v57, %v5846_v19  ;;  %v2384_v40 = vpop.f32.mrb[81].mxu1 }
 0x8b3   : > { %v2385_v15 = vadd.f32 %v2384_v40, %v5847_v52  ;;  %v2386_v50 = vpop.f32.mrb[82].mxu1 }
 0x8b4   : > { %2395 = vst [vmem:[%s298_s30 + $0x20] sm:$0xff] %v2383_v35  ;;  %v2387_v36 = vadd.f32 %v2386_v50, %v5848_v33  ;;  %v2388_v20 = vpop.f32.mrb[83].mxu1 }
 0x8b5   : > { %2396 = vst [vmem:[%s298_s30 + $0x28] sm:$0xff] %v2385_v15  ;;  %v2389_v61 = vadd.f32 %v2388_v20, %v5849_v45 }
 0x8b6   : > { %2397 = vst [vmem:[%s298_s30 + $0x30] sm:$0xff] %v2387_v36 }
 0x8b7   : > { %2398 = vst [vmem:[%s298_s30 + $0x38] sm:$0xff] %v2389_v61 }
 0x8b8 PF: > { %s17_s24 = sadd.s32 1, %s2914_s24  }
 0x8b9   : > { %p14_p4 = scmp.ge.s32.totalorder %s17_s24, 4  }
 0x8bb   :  { %16 = sbr.rel (!%p14_p4) target bundleno = 1 (0x1), region = 81 }

</bundles_post_ra>
